<compile_context>
chip_gen: v7x
topology: tpu7x:2x2x1
jax: 0.10.0
libtpu: 0.0.40
codegen_flags: <defaults>
</compile_context>

<pallas_src>
import functools

import jax
import jax.numpy as jnp
from jax.experimental import pallas as pl
from jax.experimental.pallas import tpu as pltpu


# ---------------------------------------------------------------------------
# Kernel
# ---------------------------------------------------------------------------

def make_gat_layer_kernel(offsets, widths, tm, activation):
    """Generic multi-group GATConv layer kernel.

    Each "group" g owns output columns [offsets[g], offsets[g]+widths[g]) of
    the head-concatenated linear transform and has its own attention map.
    Used both for the 8-head concat conv layers and for the 4 fused task heads
    (heads=1, concat=False each, so mean == the single head).
    """
    g = len(widths)

    def kernel(x_ref, adj_ref, w_ref, asel_ref, b_ref, o_ref):
        i = pl.program_id(0)

        x = x_ref[...]                                   # [Np, F_in]  (all source nodes)
        w = w_ref[...]                                   # [F_in, Dout]
        asel = asel_ref[...]                             # [Dout, 2g]  block-diag selector
        bias = b_ref[...]                                # [1, Dout]

        # Linear transform of all groups at once + source attention logits,
        # both on the MXU (replaces 2*g cross-lane reductions over
        # sub-128-lane slices of xw).
        xw = jnp.dot(x, w, preferred_element_type=jnp.float32)                # [Np, Dout]
        a_src = jnp.dot(xw, asel[:, :g], preferred_element_type=jnp.float32)  # [Np, g]

        # Destination-row logits for this dst tile only (tiny extra matmul;
        # avoids dynamically slicing a live vector value).
        row0 = pl.multiple_of(i * tm, 8)
        x_dst = x_ref[pl.ds(row0, tm), :]                                      # [tm, F_in]
        xw_dst = jnp.dot(x_dst, w, preferred_element_type=jnp.float32)         # [tm, Dout]
        a_dst = jnp.dot(xw_dst, asel[:, g:], preferred_element_type=jnp.float32)  # [tm, g]

        # adj[i, j] == 1  <=>  edge j -> i (self loops included).  Hoisted once.
        mask = adj_ref[...] > 0                                                # [tm, Np]

        for gi in range(g):
            off = offsets[gi]
            wd = widths[gi]

            # e[i, j] = leaky_relu(a_dst[i] + a_src[j], 0.2); masked softmax over j.
            a_src_row = jnp.transpose(a_src[:, gi:gi + 1])                     # [1, Np]
            e = a_dst[:, gi:gi + 1] + a_src_row                                # [tm, Np]
            e = jnp.where(e > 0, e, 0.2 * e)                                   # LeakyReLU(0.2)
            e = jnp.where(mask, e, jnp.float32(-1e30))

            m = jnp.max(e, axis=-1, keepdims=True)                             # [tm, 1]
            # exp(-1e30 - m) underflows to exactly 0, so no second mask select
            # is needed (every row has a self loop, so m is finite).
            p = jnp.exp(e - m)                                                 # [tm, Np]
            denom = jnp.sum(p, axis=-1, keepdims=True)                         # [tm, 1]

            # Aggregate with unnormalized weights (MXU), scale by 1/denom
            # afterwards: tm*out_c multiplies instead of a tm*N divide.
            agg = jnp.dot(p, xw[:, off:off + wd],
                          preferred_element_type=jnp.float32)                  # [tm, wd]
            out_g = agg * pl.reciprocal(denom, approx=True) + bias[:, off:off + wd]

            if activation == "elu":
                # Clamp before exp: avoids overflow-to-inf on the discarded branch.
                out_g = jnp.where(out_g > 0, out_g,
                                  jnp.exp(jnp.minimum(out_g, 0.0)) - 1.0)
            elif activation == "log_softmax":
                mm = jnp.max(out_g, axis=-1, keepdims=True)
                z = out_g - mm
                out_g = z - jnp.log(jnp.sum(jnp.exp(z), axis=-1, keepdims=True))

            # Stream each group's result straight into its output columns
            # (no jnp.concatenate; only one group's tile stays live).
            o_ref[:, off:off + wd] = out_g.astype(o_ref.dtype)

    return kernel


# ---------------------------------------------------------------------------
# Layer wrapper
# ---------------------------------------------------------------------------

def gat_layer(x, adj_b, w, asel, bias, *, offsets, widths, tm, activation):
    """One (possibly multi-group) GATConv layer, tiled over destination rows."""
    n_pad, f_in = x.shape
    out_dim = w.shape[1]
    g = len(widths)
    grid_n = n_pad // tm

    kernel = make_gat_layer_kernel(tuple(offsets), tuple(widths), tm, activation)

    cost = pl.CostEstimate(
        flops=int(grid_n * 2 * n_pad * f_in * out_dim        # xw (recomputed per tile)
                  + g * 8 * n_pad * n_pad                     # attention elementwise
                  + 2 * n_pad * n_pad * out_dim),             # aggregation matmuls
        transcendentals=int(g * n_pad * n_pad),
        bytes_accessed=int(n_pad * n_pad * 2                  # bf16 adjacency
                           + n_pad * (f_in + out_dim) * 4
                           + (f_in * out_dim + out_dim * (2 * g + 1)) * 4),
    )

    return pl.pallas_call(
        kernel,
        out_shape=jax.ShapeDtypeStruct((n_pad, out_dim), jnp.float32),
        grid_spec=pltpu.PrefetchScalarGridSpec(
            num_scalar_prefetch=0,
            grid=(grid_n,),
            in_specs=[
                pl.BlockSpec((n_pad, f_in), lambda i: (0, 0)),      # x (all nodes)
                pl.BlockSpec((tm, n_pad), lambda i: (i, 0)),        # adj dst-row tile
                pl.BlockSpec((f_in, out_dim), lambda i: (0, 0)),    # W
                pl.BlockSpec((out_dim, 2 * g), lambda i: (0, 0)),   # attention selector
                pl.BlockSpec((1, out_dim), lambda i: (0, 0)),       # bias
            ],
            out_specs=pl.BlockSpec((tm, out_dim), lambda i: (i, 0)),
        ),
        compiler_params=pltpu.CompilerParams(
            dimension_semantics=("parallel",),       # shards dst tiles across TCs (v7x)
            vmem_limit_bytes=32 * 1024 * 1024,       # explicit; TM sized to stay inside
        ),
        cost_estimate=cost,
    )(x, adj_b, w, asel, bias)


# ---------------------------------------------------------------------------
# Parameters (kernel-ready packing)
# ---------------------------------------------------------------------------

def _init_gatconv(key, in_c, out_c, heads):
    kw, ks, kd = jax.random.split(key, 3)
    scale = 1.0 / jnp.sqrt(jnp.float32(in_c))
    w = jax.random.normal(kw, (in_c, heads * out_c), jnp.float32) * scale
    att_src = jax.random.normal(ks, (heads, out_c), jnp.float32) * 0.1
    att_dst = jax.random.normal(kd, (heads, out_c), jnp.float32) * 0.1
    return w, att_src, att_dst


def _pack_selector(att_src_list, att_dst_list):
    """Block-diagonal selector so attention logits come from one MXU matmul."""
    widths = [int(v.shape[0]) for v in att_src_list]
    g = len(widths)
    dout = sum(widths)
    asel = jnp.zeros((dout, 2 * g), jnp.float32)
    off = 0
    for t in range(g):
        wd = widths[t]
        asel = asel.at[off:off + wd, t].set(att_src_list[t])
        asel = asel.at[off:off + wd, g + t].set(att_dst_list[t])
        off += wd
    return asel


def build_params(key, in_channels, hidden, heads, class_sizes):
    keys = jax.random.split(key, 2 + len(class_sizes))

    w1, s1, d1 = _init_gatconv(keys[0], in_channels, hidden, heads)
    w2, s2, d2 = _init_gatconv(keys[1], hidden * heads, hidden, heads)
    params = {
        "conv1": {"w": w1, "asel": _pack_selector(list(s1), list(d1)),
                  "bias": jnp.zeros((1, hidden * heads), jnp.float32)},
        "conv2": {"w": w2, "asel": _pack_selector(list(s2), list(d2)),
                  "bias": jnp.zeros((1, hidden * heads), jnp.float32)},
    }

    # Four single-head task heads fused into one set of packed parameters.
    ws, srcs, dsts = [], [], []
    for t, nc in enumerate(class_sizes):
        wt, st, dt = _init_gatconv(keys[2 + t], hidden * heads, nc, 1)
        ws.append(wt)
        srcs.append(st[0])
        dsts.append(dt[0])
    params["heads"] = {"w": jnp.concatenate(ws, axis=1),
                       "asel": _pack_selector(srcs, dsts),
                       "bias": jnp.zeros((1, sum(class_sizes)), jnp.float32)}
    return params


# ---------------------------------------------------------------------------
# Forward
# ---------------------------------------------------------------------------

def _round_up(a, b):
    return -(-a // b) * b


def _pad_graph(x, adj, tile_target):
    """Pad N so the dst-row tile divides it (16-aligned for the bf16 adj block)."""
    n = x.shape[0]
    if n <= tile_target:
        n_pad = _round_up(n, 16)
        tm = n_pad
    else:
        n_pad = _round_up(n, tile_target)
        tm = tile_target
    if n_pad != n:
        pad = n_pad - n
        x = jnp.pad(x, ((0, pad), (0, 0)))
        adj = jnp.pad(adj, ((0, pad), (0, pad)))
        # Self-loops for padded rows keep their masked softmax well defined;
        # padded columns stay 0 so they never leak into real rows.
        adj = adj + jnp.diag((jnp.arange(n_pad) >= n).astype(adj.dtype))
    return x, adj, n_pad, tm


@functools.partial(jax.jit,
                   static_argnames=("hidden", "heads", "class_sizes", "tile_target"))
def multitask_gat_forward(x, adj, params, *, hidden, heads, class_sizes,
                          tile_target=256):
    n = x.shape[0]
    x_p, adj_p, n_pad, tm = _pad_graph(x, adj, tile_target)
    # 0/1 mask is exact in bf16 and halves the dominant N^2 HBM stream.
    adj_b = adj_p.astype(jnp.bfloat16)

    conv_off = tuple(h * hidden for h in range(heads))
    conv_wid = (hidden,) * heads

    # F.dropout(p=0.6) -> identity in eval mode.
    h1 = gat_layer(x_p, adj_b, params["conv1"]["w"], params["conv1"]["asel"],
                   params["conv1"]["bias"], offsets=conv_off, widths=conv_wid,
                   tm=tm, activation="elu")
    # F.dropout(p=0.6) -> identity in eval mode.
    h2 = gat_layer(h1, adj_b, params["conv2"]["w"], params["conv2"]["asel"],
                   params["conv2"]["bias"], offsets=conv_off, widths=conv_wid,
                   tm=tm, activation=None)

    task_off = []
    off = 0
    for nc in class_sizes:
        task_off.append(off)
        off += nc
    logits = gat_layer(h2, adj_b, params["heads"]["w"], params["heads"]["asel"],
                       params["heads"]["bias"], offsets=tuple(task_off),
                       widths=tuple(class_sizes), tm=tm, activation="log_softmax")

    outs = []
    for t, nc in enumerate(class_sizes):
        outs.append(logits[:n, task_off[t]:task_off[t] + nc])
    return tuple(outs)


# ---------------------------------------------------------------------------
# Demo
# ---------------------------------------------------------------------------

if __name__ == "__main__":
    N = 16              # number of graph nodes
    E = 40              # number of directed edges
    IN_CHANNELS = 8
    HIDDEN = 8
    HEADS = 8
    NUM_CLASSES = {"TL": 4, "YL": 5, "TS": 6, "TZ": 3}
    class_sizes = tuple(NUM_CLASSES[k] for k in ("TL", "YL", "TS", "TZ"))

    root = jax.random.PRNGKey(0)
    kx, ksrc, kdst, kparams = jax.random.split(root, 4)

    x = jax.random.normal(kx, (N, IN_CHANNELS), jnp.float32)
    src = jax.random.randint(ksrc, (E,), 0, N)
    dst = jax.random.randint(kdst, (E,), 0, N)

    # Dense adjacency mask with self-loops (glue, plain JAX).
    adj = jnp.zeros((N, N), jnp.float32).at[dst, src].set(1.0)
    adj = jnp.maximum(adj, jnp.eye(N, dtype=jnp.float32))

    params = build_params(kparams, IN_CHANNELS, HIDDEN, HEADS, class_sizes)

    tl, yl, ts, tz = multitask_gat_forward(
        x, adj, params, hidden=HIDDEN, heads=HEADS, class_sizes=class_sizes)
    jax.block_until_ready((tl, yl, ts, tz))

    assert tl.shape == (N, NUM_CLASSES["TL"])
    assert yl.shape == (N, NUM_CLASSES["YL"])
    assert ts.shape == (N, NUM_CLASSES["TS"])
    assert tz.shape == (N, NUM_CLASSES["TZ"])
    for out in (tl, yl, ts, tz):
        assert bool(jnp.all(jnp.isfinite(out)))
        # log_softmax rows must sum to ~1 in prob space.
        assert bool(jnp.all(jnp.abs(jnp.sum(jnp.exp(out), axis=1) - 1.0) < 1e-4))

    print("KERNEL_OK")
</pallas_src>

<mosaic_0001>
module attributes {stable_mosaic.version = 11 : i64} {
  func.func @kernel(%arg0: i32, %arg1: memref<16x8xf32, #tpu.memory_space<vmem>>, %arg2: memref<16x16xbf16, #tpu.memory_space<vmem>>, %arg3: memref<8x64xf32, #tpu.memory_space<vmem>>, %arg4: memref<64x16xf32, #tpu.memory_space<vmem>>, %arg5: memref<1x64xf32, #tpu.memory_space<vmem>>, %arg6: memref<16x64xf32, #tpu.memory_space<vmem>>) attributes {dimension_semantics = [#tpu.dimension_semantics<parallel>], iteration_bounds = array<i64: 1>, scalar_prefetch = 0 : i64, scratch_operands = 0 : i64, tpu.core_type = #tpu.core_type<tc>, window_params = [{pipeline_mode = #tpu.pipeline_mode<synchronous>, transform_indices = @transform_0, window_bounds = array<i64: 16, 8>}, {transform_indices = @transform_1, window_bounds = array<i64: 16, 16>}, {pipeline_mode = #tpu.pipeline_mode<synchronous>, transform_indices = @transform_2, window_bounds = array<i64: 8, 64>}, {pipeline_mode = #tpu.pipeline_mode<synchronous>, transform_indices = @transform_3, window_bounds = array<i64: 64, 16>}, {pipeline_mode = #tpu.pipeline_mode<synchronous>, transform_indices = @transform_4, window_bounds = array<i64: 1, 64>}, {transform_indices = @transform_5, window_bounds = array<i64: 16, 64>}]} {
    %c0 = arith.constant 0 : index
    %c0_0 = arith.constant 0 : index
    %0 = vector.load %arg1[%c0, %c0_0] : memref<16x8xf32, #tpu.memory_space<vmem>>, vector<16x8xf32>
    %c0_1 = arith.constant 0 : index
    %c0_2 = arith.constant 0 : index
    %1 = vector.load %arg3[%c0_1, %c0_2] : memref<8x64xf32, #tpu.memory_space<vmem>>, vector<8x64xf32>
    %c0_3 = arith.constant 0 : index
    %c0_4 = arith.constant 0 : index
    %2 = vector.load %arg4[%c0_3, %c0_4] : memref<64x16xf32, #tpu.memory_space<vmem>>, vector<64x16xf32>
    %c0_5 = arith.constant 0 : index
    %c0_6 = arith.constant 0 : index
    %3 = vector.load %arg5[%c0_5, %c0_6] : memref<1x64xf32, #tpu.memory_space<vmem>>, vector<1x64xf32>
    %cst = arith.constant dense<0.000000e+00> : vector<16x64xf32>
    %4 = tpu.matmul %0, %1, %cst {dimension_numbers = #tpu.dot_dimension_numbers<[1], [0], [0], [1], [0, 0, 1, 1], [], []>} : vector<16x8xf32>, vector<8x64xf32>, vector<16x64xf32> -> vector<16x64xf32>
    %5 = vector.extract_strided_slice %2 {offsets = [0, 0], sizes = [64, 8], strides = [1, 1]} : vector<64x16xf32> to vector<64x8xf32>
    %cst_7 = arith.constant dense<0.000000e+00> : vector<16x8xf32>
    %6 = tpu.matmul %4, %5, %cst_7 {dimension_numbers = #tpu.dot_dimension_numbers<[1], [0], [0], [1], [0, 0, 1, 1], [], []>} : vector<16x64xf32>, vector<64x8xf32>, vector<16x8xf32> -> vector<16x8xf32>
    %c16_i32 = arith.constant 16 : i32
    %7 = arith.muli %arg0, %c16_i32 : i32
    %8 = tpu.assume_multiple %7, 8 : i32
    %9 = arith.index_cast %8 : i32 to index
    %c0_8 = arith.constant 0 : index
    %10 = vector.load %arg1[%9, %c0_8] : memref<16x8xf32, #tpu.memory_space<vmem>>, vector<16x8xf32>
    %cst_9 = arith.constant dense<0.000000e+00> : vector<16x64xf32>
    %11 = tpu.matmul %10, %1, %cst_9 {dimension_numbers = #tpu.dot_dimension_numbers<[1], [0], [0], [1], [0, 0, 1, 1], [], []>} : vector<16x8xf32>, vector<8x64xf32>, vector<16x64xf32> -> vector<16x64xf32>
    %12 = vector.extract_strided_slice %2 {offsets = [0, 8], sizes = [64, 8], strides = [1, 1]} : vector<64x16xf32> to vector<64x8xf32>
    %cst_10 = arith.constant dense<0.000000e+00> : vector<16x8xf32>
    %13 = tpu.matmul %11, %12, %cst_10 {dimension_numbers = #tpu.dot_dimension_numbers<[1], [0], [0], [1], [0, 0, 1, 1], [], []>} : vector<16x64xf32>, vector<64x8xf32>, vector<16x8xf32> -> vector<16x8xf32>
    %c0_11 = arith.constant 0 : index
    %c0_12 = arith.constant 0 : index
    %14 = vector.load %arg2[%c0_11, %c0_12] : memref<16x16xbf16, #tpu.memory_space<vmem>>, vector<16x16xbf16>
    %cst_13 = arith.constant 0.000000e+00 : bf16
    %15 = vector.broadcast %cst_13 : bf16 to vector<16x16xbf16>
    %16 = arith.cmpf ogt, %14, %15 : vector<16x16xbf16>
    %17 = vector.extract_strided_slice %6 {offsets = [0, 0], sizes = [16, 1], strides = [1, 1]} : vector<16x8xf32> to vector<16x1xf32>
    %18 = tpu.transpose %17, [1, 0] : vector<16x1xf32> -> vector<1x16xf32>
    %19 = vector.extract_strided_slice %13 {offsets = [0, 0], sizes = [16, 1], strides = [1, 1]} : vector<16x8xf32> to vector<16x1xf32>
    %20 = vector.broadcast %19 : vector<16x1xf32> to vector<16x16xf32>
    %21 = vector.broadcast %18 : vector<1x16xf32> to vector<16x16xf32>
    %22 = arith.addf %20, %21 : vector<16x16xf32>
    %cst_14 = arith.constant 0.000000e+00 : f32
    %23 = vector.broadcast %cst_14 : f32 to vector<16x16xf32>
    %24 = arith.cmpf ogt, %22, %23 : vector<16x16xf32>
    %cst_15 = arith.constant 2.000000e-01 : f32
    %25 = vector.broadcast %cst_15 : f32 to vector<16x16xf32>
    %26 = arith.mulf %25, %22 : vector<16x16xf32>
    %27 = arith.select %24, %22, %26 : vector<16x16xi1>, vector<16x16xf32>
    %cst_16 = arith.constant -1.000000e+30 : f32
    %28 = vector.broadcast %cst_16 : f32 to vector<16x16xf32>
    %29 = arith.select %16, %27, %28 : vector<16x16xi1>, vector<16x16xf32>
    %cst_17 = arith.constant dense<0xFF800000> : vector<16xf32>
    %30 = vector.multi_reduction <maximumf>, %29, %cst_17 [1] : vector<16x16xf32> to vector<16xf32>
    %31 = vector.shape_cast %30 : vector<16xf32> to vector<16x1xf32>
    %32 = vector.broadcast %31 : vector<16x1xf32> to vector<16x16xf32>
    %33 = arith.subf %29, %32 : vector<16x16xf32>
    %34 = math.exp %33 : vector<16x16xf32>
    %cst_18 = arith.constant dense<0.000000e+00> : vector<16xf32>
    %35 = vector.multi_reduction <add>, %34, %cst_18 [1] : vector<16x16xf32> to vector<16xf32>
    %36 = vector.shape_cast %35 : vector<16xf32> to vector<16x1xf32>
    %37 = vector.extract_strided_slice %4 {offsets = [0, 0], sizes = [16, 8], strides = [1, 1]} : vector<16x64xf32> to vector<16x8xf32>
    %cst_19 = arith.constant dense<0.000000e+00> : vector<16x8xf32>
    %38 = tpu.matmul %34, %37, %cst_19 {dimension_numbers = #tpu.dot_dimension_numbers<[1], [0], [0], [1], [0, 0, 1, 1], [], []>} : vector<16x16xf32>, vector<16x8xf32>, vector<16x8xf32> -> vector<16x8xf32>
    %39 = tpu.reciprocal %36 {approx = true} : vector<16x1xf32> -> vector<16x1xf32>
    %40 = vector.broadcast %39 : vector<16x1xf32> to vector<16x8xf32>
    %41 = arith.mulf %38, %40 : vector<16x8xf32>
    %42 = vector.extract_strided_slice %3 {offsets = [0, 0], sizes = [1, 8], strides = [1, 1]} : vector<1x64xf32> to vector<1x8xf32>
    %43 = vector.broadcast %42 : vector<1x8xf32> to vector<16x8xf32>
    %44 = arith.addf %41, %43 : vector<16x8xf32>
    %cst_20 = arith.constant 0.000000e+00 : f32
    %45 = vector.broadcast %cst_20 : f32 to vector<16x8xf32>
    %46 = arith.cmpf ogt, %44, %45 : vector<16x8xf32>
    %cst_21 = arith.constant 0.000000e+00 : f32
    %47 = vector.broadcast %cst_21 : f32 to vector<16x8xf32>
    %48 = arith.minimumf %44, %47 : vector<16x8xf32>
    %49 = math.exp %48 : vector<16x8xf32>
    %cst_22 = arith.constant 1.000000e+00 : f32
    %50 = vector.broadcast %cst_22 : f32 to vector<16x8xf32>
    %51 = arith.subf %49, %50 : vector<16x8xf32>
    %52 = arith.select %46, %44, %51 : vector<16x8xi1>, vector<16x8xf32>
    %c0_23 = arith.constant 0 : index
    %c0_24 = arith.constant 0 : index
    %53 = vector.load %arg6[%c0_23, %c0_24] : memref<16x64xf32, #tpu.memory_space<vmem>>, vector<16x8xf32>
    tpu.vector_store %arg6[%c0_23, %c0_24], %52 {strides = array<i32>} : memref<16x64xf32, #tpu.memory_space<vmem>>, vector<16x8xf32>,
    %54 = vector.extract_strided_slice %6 {offsets = [0, 1], sizes = [16, 1], strides = [1, 1]} : vector<16x8xf32> to vector<16x1xf32>
    %55 = tpu.transpose %54, [1, 0] : vector<16x1xf32> -> vector<1x16xf32>
    %56 = vector.extract_strided_slice %13 {offsets = [0, 1], sizes = [16, 1], strides = [1, 1]} : vector<16x8xf32> to vector<16x1xf32>
    %57 = vector.broadcast %56 : vector<16x1xf32> to vector<16x16xf32>
    %58 = vector.broadcast %55 : vector<1x16xf32> to vector<16x16xf32>
    %59 = arith.addf %57, %58 : vector<16x16xf32>
    %cst_25 = arith.constant 0.000000e+00 : f32
    %60 = vector.broadcast %cst_25 : f32 to vector<16x16xf32>
    %61 = arith.cmpf ogt, %59, %60 : vector<16x16xf32>
    %cst_26 = arith.constant 2.000000e-01 : f32
    %62 = vector.broadcast %cst_26 : f32 to vector<16x16xf32>
    %63 = arith.mulf %62, %59 : vector<16x16xf32>
    %64 = arith.select %61, %59, %63 : vector<16x16xi1>, vector<16x16xf32>
    %cst_27 = arith.constant -1.000000e+30 : f32
    %65 = vector.broadcast %cst_27 : f32 to vector<16x16xf32>
    %66 = arith.select %16, %64, %65 : vector<16x16xi1>, vector<16x16xf32>
    %cst_28 = arith.constant dense<0xFF800000> : vector<16xf32>
    %67 = vector.multi_reduction <maximumf>, %66, %cst_28 [1] : vector<16x16xf32> to vector<16xf32>
    %68 = vector.shape_cast %67 : vector<16xf32> to vector<16x1xf32>
    %69 = vector.broadcast %68 : vector<16x1xf32> to vector<16x16xf32>
    %70 = arith.subf %66, %69 : vector<16x16xf32>
    %71 = math.exp %70 : vector<16x16xf32>
    %cst_29 = arith.constant dense<0.000000e+00> : vector<16xf32>
    %72 = vector.multi_reduction <add>, %71, %cst_29 [1] : vector<16x16xf32> to vector<16xf32>
    %73 = vector.shape_cast %72 : vector<16xf32> to vector<16x1xf32>
    %74 = vector.extract_strided_slice %4 {offsets = [0, 8], sizes = [16, 8], strides = [1, 1]} : vector<16x64xf32> to vector<16x8xf32>
    %cst_30 = arith.constant dense<0.000000e+00> : vector<16x8xf32>
    %75 = tpu.matmul %71, %74, %cst_30 {dimension_numbers = #tpu.dot_dimension_numbers<[1], [0], [0], [1], [0, 0, 1, 1], [], []>} : vector<16x16xf32>, vector<16x8xf32>, vector<16x8xf32> -> vector<16x8xf32>
    %76 = tpu.reciprocal %73 {approx = true} : vector<16x1xf32> -> vector<16x1xf32>
    %77 = vector.broadcast %76 : vector<16x1xf32> to vector<16x8xf32>
    %78 = arith.mulf %75, %77 : vector<16x8xf32>
    %79 = vector.extract_strided_slice %3 {offsets = [0, 8], sizes = [1, 8], strides = [1, 1]} : vector<1x64xf32> to vector<1x8xf32>
    %80 = vector.broadcast %79 : vector<1x8xf32> to vector<16x8xf32>
    %81 = arith.addf %78, %80 : vector<16x8xf32>
    %cst_31 = arith.constant 0.000000e+00 : f32
    %82 = vector.broadcast %cst_31 : f32 to vector<16x8xf32>
    %83 = arith.cmpf ogt, %81, %82 : vector<16x8xf32>
    %cst_32 = arith.constant 0.000000e+00 : f32
    %84 = vector.broadcast %cst_32 : f32 to vector<16x8xf32>
    %85 = arith.minimumf %81, %84 : vector<16x8xf32>
    %86 = math.exp %85 : vector<16x8xf32>
    %cst_33 = arith.constant 1.000000e+00 : f32
    %87 = vector.broadcast %cst_33 : f32 to vector<16x8xf32>
    %88 = arith.subf %86, %87 : vector<16x8xf32>
    %89 = arith.select %83, %81, %88 : vector<16x8xi1>, vector<16x8xf32>
    %c0_34 = arith.constant 0 : index
    %c8 = arith.constant 8 : index
    %90 = vector.load %arg6[%c0_34, %c8] : memref<16x64xf32, #tpu.memory_space<vmem>>, vector<16x8xf32>
    tpu.vector_store %arg6[%c0_34, %c8], %89 {strides = array<i32>} : memref<16x64xf32, #tpu.memory_space<vmem>>, vector<16x8xf32>,
    %91 = vector.extract_strided_slice %6 {offsets = [0, 2], sizes = [16, 1], strides = [1, 1]} : vector<16x8xf32> to vector<16x1xf32>
    %92 = tpu.transpose %91, [1, 0] : vector<16x1xf32> -> vector<1x16xf32>
    %93 = vector.extract_strided_slice %13 {offsets = [0, 2], sizes = [16, 1], strides = [1, 1]} : vector<16x8xf32> to vector<16x1xf32>
    %94 = vector.broadcast %93 : vector<16x1xf32> to vector<16x16xf32>
    %95 = vector.broadcast %92 : vector<1x16xf32> to vector<16x16xf32>
    %96 = arith.addf %94, %95 : vector<16x16xf32>
    %cst_35 = arith.constant 0.000000e+00 : f32
    %97 = vector.broadcast %cst_35 : f32 to vector<16x16xf32>
    %98 = arith.cmpf ogt, %96, %97 : vector<16x16xf32>
    %cst_36 = arith.constant 2.000000e-01 : f32
    %99 = vector.broadcast %cst_36 : f32 to vector<16x16xf32>
    %100 = arith.mulf %99, %96 : vector<16x16xf32>
    %101 = arith.select %98, %96, %100 : vector<16x16xi1>, vector<16x16xf32>
    %cst_37 = arith.constant -1.000000e+30 : f32
    %102 = vector.broadcast %cst_37 : f32 to vector<16x16xf32>
    %103 = arith.select %16, %101, %102 : vector<16x16xi1>, vector<16x16xf32>
    %cst_38 = arith.constant dense<0xFF800000> : vector<16xf32>
    %104 = vector.multi_reduction <maximumf>, %103, %cst_38 [1] : vector<16x16xf32> to vector<16xf32>
    %105 = vector.shape_cast %104 : vector<16xf32> to vector<16x1xf32>
    %106 = vector.broadcast %105 : vector<16x1xf32> to vector<16x16xf32>
    %107 = arith.subf %103, %106 : vector<16x16xf32>
    %108 = math.exp %107 : vector<16x16xf32>
    %cst_39 = arith.constant dense<0.000000e+00> : vector<16xf32>
    %109 = vector.multi_reduction <add>, %108, %cst_39 [1] : vector<16x16xf32> to vector<16xf32>
    %110 = vector.shape_cast %109 : vector<16xf32> to vector<16x1xf32>
    %111 = vector.extract_strided_slice %4 {offsets = [0, 16], sizes = [16, 8], strides = [1, 1]} : vector<16x64xf32> to vector<16x8xf32>
    %cst_40 = arith.constant dense<0.000000e+00> : vector<16x8xf32>
    %112 = tpu.matmul %108, %111, %cst_40 {dimension_numbers = #tpu.dot_dimension_numbers<[1], [0], [0], [1], [0, 0, 1, 1], [], []>} : vector<16x16xf32>, vector<16x8xf32>, vector<16x8xf32> -> vector<16x8xf32>
    %113 = tpu.reciprocal %110 {approx = true} : vector<16x1xf32> -> vector<16x1xf32>
    %114 = vector.broadcast %113 : vector<16x1xf32> to vector<16x8xf32>
    %115 = arith.mulf %112, %114 : vector<16x8xf32>
    %116 = vector.extract_strided_slice %3 {offsets = [0, 16], sizes = [1, 8], strides = [1, 1]} : vector<1x64xf32> to vector<1x8xf32>
    %117 = vector.broadcast %116 : vector<1x8xf32> to vector<16x8xf32>
    %118 = arith.addf %115, %117 : vector<16x8xf32>
    %cst_41 = arith.constant 0.000000e+00 : f32
    %119 = vector.broadcast %cst_41 : f32 to vector<16x8xf32>
    %120 = arith.cmpf ogt, %118, %119 : vector<16x8xf32>
    %cst_42 = arith.constant 0.000000e+00 : f32
    %121 = vector.broadcast %cst_42 : f32 to vector<16x8xf32>
    %122 = arith.minimumf %118, %121 : vector<16x8xf32>
    %123 = math.exp %122 : vector<16x8xf32>
    %cst_43 = arith.constant 1.000000e+00 : f32
    %124 = vector.broadcast %cst_43 : f32 to vector<16x8xf32>
    %125 = arith.subf %123, %124 : vector<16x8xf32>
    %126 = arith.select %120, %118, %125 : vector<16x8xi1>, vector<16x8xf32>
    %c0_44 = arith.constant 0 : index
    %c16 = arith.constant 16 : index
    %127 = vector.load %arg6[%c0_44, %c16] : memref<16x64xf32, #tpu.memory_space<vmem>>, vector<16x8xf32>
    tpu.vector_store %arg6[%c0_44, %c16], %126 {strides = array<i32>} : memref<16x64xf32, #tpu.memory_space<vmem>>, vector<16x8xf32>,
    %128 = vector.extract_strided_slice %6 {offsets = [0, 3], sizes = [16, 1], strides = [1, 1]} : vector<16x8xf32> to vector<16x1xf32>
    %129 = tpu.transpose %128, [1, 0] : vector<16x1xf32> -> vector<1x16xf32>
    %130 = vector.extract_strided_slice %13 {offsets = [0, 3], sizes = [16, 1], strides = [1, 1]} : vector<16x8xf32> to vector<16x1xf32>
    %131 = vector.broadcast %130 : vector<16x1xf32> to vector<16x16xf32>
    %132 = vector.broadcast %129 : vector<1x16xf32> to vector<16x16xf32>
    %133 = arith.addf %131, %132 : vector<16x16xf32>
    %cst_45 = arith.constant 0.000000e+00 : f32
    %134 = vector.broadcast %cst_45 : f32 to vector<16x16xf32>
    %135 = arith.cmpf ogt, %133, %134 : vector<16x16xf32>
    %cst_46 = arith.constant 2.000000e-01 : f32
    %136 = vector.broadcast %cst_46 : f32 to vector<16x16xf32>
    %137 = arith.mulf %136, %133 : vector<16x16xf32>
    %138 = arith.select %135, %133, %137 : vector<16x16xi1>, vector<16x16xf32>
    %cst_47 = arith.constant -1.000000e+30 : f32
    %139 = vector.broadcast %cst_47 : f32 to vector<16x16xf32>
    %140 = arith.select %16, %138, %139 : vector<16x16xi1>, vector<16x16xf32>
    %cst_48 = arith.constant dense<0xFF800000> : vector<16xf32>
    %141 = vector.multi_reduction <maximumf>, %140, %cst_48 [1] : vector<16x16xf32> to vector<16xf32>
    %142 = vector.shape_cast %141 : vector<16xf32> to vector<16x1xf32>
    %143 = vector.broadcast %142 : vector<16x1xf32> to vector<16x16xf32>
    %144 = arith.subf %140, %143 : vector<16x16xf32>
    %145 = math.exp %144 : vector<16x16xf32>
    %cst_49 = arith.constant dense<0.000000e+00> : vector<16xf32>
    %146 = vector.multi_reduction <add>, %145, %cst_49 [1] : vector<16x16xf32> to vector<16xf32>
    %147 = vector.shape_cast %146 : vector<16xf32> to vector<16x1xf32>
    %148 = vector.extract_strided_slice %4 {offsets = [0, 24], sizes = [16, 8], strides = [1, 1]} : vector<16x64xf32> to vector<16x8xf32>
    %cst_50 = arith.constant dense<0.000000e+00> : vector<16x8xf32>
    %149 = tpu.matmul %145, %148, %cst_50 {dimension_numbers = #tpu.dot_dimension_numbers<[1], [0], [0], [1], [0, 0, 1, 1], [], []>} : vector<16x16xf32>, vector<16x8xf32>, vector<16x8xf32> -> vector<16x8xf32>
    %150 = tpu.reciprocal %147 {approx = true} : vector<16x1xf32> -> vector<16x1xf32>
    %151 = vector.broadcast %150 : vector<16x1xf32> to vector<16x8xf32>
    %152 = arith.mulf %149, %151 : vector<16x8xf32>
    %153 = vector.extract_strided_slice %3 {offsets = [0, 24], sizes = [1, 8], strides = [1, 1]} : vector<1x64xf32> to vector<1x8xf32>
    %154 = vector.broadcast %153 : vector<1x8xf32> to vector<16x8xf32>
    %155 = arith.addf %152, %154 : vector<16x8xf32>
    %cst_51 = arith.constant 0.000000e+00 : f32
    %156 = vector.broadcast %cst_51 : f32 to vector<16x8xf32>
    %157 = arith.cmpf ogt, %155, %156 : vector<16x8xf32>
    %cst_52 = arith.constant 0.000000e+00 : f32
    %158 = vector.broadcast %cst_52 : f32 to vector<16x8xf32>
    %159 = arith.minimumf %155, %158 : vector<16x8xf32>
    %160 = math.exp %159 : vector<16x8xf32>
    %cst_53 = arith.constant 1.000000e+00 : f32
    %161 = vector.broadcast %cst_53 : f32 to vector<16x8xf32>
    %162 = arith.subf %160, %161 : vector<16x8xf32>
    %163 = arith.select %157, %155, %162 : vector<16x8xi1>, vector<16x8xf32>
    %c0_54 = arith.constant 0 : index
    %c24 = arith.constant 24 : index
    %164 = vector.load %arg6[%c0_54, %c24] : memref<16x64xf32, #tpu.memory_space<vmem>>, vector<16x8xf32>
    tpu.vector_store %arg6[%c0_54, %c24], %163 {strides = array<i32>} : memref<16x64xf32, #tpu.memory_space<vmem>>, vector<16x8xf32>,
    %165 = vector.extract_strided_slice %6 {offsets = [0, 4], sizes = [16, 1], strides = [1, 1]} : vector<16x8xf32> to vector<16x1xf32>
    %166 = tpu.transpose %165, [1, 0] : vector<16x1xf32> -> vector<1x16xf32>
    %167 = vector.extract_strided_slice %13 {offsets = [0, 4], sizes = [16, 1], strides = [1, 1]} : vector<16x8xf32> to vector<16x1xf32>
    %168 = vector.broadcast %167 : vector<16x1xf32> to vector<16x16xf32>
    %169 = vector.broadcast %166 : vector<1x16xf32> to vector<16x16xf32>
    %170 = arith.addf %168, %169 : vector<16x16xf32>
    %cst_55 = arith.constant 0.000000e+00 : f32
    %171 = vector.broadcast %cst_55 : f32 to vector<16x16xf32>
    %172 = arith.cmpf ogt, %170, %171 : vector<16x16xf32>
    %cst_56 = arith.constant 2.000000e-01 : f32
    %173 = vector.broadcast %cst_56 : f32 to vector<16x16xf32>
    %174 = arith.mulf %173, %170 : vector<16x16xf32>
    %175 = arith.select %172, %170, %174 : vector<16x16xi1>, vector<16x16xf32>
    %cst_57 = arith.constant -1.000000e+30 : f32
    %176 = vector.broadcast %cst_57 : f32 to vector<16x16xf32>
    %177 = arith.select %16, %175, %176 : vector<16x16xi1>, vector<16x16xf32>
    %cst_58 = arith.constant dense<0xFF800000> : vector<16xf32>
    %178 = vector.multi_reduction <maximumf>, %177, %cst_58 [1] : vector<16x16xf32> to vector<16xf32>
    %179 = vector.shape_cast %178 : vector<16xf32> to vector<16x1xf32>
    %180 = vector.broadcast %179 : vector<16x1xf32> to vector<16x16xf32>
    %181 = arith.subf %177, %180 : vector<16x16xf32>
    %182 = math.exp %181 : vector<16x16xf32>
    %cst_59 = arith.constant dense<0.000000e+00> : vector<16xf32>
    %183 = vector.multi_reduction <add>, %182, %cst_59 [1] : vector<16x16xf32> to vector<16xf32>
    %184 = vector.shape_cast %183 : vector<16xf32> to vector<16x1xf32>
    %185 = vector.extract_strided_slice %4 {offsets = [0, 32], sizes = [16, 8], strides = [1, 1]} : vector<16x64xf32> to vector<16x8xf32>
    %cst_60 = arith.constant dense<0.000000e+00> : vector<16x8xf32>
    %186 = tpu.matmul %182, %185, %cst_60 {dimension_numbers = #tpu.dot_dimension_numbers<[1], [0], [0], [1], [0, 0, 1, 1], [], []>} : vector<16x16xf32>, vector<16x8xf32>, vector<16x8xf32> -> vector<16x8xf32>
    %187 = tpu.reciprocal %184 {approx = true} : vector<16x1xf32> -> vector<16x1xf32>
    %188 = vector.broadcast %187 : vector<16x1xf32> to vector<16x8xf32>
    %189 = arith.mulf %186, %188 : vector<16x8xf32>
    %190 = vector.extract_strided_slice %3 {offsets = [0, 32], sizes = [1, 8], strides = [1, 1]} : vector<1x64xf32> to vector<1x8xf32>
    %191 = vector.broadcast %190 : vector<1x8xf32> to vector<16x8xf32>
    %192 = arith.addf %189, %191 : vector<16x8xf32>
    %cst_61 = arith.constant 0.000000e+00 : f32
    %193 = vector.broadcast %cst_61 : f32 to vector<16x8xf32>
    %194 = arith.cmpf ogt, %192, %193 : vector<16x8xf32>
    %cst_62 = arith.constant 0.000000e+00 : f32
    %195 = vector.broadcast %cst_62 : f32 to vector<16x8xf32>
    %196 = arith.minimumf %192, %195 : vector<16x8xf32>
    %197 = math.exp %196 : vector<16x8xf32>
    %cst_63 = arith.constant 1.000000e+00 : f32
    %198 = vector.broadcast %cst_63 : f32 to vector<16x8xf32>
    %199 = arith.subf %197, %198 : vector<16x8xf32>
    %200 = arith.select %194, %192, %199 : vector<16x8xi1>, vector<16x8xf32>
    %c0_64 = arith.constant 0 : index
    %c32 = arith.constant 32 : index
    %201 = vector.load %arg6[%c0_64, %c32] : memref<16x64xf32, #tpu.memory_space<vmem>>, vector<16x8xf32>
    tpu.vector_store %arg6[%c0_64, %c32], %200 {strides = array<i32>} : memref<16x64xf32, #tpu.memory_space<vmem>>, vector<16x8xf32>,
    %202 = vector.extract_strided_slice %6 {offsets = [0, 5], sizes = [16, 1], strides = [1, 1]} : vector<16x8xf32> to vector<16x1xf32>
    %203 = tpu.transpose %202, [1, 0] : vector<16x1xf32> -> vector<1x16xf32>
    %204 = vector.extract_strided_slice %13 {offsets = [0, 5], sizes = [16, 1], strides = [1, 1]} : vector<16x8xf32> to vector<16x1xf32>
    %205 = vector.broadcast %204 : vector<16x1xf32> to vector<16x16xf32>
    %206 = vector.broadcast %203 : vector<1x16xf32> to vector<16x16xf32>
    %207 = arith.addf %205, %206 : vector<16x16xf32>
    %cst_65 = arith.constant 0.000000e+00 : f32
    %208 = vector.broadcast %cst_65 : f32 to vector<16x16xf32>
    %209 = arith.cmpf ogt, %207, %208 : vector<16x16xf32>
    %cst_66 = arith.constant 2.000000e-01 : f32
    %210 = vector.broadcast %cst_66 : f32 to vector<16x16xf32>
    %211 = arith.mulf %210, %207 : vector<16x16xf32>
    %212 = arith.select %209, %207, %211 : vector<16x16xi1>, vector<16x16xf32>
    %cst_67 = arith.constant -1.000000e+30 : f32
    %213 = vector.broadcast %cst_67 : f32 to vector<16x16xf32>
    %214 = arith.select %16, %212, %213 : vector<16x16xi1>, vector<16x16xf32>
    %cst_68 = arith.constant dense<0xFF800000> : vector<16xf32>
    %215 = vector.multi_reduction <maximumf>, %214, %cst_68 [1] : vector<16x16xf32> to vector<16xf32>
    %216 = vector.shape_cast %215 : vector<16xf32> to vector<16x1xf32>
    %217 = vector.broadcast %216 : vector<16x1xf32> to vector<16x16xf32>
    %218 = arith.subf %214, %217 : vector<16x16xf32>
    %219 = math.exp %218 : vector<16x16xf32>
    %cst_69 = arith.constant dense<0.000000e+00> : vector<16xf32>
    %220 = vector.multi_reduction <add>, %219, %cst_69 [1] : vector<16x16xf32> to vector<16xf32>
    %221 = vector.shape_cast %220 : vector<16xf32> to vector<16x1xf32>
    %222 = vector.extract_strided_slice %4 {offsets = [0, 40], sizes = [16, 8], strides = [1, 1]} : vector<16x64xf32> to vector<16x8xf32>
    %cst_70 = arith.constant dense<0.000000e+00> : vector<16x8xf32>
    %223 = tpu.matmul %219, %222, %cst_70 {dimension_numbers = #tpu.dot_dimension_numbers<[1], [0], [0], [1], [0, 0, 1, 1], [], []>} : vector<16x16xf32>, vector<16x8xf32>, vector<16x8xf32> -> vector<16x8xf32>
    %224 = tpu.reciprocal %221 {approx = true} : vector<16x1xf32> -> vector<16x1xf32>
    %225 = vector.broadcast %224 : vector<16x1xf32> to vector<16x8xf32>
    %226 = arith.mulf %223, %225 : vector<16x8xf32>
    %227 = vector.extract_strided_slice %3 {offsets = [0, 40], sizes = [1, 8], strides = [1, 1]} : vector<1x64xf32> to vector<1x8xf32>
    %228 = vector.broadcast %227 : vector<1x8xf32> to vector<16x8xf32>
    %229 = arith.addf %226, %228 : vector<16x8xf32>
    %cst_71 = arith.constant 0.000000e+00 : f32
    %230 = vector.broadcast %cst_71 : f32 to vector<16x8xf32>
    %231 = arith.cmpf ogt, %229, %230 : vector<16x8xf32>
    %cst_72 = arith.constant 0.000000e+00 : f32
    %232 = vector.broadcast %cst_72 : f32 to vector<16x8xf32>
    %233 = arith.minimumf %229, %232 : vector<16x8xf32>
    %234 = math.exp %233 : vector<16x8xf32>
    %cst_73 = arith.constant 1.000000e+00 : f32
    %235 = vector.broadcast %cst_73 : f32 to vector<16x8xf32>
    %236 = arith.subf %234, %235 : vector<16x8xf32>
    %237 = arith.select %231, %229, %236 : vector<16x8xi1>, vector<16x8xf32>
    %c0_74 = arith.constant 0 : index
    %c40 = arith.constant 40 : index
    %238 = vector.load %arg6[%c0_74, %c40] : memref<16x64xf32, #tpu.memory_space<vmem>>, vector<16x8xf32>
    tpu.vector_store %arg6[%c0_74, %c40], %237 {strides = array<i32>} : memref<16x64xf32, #tpu.memory_space<vmem>>, vector<16x8xf32>,
    %239 = vector.extract_strided_slice %6 {offsets = [0, 6], sizes = [16, 1], strides = [1, 1]} : vector<16x8xf32> to vector<16x1xf32>
    %240 = tpu.transpose %239, [1, 0] : vector<16x1xf32> -> vector<1x16xf32>
    %241 = vector.extract_strided_slice %13 {offsets = [0, 6], sizes = [16, 1], strides = [1, 1]} : vector<16x8xf32> to vector<16x1xf32>
    %242 = vector.broadcast %241 : vector<16x1xf32> to vector<16x16xf32>
    %243 = vector.broadcast %240 : vector<1x16xf32> to vector<16x16xf32>
    %244 = arith.addf %242, %243 : vector<16x16xf32>
    %cst_75 = arith.constant 0.000000e+00 : f32
    %245 = vector.broadcast %cst_75 : f32 to vector<16x16xf32>
    %246 = arith.cmpf ogt, %244, %245 : vector<16x16xf32>
    %cst_76 = arith.constant 2.000000e-01 : f32
    %247 = vector.broadcast %cst_76 : f32 to vector<16x16xf32>
    %248 = arith.mulf %247, %244 : vector<16x16xf32>
    %249 = arith.select %246, %244, %248 : vector<16x16xi1>, vector<16x16xf32>
    %cst_77 = arith.constant -1.000000e+30 : f32
    %250 = vector.broadcast %cst_77 : f32 to vector<16x16xf32>
    %251 = arith.select %16, %249, %250 : vector<16x16xi1>, vector<16x16xf32>
    %cst_78 = arith.constant dense<0xFF800000> : vector<16xf32>
    %252 = vector.multi_reduction <maximumf>, %251, %cst_78 [1] : vector<16x16xf32> to vector<16xf32>
    %253 = vector.shape_cast %252 : vector<16xf32> to vector<16x1xf32>
    %254 = vector.broadcast %253 : vector<16x1xf32> to vector<16x16xf32>
    %255 = arith.subf %251, %254 : vector<16x16xf32>
    %256 = math.exp %255 : vector<16x16xf32>
    %cst_79 = arith.constant dense<0.000000e+00> : vector<16xf32>
    %257 = vector.multi_reduction <add>, %256, %cst_79 [1] : vector<16x16xf32> to vector<16xf32>
    %258 = vector.shape_cast %257 : vector<16xf32> to vector<16x1xf32>
    %259 = vector.extract_strided_slice %4 {offsets = [0, 48], sizes = [16, 8], strides = [1, 1]} : vector<16x64xf32> to vector<16x8xf32>
    %cst_80 = arith.constant dense<0.000000e+00> : vector<16x8xf32>
    %260 = tpu.matmul %256, %259, %cst_80 {dimension_numbers = #tpu.dot_dimension_numbers<[1], [0], [0], [1], [0, 0, 1, 1], [], []>} : vector<16x16xf32>, vector<16x8xf32>, vector<16x8xf32> -> vector<16x8xf32>
    %261 = tpu.reciprocal %258 {approx = true} : vector<16x1xf32> -> vector<16x1xf32>
    %262 = vector.broadcast %261 : vector<16x1xf32> to vector<16x8xf32>
    %263 = arith.mulf %260, %262 : vector<16x8xf32>
    %264 = vector.extract_strided_slice %3 {offsets = [0, 48], sizes = [1, 8], strides = [1, 1]} : vector<1x64xf32> to vector<1x8xf32>
    %265 = vector.broadcast %264 : vector<1x8xf32> to vector<16x8xf32>
    %266 = arith.addf %263, %265 : vector<16x8xf32>
    %cst_81 = arith.constant 0.000000e+00 : f32
    %267 = vector.broadcast %cst_81 : f32 to vector<16x8xf32>
    %268 = arith.cmpf ogt, %266, %267 : vector<16x8xf32>
    %cst_82 = arith.constant 0.000000e+00 : f32
    %269 = vector.broadcast %cst_82 : f32 to vector<16x8xf32>
    %270 = arith.minimumf %266, %269 : vector<16x8xf32>
    %271 = math.exp %270 : vector<16x8xf32>
    %cst_83 = arith.constant 1.000000e+00 : f32
    %272 = vector.broadcast %cst_83 : f32 to vector<16x8xf32>
    %273 = arith.subf %271, %272 : vector<16x8xf32>
    %274 = arith.select %268, %266, %273 : vector<16x8xi1>, vector<16x8xf32>
    %c0_84 = arith.constant 0 : index
    %c48 = arith.constant 48 : index
    %275 = vector.load %arg6[%c0_84, %c48] : memref<16x64xf32, #tpu.memory_space<vmem>>, vector<16x8xf32>
    tpu.vector_store %arg6[%c0_84, %c48], %274 {strides = array<i32>} : memref<16x64xf32, #tpu.memory_space<vmem>>, vector<16x8xf32>,
    %276 = vector.extract_strided_slice %6 {offsets = [0, 7], sizes = [16, 1], strides = [1, 1]} : vector<16x8xf32> to vector<16x1xf32>
    %277 = tpu.transpose %276, [1, 0] : vector<16x1xf32> -> vector<1x16xf32>
    %278 = vector.extract_strided_slice %13 {offsets = [0, 7], sizes = [16, 1], strides = [1, 1]} : vector<16x8xf32> to vector<16x1xf32>
    %279 = vector.broadcast %278 : vector<16x1xf32> to vector<16x16xf32>
    %280 = vector.broadcast %277 : vector<1x16xf32> to vector<16x16xf32>
    %281 = arith.addf %279, %280 : vector<16x16xf32>
    %cst_85 = arith.constant 0.000000e+00 : f32
    %282 = vector.broadcast %cst_85 : f32 to vector<16x16xf32>
    %283 = arith.cmpf ogt, %281, %282 : vector<16x16xf32>
    %cst_86 = arith.constant 2.000000e-01 : f32
    %284 = vector.broadcast %cst_86 : f32 to vector<16x16xf32>
    %285 = arith.mulf %284, %281 : vector<16x16xf32>
    %286 = arith.select %283, %281, %285 : vector<16x16xi1>, vector<16x16xf32>
    %cst_87 = arith.constant -1.000000e+30 : f32
    %287 = vector.broadcast %cst_87 : f32 to vector<16x16xf32>
    %288 = arith.select %16, %286, %287 : vector<16x16xi1>, vector<16x16xf32>
    %cst_88 = arith.constant dense<0xFF800000> : vector<16xf32>
    %289 = vector.multi_reduction <maximumf>, %288, %cst_88 [1] : vector<16x16xf32> to vector<16xf32>
    %290 = vector.shape_cast %289 : vector<16xf32> to vector<16x1xf32>
    %291 = vector.broadcast %290 : vector<16x1xf32> to vector<16x16xf32>
    %292 = arith.subf %288, %291 : vector<16x16xf32>
    %293 = math.exp %292 : vector<16x16xf32>
    %cst_89 = arith.constant dense<0.000000e+00> : vector<16xf32>
    %294 = vector.multi_reduction <add>, %293, %cst_89 [1] : vector<16x16xf32> to vector<16xf32>
    %295 = vector.shape_cast %294 : vector<16xf32> to vector<16x1xf32>
    %296 = vector.extract_strided_slice %4 {offsets = [0, 56], sizes = [16, 8], strides = [1, 1]} : vector<16x64xf32> to vector<16x8xf32>
    %cst_90 = arith.constant dense<0.000000e+00> : vector<16x8xf32>
    %297 = tpu.matmul %293, %296, %cst_90 {dimension_numbers = #tpu.dot_dimension_numbers<[1], [0], [0], [1], [0, 0, 1, 1], [], []>} : vector<16x16xf32>, vector<16x8xf32>, vector<16x8xf32> -> vector<16x8xf32>
    %298 = tpu.reciprocal %295 {approx = true} : vector<16x1xf32> -> vector<16x1xf32>
    %299 = vector.broadcast %298 : vector<16x1xf32> to vector<16x8xf32>
    %300 = arith.mulf %297, %299 : vector<16x8xf32>
    %301 = vector.extract_strided_slice %3 {offsets = [0, 56], sizes = [1, 8], strides = [1, 1]} : vector<1x64xf32> to vector<1x8xf32>
    %302 = vector.broadcast %301 : vector<1x8xf32> to vector<16x8xf32>
    %303 = arith.addf %300, %302 : vector<16x8xf32>
    %cst_91 = arith.constant 0.000000e+00 : f32
    %304 = vector.broadcast %cst_91 : f32 to vector<16x8xf32>
    %305 = arith.cmpf ogt, %303, %304 : vector<16x8xf32>
    %cst_92 = arith.constant 0.000000e+00 : f32
    %306 = vector.broadcast %cst_92 : f32 to vector<16x8xf32>
    %307 = arith.minimumf %303, %306 : vector<16x8xf32>
    %308 = math.exp %307 : vector<16x8xf32>
    %cst_93 = arith.constant 1.000000e+00 : f32
    %309 = vector.broadcast %cst_93 : f32 to vector<16x8xf32>
    %310 = arith.subf %308, %309 : vector<16x8xf32>
    %311 = arith.select %305, %303, %310 : vector<16x8xi1>, vector<16x8xf32>
    %c0_94 = arith.constant 0 : index
    %c56 = arith.constant 56 : index
    %312 = vector.load %arg6[%c0_94, %c56] : memref<16x64xf32, #tpu.memory_space<vmem>>, vector<16x8xf32>
    tpu.vector_store %arg6[%c0_94, %c56], %311 {strides = array<i32>} : memref<16x64xf32, #tpu.memory_space<vmem>>, vector<16x8xf32>,
    return
  }
  func.func @transform_0(%arg0: i32) -> (i32, i32) {
    %c0_i32 = arith.constant 0 : i32
    %c0_i32_0 = arith.constant 0 : i32
    %c0_i32_1 = arith.constant 0 : i32
    return %c0_i32, %c0_i32_0 : i32, i32
  }
  func.func @transform_1(%arg0: i32) -> (i32, i32) {
    %c0_i32 = arith.constant 0 : i32
    %c0_i32_0 = arith.constant 0 : i32
    return %arg0, %c0_i32 : i32, i32
  }
  func.func @transform_2(%arg0: i32) -> (i32, i32) {
    %c0_i32 = arith.constant 0 : i32
    %c0_i32_0 = arith.constant 0 : i32
    %c0_i32_1 = arith.constant 0 : i32
    return %c0_i32, %c0_i32_0 : i32, i32
  }
  func.func @transform_3(%arg0: i32) -> (i32, i32) {
    %c0_i32 = arith.constant 0 : i32
    %c0_i32_0 = arith.constant 0 : i32
    %c0_i32_1 = arith.constant 0 : i32
    return %c0_i32, %c0_i32_0 : i32, i32
  }
  func.func @transform_4(%arg0: i32) -> (i32, i32) {
    %c0_i32 = arith.constant 0 : i32
    %c0_i32_0 = arith.constant 0 : i32
    %c0_i32_1 = arith.constant 0 : i32
    return %c0_i32, %c0_i32_0 : i32, i32
  }
  func.func @transform_5(%arg0: i32) -> (i32, i32) {
    %c0_i32 = arith.constant 0 : i32
    %c0_i32_0 = arith.constant 0 : i32
    return %arg0, %c0_i32 : i32, i32
  }
}

module attributes {stable_mosaic.version = 11 : i64} {
  func.func @kernel(%arg0: i32, %arg1: memref<16x64xf32, #tpu.memory_space<vmem>>, %arg2: memref<16x16xbf16, #tpu.memory_space<vmem>>, %arg3: memref<64x18xf32, #tpu.memory_space<vmem>>, %arg4: memref<18x8xf32, #tpu.memory_space<vmem>>, %arg5: memref<1x18xf32, #tpu.memory_space<vmem>>, %arg6: memref<16x18xf32, #tpu.memory_space<vmem>>) attributes {dimension_semantics = [#tpu.dimension_semantics<parallel>], iteration_bounds = array<i64: 1>, scalar_prefetch = 0 : i64, scratch_operands = 0 : i64, tpu.core_type = #tpu.core_type<tc>, window_params = [{pipeline_mode = #tpu.pipeline_mode<synchronous>, transform_indices = @transform_0, window_bounds = array<i64: 16, 64>}, {transform_indices = @transform_1, window_bounds = array<i64: 16, 16>}, {pipeline_mode = #tpu.pipeline_mode<synchronous>, transform_indices = @transform_2, window_bounds = array<i64: 64, 18>}, {pipeline_mode = #tpu.pipeline_mode<synchronous>, transform_indices = @transform_3, window_bounds = array<i64: 18, 8>}, {pipeline_mode = #tpu.pipeline_mode<synchronous>, transform_indices = @transform_4, window_bounds = array<i64: 1, 18>}, {transform_indices = @transform_5, window_bounds = array<i64: 16, 18>}]} {
    %c0 = arith.constant 0 : index
    %c0_0 = arith.constant 0 : index
    %0 = vector.load %arg1[%c0, %c0_0] : memref<16x64xf32, #tpu.memory_space<vmem>>, vector<16x64xf32>
    %c0_1 = arith.constant 0 : index
    %c0_2 = arith.constant 0 : index
    %1 = vector.load %arg3[%c0_1, %c0_2] : memref<64x18xf32, #tpu.memory_space<vmem>>, vector<64x18xf32>
    %c0_3 = arith.constant 0 : index
    %c0_4 = arith.constant 0 : index
    %2 = vector.load %arg4[%c0_3, %c0_4] : memref<18x8xf32, #tpu.memory_space<vmem>>, vector<18x8xf32>
    %c0_5 = arith.constant 0 : index
    %c0_6 = arith.constant 0 : index
    %3 = vector.load %arg5[%c0_5, %c0_6] : memref<1x18xf32, #tpu.memory_space<vmem>>, vector<1x18xf32>
    %cst = arith.constant dense<0.000000e+00> : vector<16x18xf32>
    %4 = tpu.matmul %0, %1, %cst {dimension_numbers = #tpu.dot_dimension_numbers<[1], [0], [0], [1], [0, 0, 1, 1], [], []>} : vector<16x64xf32>, vector<64x18xf32>, vector<16x18xf32> -> vector<16x18xf32>
    %5 = vector.extract_strided_slice %2 {offsets = [0, 0], sizes = [18, 4], strides = [1, 1]} : vector<18x8xf32> to vector<18x4xf32>
    %cst_7 = arith.constant dense<0.000000e+00> : vector<16x4xf32>
    %6 = tpu.matmul %4, %5, %cst_7 {dimension_numbers = #tpu.dot_dimension_numbers<[1], [0], [0], [1], [0, 0, 1, 1], [], []>} : vector<16x18xf32>, vector<18x4xf32>, vector<16x4xf32> -> vector<16x4xf32>
    %c16_i32 = arith.constant 16 : i32
    %7 = arith.muli %arg0, %c16_i32 : i32
    %8 = tpu.assume_multiple %7, 8 : i32
    %9 = arith.index_cast %8 : i32 to index
    %c0_8 = arith.constant 0 : index
    %10 = vector.load %arg1[%9, %c0_8] : memref<16x64xf32, #tpu.memory_space<vmem>>, vector<16x64xf32>
    %cst_9 = arith.constant dense<0.000000e+00> : vector<16x18xf32>
    %11 = tpu.matmul %10, %1, %cst_9 {dimension_numbers = #tpu.dot_dimension_numbers<[1], [0], [0], [1], [0, 0, 1, 1], [], []>} : vector<16x64xf32>, vector<64x18xf32>, vector<16x18xf32> -> vector<16x18xf32>
    %12 = vector.extract_strided_slice %2 {offsets = [0, 4], sizes = [18, 4], strides = [1, 1]} : vector<18x8xf32> to vector<18x4xf32>
    %cst_10 = arith.constant dense<0.000000e+00> : vector<16x4xf32>
    %13 = tpu.matmul %11, %12, %cst_10 {dimension_numbers = #tpu.dot_dimension_numbers<[1], [0], [0], [1], [0, 0, 1, 1], [], []>} : vector<16x18xf32>, vector<18x4xf32>, vector<16x4xf32> -> vector<16x4xf32>
    %c0_11 = arith.constant 0 : index
    %c0_12 = arith.constant 0 : index
    %14 = vector.load %arg2[%c0_11, %c0_12] : memref<16x16xbf16, #tpu.memory_space<vmem>>, vector<16x16xbf16>
    %cst_13 = arith.constant 0.000000e+00 : bf16
    %15 = vector.broadcast %cst_13 : bf16 to vector<16x16xbf16>
    %16 = arith.cmpf ogt, %14, %15 : vector<16x16xbf16>
    %17 = vector.extract_strided_slice %6 {offsets = [0, 0], sizes = [16, 1], strides = [1, 1]} : vector<16x4xf32> to vector<16x1xf32>
    %18 = tpu.transpose %17, [1, 0] : vector<16x1xf32> -> vector<1x16xf32>
    %19 = vector.extract_strided_slice %13 {offsets = [0, 0], sizes = [16, 1], strides = [1, 1]} : vector<16x4xf32> to vector<16x1xf32>
    %20 = vector.broadcast %19 : vector<16x1xf32> to vector<16x16xf32>
    %21 = vector.broadcast %18 : vector<1x16xf32> to vector<16x16xf32>
    %22 = arith.addf %20, %21 : vector<16x16xf32>
    %cst_14 = arith.constant 0.000000e+00 : f32
    %23 = vector.broadcast %cst_14 : f32 to vector<16x16xf32>
    %24 = arith.cmpf ogt, %22, %23 : vector<16x16xf32>
    %cst_15 = arith.constant 2.000000e-01 : f32
    %25 = vector.broadcast %cst_15 : f32 to vector<16x16xf32>
    %26 = arith.mulf %25, %22 : vector<16x16xf32>
    %27 = arith.select %24, %22, %26 : vector<16x16xi1>, vector<16x16xf32>
    %cst_16 = arith.constant -1.000000e+30 : f32
    %28 = vector.broadcast %cst_16 : f32 to vector<16x16xf32>
    %29 = arith.select %16, %27, %28 : vector<16x16xi1>, vector<16x16xf32>
    %cst_17 = arith.constant dense<0xFF800000> : vector<16xf32>
    %30 = vector.multi_reduction <maximumf>, %29, %cst_17 [1] : vector<16x16xf32> to vector<16xf32>
    %31 = vector.shape_cast %30 : vector<16xf32> to vector<16x1xf32>
    %32 = vector.broadcast %31 : vector<16x1xf32> to vector<16x16xf32>
    %33 = arith.subf %29, %32 : vector<16x16xf32>
    %34 = math.exp %33 : vector<16x16xf32>
    %cst_18 = arith.constant dense<0.000000e+00> : vector<16xf32>
    %35 = vector.multi_reduction <add>, %34, %cst_18 [1] : vector<16x16xf32> to vector<16xf32>
    %36 = vector.shape_cast %35 : vector<16xf32> to vector<16x1xf32>
    %37 = vector.extract_strided_slice %4 {offsets = [0, 0], sizes = [16, 4], strides = [1, 1]} : vector<16x18xf32> to vector<16x4xf32>
    %cst_19 = arith.constant dense<0.000000e+00> : vector<16x4xf32>
    %38 = tpu.matmul %34, %37, %cst_19 {dimension_numbers = #tpu.dot_dimension_numbers<[1], [0], [0], [1], [0, 0, 1, 1], [], []>} : vector<16x16xf32>, vector<16x4xf32>, vector<16x4xf32> -> vector<16x4xf32>
    %39 = tpu.reciprocal %36 {approx = true} : vector<16x1xf32> -> vector<16x1xf32>
    %40 = vector.broadcast %39 : vector<16x1xf32> to vector<16x4xf32>
    %41 = arith.mulf %38, %40 : vector<16x4xf32>
    %42 = vector.extract_strided_slice %3 {offsets = [0, 0], sizes = [1, 4], strides = [1, 1]} : vector<1x18xf32> to vector<1x4xf32>
    %43 = vector.broadcast %42 : vector<1x4xf32> to vector<16x4xf32>
    %44 = arith.addf %41, %43 : vector<16x4xf32>
    %cst_20 = arith.constant dense<0xFF800000> : vector<16xf32>
    %45 = vector.multi_reduction <maximumf>, %44, %cst_20 [1] : vector<16x4xf32> to vector<16xf32>
    %46 = vector.shape_cast %45 : vector<16xf32> to vector<16x1xf32>
    %47 = vector.broadcast %46 : vector<16x1xf32> to vector<16x4xf32>
    %48 = arith.subf %44, %47 : vector<16x4xf32>
    %49 = math.exp %48 : vector<16x4xf32>
    %cst_21 = arith.constant dense<0.000000e+00> : vector<16xf32>
    %50 = vector.multi_reduction <add>, %49, %cst_21 [1] : vector<16x4xf32> to vector<16xf32>
    %51 = vector.shape_cast %50 : vector<16xf32> to vector<16x1xf32>
    %52 = math.log %51 : vector<16x1xf32>
    %53 = vector.broadcast %52 : vector<16x1xf32> to vector<16x4xf32>
    %54 = arith.subf %48, %53 : vector<16x4xf32>
    %c0_22 = arith.constant 0 : index
    %c0_23 = arith.constant 0 : index
    %55 = vector.load %arg6[%c0_22, %c0_23] : memref<16x18xf32, #tpu.memory_space<vmem>>, vector<16x4xf32>
    tpu.vector_store %arg6[%c0_22, %c0_23], %54 {strides = array<i32>} : memref<16x18xf32, #tpu.memory_space<vmem>>, vector<16x4xf32>,
    %56 = vector.extract_strided_slice %6 {offsets = [0, 1], sizes = [16, 1], strides = [1, 1]} : vector<16x4xf32> to vector<16x1xf32>
    %57 = tpu.transpose %56, [1, 0] : vector<16x1xf32> -> vector<1x16xf32>
    %58 = vector.extract_strided_slice %13 {offsets = [0, 1], sizes = [16, 1], strides = [1, 1]} : vector<16x4xf32> to vector<16x1xf32>
    %59 = vector.broadcast %58 : vector<16x1xf32> to vector<16x16xf32>
    %60 = vector.broadcast %57 : vector<1x16xf32> to vector<16x16xf32>
    %61 = arith.addf %59, %60 : vector<16x16xf32>
    %cst_24 = arith.constant 0.000000e+00 : f32
    %62 = vector.broadcast %cst_24 : f32 to vector<16x16xf32>
    %63 = arith.cmpf ogt, %61, %62 : vector<16x16xf32>
    %cst_25 = arith.constant 2.000000e-01 : f32
    %64 = vector.broadcast %cst_25 : f32 to vector<16x16xf32>
    %65 = arith.mulf %64, %61 : vector<16x16xf32>
    %66 = arith.select %63, %61, %65 : vector<16x16xi1>, vector<16x16xf32>
    %cst_26 = arith.constant -1.000000e+30 : f32
    %67 = vector.broadcast %cst_26 : f32 to vector<16x16xf32>
    %68 = arith.select %16, %66, %67 : vector<16x16xi1>, vector<16x16xf32>
    %cst_27 = arith.constant dense<0xFF800000> : vector<16xf32>
    %69 = vector.multi_reduction <maximumf>, %68, %cst_27 [1] : vector<16x16xf32> to vector<16xf32>
    %70 = vector.shape_cast %69 : vector<16xf32> to vector<16x1xf32>
    %71 = vector.broadcast %70 : vector<16x1xf32> to vector<16x16xf32>
    %72 = arith.subf %68, %71 : vector<16x16xf32>
    %73 = math.exp %72 : vector<16x16xf32>
    %cst_28 = arith.constant dense<0.000000e+00> : vector<16xf32>
    %74 = vector.multi_reduction <add>, %73, %cst_28 [1] : vector<16x16xf32> to vector<16xf32>
    %75 = vector.shape_cast %74 : vector<16xf32> to vector<16x1xf32>
    %76 = vector.extract_strided_slice %4 {offsets = [0, 4], sizes = [16, 5], strides = [1, 1]} : vector<16x18xf32> to vector<16x5xf32>
    %cst_29 = arith.constant dense<0.000000e+00> : vector<16x5xf32>
    %77 = tpu.matmul %73, %76, %cst_29 {dimension_numbers = #tpu.dot_dimension_numbers<[1], [0], [0], [1], [0, 0, 1, 1], [], []>} : vector<16x16xf32>, vector<16x5xf32>, vector<16x5xf32> -> vector<16x5xf32>
    %78 = tpu.reciprocal %75 {approx = true} : vector<16x1xf32> -> vector<16x1xf32>
    %79 = vector.broadcast %78 : vector<16x1xf32> to vector<16x5xf32>
    %80 = arith.mulf %77, %79 : vector<16x5xf32>
    %81 = vector.extract_strided_slice %3 {offsets = [0, 4], sizes = [1, 5], strides = [1, 1]} : vector<1x18xf32> to vector<1x5xf32>
    %82 = vector.broadcast %81 : vector<1x5xf32> to vector<16x5xf32>
    %83 = arith.addf %80, %82 : vector<16x5xf32>
    %cst_30 = arith.constant dense<0xFF800000> : vector<16xf32>
    %84 = vector.multi_reduction <maximumf>, %83, %cst_30 [1] : vector<16x5xf32> to vector<16xf32>
    %85 = vector.shape_cast %84 : vector<16xf32> to vector<16x1xf32>
    %86 = vector.broadcast %85 : vector<16x1xf32> to vector<16x5xf32>
    %87 = arith.subf %83, %86 : vector<16x5xf32>
    %88 = math.exp %87 : vector<16x5xf32>
    %cst_31 = arith.constant dense<0.000000e+00> : vector<16xf32>
    %89 = vector.multi_reduction <add>, %88, %cst_31 [1] : vector<16x5xf32> to vector<16xf32>
    %90 = vector.shape_cast %89 : vector<16xf32> to vector<16x1xf32>
    %91 = math.log %90 : vector<16x1xf32>
    %92 = vector.broadcast %91 : vector<16x1xf32> to vector<16x5xf32>
    %93 = arith.subf %87, %92 : vector<16x5xf32>
    %c0_32 = arith.constant 0 : index
    %c4 = arith.constant 4 : index
    %94 = vector.load %arg6[%c0_32, %c4] : memref<16x18xf32, #tpu.memory_space<vmem>>, vector<16x5xf32>
    tpu.vector_store %arg6[%c0_32, %c4], %93 {strides = array<i32>} : memref<16x18xf32, #tpu.memory_space<vmem>>, vector<16x5xf32>,
    %95 = vector.extract_strided_slice %6 {offsets = [0, 2], sizes = [16, 1], strides = [1, 1]} : vector<16x4xf32> to vector<16x1xf32>
    %96 = tpu.transpose %95, [1, 0] : vector<16x1xf32> -> vector<1x16xf32>
    %97 = vector.extract_strided_slice %13 {offsets = [0, 2], sizes = [16, 1], strides = [1, 1]} : vector<16x4xf32> to vector<16x1xf32>
    %98 = vector.broadcast %97 : vector<16x1xf32> to vector<16x16xf32>
    %99 = vector.broadcast %96 : vector<1x16xf32> to vector<16x16xf32>
    %100 = arith.addf %98, %99 : vector<16x16xf32>
    %cst_33 = arith.constant 0.000000e+00 : f32
    %101 = vector.broadcast %cst_33 : f32 to vector<16x16xf32>
    %102 = arith.cmpf ogt, %100, %101 : vector<16x16xf32>
    %cst_34 = arith.constant 2.000000e-01 : f32
    %103 = vector.broadcast %cst_34 : f32 to vector<16x16xf32>
    %104 = arith.mulf %103, %100 : vector<16x16xf32>
    %105 = arith.select %102, %100, %104 : vector<16x16xi1>, vector<16x16xf32>
    %cst_35 = arith.constant -1.000000e+30 : f32
    %106 = vector.broadcast %cst_35 : f32 to vector<16x16xf32>
    %107 = arith.select %16, %105, %106 : vector<16x16xi1>, vector<16x16xf32>
    %cst_36 = arith.constant dense<0xFF800000> : vector<16xf32>
    %108 = vector.multi_reduction <maximumf>, %107, %cst_36 [1] : vector<16x16xf32> to vector<16xf32>
    %109 = vector.shape_cast %108 : vector<16xf32> to vector<16x1xf32>
    %110 = vector.broadcast %109 : vector<16x1xf32> to vector<16x16xf32>
    %111 = arith.subf %107, %110 : vector<16x16xf32>
    %112 = math.exp %111 : vector<16x16xf32>
    %cst_37 = arith.constant dense<0.000000e+00> : vector<16xf32>
    %113 = vector.multi_reduction <add>, %112, %cst_37 [1] : vector<16x16xf32> to vector<16xf32>
    %114 = vector.shape_cast %113 : vector<16xf32> to vector<16x1xf32>
    %115 = vector.extract_strided_slice %4 {offsets = [0, 9], sizes = [16, 6], strides = [1, 1]} : vector<16x18xf32> to vector<16x6xf32>
    %cst_38 = arith.constant dense<0.000000e+00> : vector<16x6xf32>
    %116 = tpu.matmul %112, %115, %cst_38 {dimension_numbers = #tpu.dot_dimension_numbers<[1], [0], [0], [1], [0, 0, 1, 1], [], []>} : vector<16x16xf32>, vector<16x6xf32>, vector<16x6xf32> -> vector<16x6xf32>
    %117 = tpu.reciprocal %114 {approx = true} : vector<16x1xf32> -> vector<16x1xf32>
    %118 = vector.broadcast %117 : vector<16x1xf32> to vector<16x6xf32>
    %119 = arith.mulf %116, %118 : vector<16x6xf32>
    %120 = vector.extract_strided_slice %3 {offsets = [0, 9], sizes = [1, 6], strides = [1, 1]} : vector<1x18xf32> to vector<1x6xf32>
    %121 = vector.broadcast %120 : vector<1x6xf32> to vector<16x6xf32>
    %122 = arith.addf %119, %121 : vector<16x6xf32>
    %cst_39 = arith.constant dense<0xFF800000> : vector<16xf32>
    %123 = vector.multi_reduction <maximumf>, %122, %cst_39 [1] : vector<16x6xf32> to vector<16xf32>
    %124 = vector.shape_cast %123 : vector<16xf32> to vector<16x1xf32>
    %125 = vector.broadcast %124 : vector<16x1xf32> to vector<16x6xf32>
    %126 = arith.subf %122, %125 : vector<16x6xf32>
    %127 = math.exp %126 : vector<16x6xf32>
    %cst_40 = arith.constant dense<0.000000e+00> : vector<16xf32>
    %128 = vector.multi_reduction <add>, %127, %cst_40 [1] : vector<16x6xf32> to vector<16xf32>
    %129 = vector.shape_cast %128 : vector<16xf32> to vector<16x1xf32>
    %130 = math.log %129 : vector<16x1xf32>
    %131 = vector.broadcast %130 : vector<16x1xf32> to vector<16x6xf32>
    %132 = arith.subf %126, %131 : vector<16x6xf32>
    %c0_41 = arith.constant 0 : index
    %c9 = arith.constant 9 : index
    %133 = vector.load %arg6[%c0_41, %c9] : memref<16x18xf32, #tpu.memory_space<vmem>>, vector<16x6xf32>
    tpu.vector_store %arg6[%c0_41, %c9], %132 {strides = array<i32>} : memref<16x18xf32, #tpu.memory_space<vmem>>, vector<16x6xf32>,
    %134 = vector.extract_strided_slice %6 {offsets = [0, 3], sizes = [16, 1], strides = [1, 1]} : vector<16x4xf32> to vector<16x1xf32>
    %135 = tpu.transpose %134, [1, 0] : vector<16x1xf32> -> vector<1x16xf32>
    %136 = vector.extract_strided_slice %13 {offsets = [0, 3], sizes = [16, 1], strides = [1, 1]} : vector<16x4xf32> to vector<16x1xf32>
    %137 = vector.broadcast %136 : vector<16x1xf32> to vector<16x16xf32>
    %138 = vector.broadcast %135 : vector<1x16xf32> to vector<16x16xf32>
    %139 = arith.addf %137, %138 : vector<16x16xf32>
    %cst_42 = arith.constant 0.000000e+00 : f32
    %140 = vector.broadcast %cst_42 : f32 to vector<16x16xf32>
    %141 = arith.cmpf ogt, %139, %140 : vector<16x16xf32>
    %cst_43 = arith.constant 2.000000e-01 : f32
    %142 = vector.broadcast %cst_43 : f32 to vector<16x16xf32>
    %143 = arith.mulf %142, %139 : vector<16x16xf32>
    %144 = arith.select %141, %139, %143 : vector<16x16xi1>, vector<16x16xf32>
    %cst_44 = arith.constant -1.000000e+30 : f32
    %145 = vector.broadcast %cst_44 : f32 to vector<16x16xf32>
    %146 = arith.select %16, %144, %145 : vector<16x16xi1>, vector<16x16xf32>
    %cst_45 = arith.constant dense<0xFF800000> : vector<16xf32>
    %147 = vector.multi_reduction <maximumf>, %146, %cst_45 [1] : vector<16x16xf32> to vector<16xf32>
    %148 = vector.shape_cast %147 : vector<16xf32> to vector<16x1xf32>
    %149 = vector.broadcast %148 : vector<16x1xf32> to vector<16x16xf32>
    %150 = arith.subf %146, %149 : vector<16x16xf32>
    %151 = math.exp %150 : vector<16x16xf32>
    %cst_46 = arith.constant dense<0.000000e+00> : vector<16xf32>
    %152 = vector.multi_reduction <add>, %151, %cst_46 [1] : vector<16x16xf32> to vector<16xf32>
    %153 = vector.shape_cast %152 : vector<16xf32> to vector<16x1xf32>
    %154 = vector.extract_strided_slice %4 {offsets = [0, 15], sizes = [16, 3], strides = [1, 1]} : vector<16x18xf32> to vector<16x3xf32>
    %cst_47 = arith.constant dense<0.000000e+00> : vector<16x3xf32>
    %155 = tpu.matmul %151, %154, %cst_47 {dimension_numbers = #tpu.dot_dimension_numbers<[1], [0], [0], [1], [0, 0, 1, 1], [], []>} : vector<16x16xf32>, vector<16x3xf32>, vector<16x3xf32> -> vector<16x3xf32>
    %156 = tpu.reciprocal %153 {approx = true} : vector<16x1xf32> -> vector<16x1xf32>
    %157 = vector.broadcast %156 : vector<16x1xf32> to vector<16x3xf32>
    %158 = arith.mulf %155, %157 : vector<16x3xf32>
    %159 = vector.extract_strided_slice %3 {offsets = [0, 15], sizes = [1, 3], strides = [1, 1]} : vector<1x18xf32> to vector<1x3xf32>
    %160 = vector.broadcast %159 : vector<1x3xf32> to vector<16x3xf32>
    %161 = arith.addf %158, %160 : vector<16x3xf32>
    %cst_48 = arith.constant dense<0xFF800000> : vector<16xf32>
    %162 = vector.multi_reduction <maximumf>, %161, %cst_48 [1] : vector<16x3xf32> to vector<16xf32>
    %163 = vector.shape_cast %162 : vector<16xf32> to vector<16x1xf32>
    %164 = vector.broadcast %163 : vector<16x1xf32> to vector<16x3xf32>
    %165 = arith.subf %161, %164 : vector<16x3xf32>
    %166 = math.exp %165 : vector<16x3xf32>
    %cst_49 = arith.constant dense<0.000000e+00> : vector<16xf32>
    %167 = vector.multi_reduction <add>, %166, %cst_49 [1] : vector<16x3xf32> to vector<16xf32>
    %168 = vector.shape_cast %167 : vector<16xf32> to vector<16x1xf32>
    %169 = math.log %168 : vector<16x1xf32>
    %170 = vector.broadcast %169 : vector<16x1xf32> to vector<16x3xf32>
    %171 = arith.subf %165, %170 : vector<16x3xf32>
    %c0_50 = arith.constant 0 : index
    %c15 = arith.constant 15 : index
    %172 = vector.load %arg6[%c0_50, %c15] : memref<16x18xf32, #tpu.memory_space<vmem>>, vector<16x3xf32>
    tpu.vector_store %arg6[%c0_50, %c15], %171 {strides = array<i32>} : memref<16x18xf32, #tpu.memory_space<vmem>>, vector<16x3xf32>,
    return
  }
  func.func @transform_0(%arg0: i32) -> (i32, i32) {
    %c0_i32 = arith.constant 0 : i32
    %c0_i32_0 = arith.constant 0 : i32
    %c0_i32_1 = arith.constant 0 : i32
    return %c0_i32, %c0_i32_0 : i32, i32
  }
  func.func @transform_1(%arg0: i32) -> (i32, i32) {
    %c0_i32 = arith.constant 0 : i32
    %c0_i32_0 = arith.constant 0 : i32
    return %arg0, %c0_i32 : i32, i32
  }
  func.func @transform_2(%arg0: i32) -> (i32, i32) {
    %c0_i32 = arith.constant 0 : i32
    %c0_i32_0 = arith.constant 0 : i32
    %c0_i32_1 = arith.constant 0 : i32
    return %c0_i32, %c0_i32_0 : i32, i32
  }
  func.func @transform_3(%arg0: i32) -> (i32, i32) {
    %c0_i32 = arith.constant 0 : i32
    %c0_i32_0 = arith.constant 0 : i32
    %c0_i32_1 = arith.constant 0 : i32
    return %c0_i32, %c0_i32_0 : i32, i32
  }
  func.func @transform_4(%arg0: i32) -> (i32, i32) {
    %c0_i32 = arith.constant 0 : i32
    %c0_i32_0 = arith.constant 0 : i32
    %c0_i32_1 = arith.constant 0 : i32
    return %c0_i32, %c0_i32_0 : i32, i32
  }
  func.func @transform_5(%arg0: i32) -> (i32, i32) {
    %c0_i32 = arith.constant 0 : i32
    %c0_i32_0 = arith.constant 0 : i32
    return %arg0, %c0_i32 : i32, i32
  }
}

module attributes {stable_mosaic.version = 11 : i64} {
  func.func @kernel(%arg0: i32, %arg1: memref<16x64xf32, #tpu.memory_space<vmem>>, %arg2: memref<16x16xbf16, #tpu.memory_space<vmem>>, %arg3: memref<64x64xf32, #tpu.memory_space<vmem>>, %arg4: memref<64x16xf32, #tpu.memory_space<vmem>>, %arg5: memref<1x64xf32, #tpu.memory_space<vmem>>, %arg6: memref<16x64xf32, #tpu.memory_space<vmem>>) attributes {dimension_semantics = [#tpu.dimension_semantics<parallel>], iteration_bounds = array<i64: 1>, scalar_prefetch = 0 : i64, scratch_operands = 0 : i64, tpu.core_type = #tpu.core_type<tc>, window_params = [{pipeline_mode = #tpu.pipeline_mode<synchronous>, transform_indices = @transform_0, window_bounds = array<i64: 16, 64>}, {transform_indices = @transform_1, window_bounds = array<i64: 16, 16>}, {pipeline_mode = #tpu.pipeline_mode<synchronous>, transform_indices = @transform_2, window_bounds = array<i64: 64, 64>}, {pipeline_mode = #tpu.pipeline_mode<synchronous>, transform_indices = @transform_3, window_bounds = array<i64: 64, 16>}, {pipeline_mode = #tpu.pipeline_mode<synchronous>, transform_indices = @transform_4, window_bounds = array<i64: 1, 64>}, {transform_indices = @transform_5, window_bounds = array<i64: 16, 64>}]} {
    %c0 = arith.constant 0 : index
    %c0_0 = arith.constant 0 : index
    %0 = vector.load %arg1[%c0, %c0_0] : memref<16x64xf32, #tpu.memory_space<vmem>>, vector<16x64xf32>
    %c0_1 = arith.constant 0 : index
    %c0_2 = arith.constant 0 : index
    %1 = vector.load %arg3[%c0_1, %c0_2] : memref<64x64xf32, #tpu.memory_space<vmem>>, vector<64x64xf32>
    %c0_3 = arith.constant 0 : index
    %c0_4 = arith.constant 0 : index
    %2 = vector.load %arg4[%c0_3, %c0_4] : memref<64x16xf32, #tpu.memory_space<vmem>>, vector<64x16xf32>
    %c0_5 = arith.constant 0 : index
    %c0_6 = arith.constant 0 : index
    %3 = vector.load %arg5[%c0_5, %c0_6] : memref<1x64xf32, #tpu.memory_space<vmem>>, vector<1x64xf32>
    %cst = arith.constant dense<0.000000e+00> : vector<16x64xf32>
    %4 = tpu.matmul %0, %1, %cst {dimension_numbers = #tpu.dot_dimension_numbers<[1], [0], [0], [1], [0, 0, 1, 1], [], []>} : vector<16x64xf32>, vector<64x64xf32>, vector<16x64xf32> -> vector<16x64xf32>
    %5 = vector.extract_strided_slice %2 {offsets = [0, 0], sizes = [64, 8], strides = [1, 1]} : vector<64x16xf32> to vector<64x8xf32>
    %cst_7 = arith.constant dense<0.000000e+00> : vector<16x8xf32>
    %6 = tpu.matmul %4, %5, %cst_7 {dimension_numbers = #tpu.dot_dimension_numbers<[1], [0], [0], [1], [0, 0, 1, 1], [], []>} : vector<16x64xf32>, vector<64x8xf32>, vector<16x8xf32> -> vector<16x8xf32>
    %c16_i32 = arith.constant 16 : i32
    %7 = arith.muli %arg0, %c16_i32 : i32
    %8 = tpu.assume_multiple %7, 8 : i32
    %9 = arith.index_cast %8 : i32 to index
    %c0_8 = arith.constant 0 : index
    %10 = vector.load %arg1[%9, %c0_8] : memref<16x64xf32, #tpu.memory_space<vmem>>, vector<16x64xf32>
    %cst_9 = arith.constant dense<0.000000e+00> : vector<16x64xf32>
    %11 = tpu.matmul %10, %1, %cst_9 {dimension_numbers = #tpu.dot_dimension_numbers<[1], [0], [0], [1], [0, 0, 1, 1], [], []>} : vector<16x64xf32>, vector<64x64xf32>, vector<16x64xf32> -> vector<16x64xf32>
    %12 = vector.extract_strided_slice %2 {offsets = [0, 8], sizes = [64, 8], strides = [1, 1]} : vector<64x16xf32> to vector<64x8xf32>
    %cst_10 = arith.constant dense<0.000000e+00> : vector<16x8xf32>
    %13 = tpu.matmul %11, %12, %cst_10 {dimension_numbers = #tpu.dot_dimension_numbers<[1], [0], [0], [1], [0, 0, 1, 1], [], []>} : vector<16x64xf32>, vector<64x8xf32>, vector<16x8xf32> -> vector<16x8xf32>
    %c0_11 = arith.constant 0 : index
    %c0_12 = arith.constant 0 : index
    %14 = vector.load %arg2[%c0_11, %c0_12] : memref<16x16xbf16, #tpu.memory_space<vmem>>, vector<16x16xbf16>
    %cst_13 = arith.constant 0.000000e+00 : bf16
    %15 = vector.broadcast %cst_13 : bf16 to vector<16x16xbf16>
    %16 = arith.cmpf ogt, %14, %15 : vector<16x16xbf16>
    %17 = vector.extract_strided_slice %6 {offsets = [0, 0], sizes = [16, 1], strides = [1, 1]} : vector<16x8xf32> to vector<16x1xf32>
    %18 = tpu.transpose %17, [1, 0] : vector<16x1xf32> -> vector<1x16xf32>
    %19 = vector.extract_strided_slice %13 {offsets = [0, 0], sizes = [16, 1], strides = [1, 1]} : vector<16x8xf32> to vector<16x1xf32>
    %20 = vector.broadcast %19 : vector<16x1xf32> to vector<16x16xf32>
    %21 = vector.broadcast %18 : vector<1x16xf32> to vector<16x16xf32>
    %22 = arith.addf %20, %21 : vector<16x16xf32>
    %cst_14 = arith.constant 0.000000e+00 : f32
    %23 = vector.broadcast %cst_14 : f32 to vector<16x16xf32>
    %24 = arith.cmpf ogt, %22, %23 : vector<16x16xf32>
    %cst_15 = arith.constant 2.000000e-01 : f32
    %25 = vector.broadcast %cst_15 : f32 to vector<16x16xf32>
    %26 = arith.mulf %25, %22 : vector<16x16xf32>
    %27 = arith.select %24, %22, %26 : vector<16x16xi1>, vector<16x16xf32>
    %cst_16 = arith.constant -1.000000e+30 : f32
    %28 = vector.broadcast %cst_16 : f32 to vector<16x16xf32>
    %29 = arith.select %16, %27, %28 : vector<16x16xi1>, vector<16x16xf32>
    %cst_17 = arith.constant dense<0xFF800000> : vector<16xf32>
    %30 = vector.multi_reduction <maximumf>, %29, %cst_17 [1] : vector<16x16xf32> to vector<16xf32>
    %31 = vector.shape_cast %30 : vector<16xf32> to vector<16x1xf32>
    %32 = vector.broadcast %31 : vector<16x1xf32> to vector<16x16xf32>
    %33 = arith.subf %29, %32 : vector<16x16xf32>
    %34 = math.exp %33 : vector<16x16xf32>
    %cst_18 = arith.constant dense<0.000000e+00> : vector<16xf32>
    %35 = vector.multi_reduction <add>, %34, %cst_18 [1] : vector<16x16xf32> to vector<16xf32>
    %36 = vector.shape_cast %35 : vector<16xf32> to vector<16x1xf32>
    %37 = vector.extract_strided_slice %4 {offsets = [0, 0], sizes = [16, 8], strides = [1, 1]} : vector<16x64xf32> to vector<16x8xf32>
    %cst_19 = arith.constant dense<0.000000e+00> : vector<16x8xf32>
    %38 = tpu.matmul %34, %37, %cst_19 {dimension_numbers = #tpu.dot_dimension_numbers<[1], [0], [0], [1], [0, 0, 1, 1], [], []>} : vector<16x16xf32>, vector<16x8xf32>, vector<16x8xf32> -> vector<16x8xf32>
    %39 = tpu.reciprocal %36 {approx = true} : vector<16x1xf32> -> vector<16x1xf32>
    %40 = vector.broadcast %39 : vector<16x1xf32> to vector<16x8xf32>
    %41 = arith.mulf %38, %40 : vector<16x8xf32>
    %42 = vector.extract_strided_slice %3 {offsets = [0, 0], sizes = [1, 8], strides = [1, 1]} : vector<1x64xf32> to vector<1x8xf32>
    %43 = vector.broadcast %42 : vector<1x8xf32> to vector<16x8xf32>
    %44 = arith.addf %41, %43 : vector<16x8xf32>
    %c0_20 = arith.constant 0 : index
    %c0_21 = arith.constant 0 : index
    %45 = vector.load %arg6[%c0_20, %c0_21] : memref<16x64xf32, #tpu.memory_space<vmem>>, vector<16x8xf32>
    tpu.vector_store %arg6[%c0_20, %c0_21], %44 {strides = array<i32>} : memref<16x64xf32, #tpu.memory_space<vmem>>, vector<16x8xf32>,
    %46 = vector.extract_strided_slice %6 {offsets = [0, 1], sizes = [16, 1], strides = [1, 1]} : vector<16x8xf32> to vector<16x1xf32>
    %47 = tpu.transpose %46, [1, 0] : vector<16x1xf32> -> vector<1x16xf32>
    %48 = vector.extract_strided_slice %13 {offsets = [0, 1], sizes = [16, 1], strides = [1, 1]} : vector<16x8xf32> to vector<16x1xf32>
    %49 = vector.broadcast %48 : vector<16x1xf32> to vector<16x16xf32>
    %50 = vector.broadcast %47 : vector<1x16xf32> to vector<16x16xf32>
    %51 = arith.addf %49, %50 : vector<16x16xf32>
    %cst_22 = arith.constant 0.000000e+00 : f32
    %52 = vector.broadcast %cst_22 : f32 to vector<16x16xf32>
    %53 = arith.cmpf ogt, %51, %52 : vector<16x16xf32>
    %cst_23 = arith.constant 2.000000e-01 : f32
    %54 = vector.broadcast %cst_23 : f32 to vector<16x16xf32>
    %55 = arith.mulf %54, %51 : vector<16x16xf32>
    %56 = arith.select %53, %51, %55 : vector<16x16xi1>, vector<16x16xf32>
    %cst_24 = arith.constant -1.000000e+30 : f32
    %57 = vector.broadcast %cst_24 : f32 to vector<16x16xf32>
    %58 = arith.select %16, %56, %57 : vector<16x16xi1>, vector<16x16xf32>
    %cst_25 = arith.constant dense<0xFF800000> : vector<16xf32>
    %59 = vector.multi_reduction <maximumf>, %58, %cst_25 [1] : vector<16x16xf32> to vector<16xf32>
    %60 = vector.shape_cast %59 : vector<16xf32> to vector<16x1xf32>
    %61 = vector.broadcast %60 : vector<16x1xf32> to vector<16x16xf32>
    %62 = arith.subf %58, %61 : vector<16x16xf32>
    %63 = math.exp %62 : vector<16x16xf32>
    %cst_26 = arith.constant dense<0.000000e+00> : vector<16xf32>
    %64 = vector.multi_reduction <add>, %63, %cst_26 [1] : vector<16x16xf32> to vector<16xf32>
    %65 = vector.shape_cast %64 : vector<16xf32> to vector<16x1xf32>
    %66 = vector.extract_strided_slice %4 {offsets = [0, 8], sizes = [16, 8], strides = [1, 1]} : vector<16x64xf32> to vector<16x8xf32>
    %cst_27 = arith.constant dense<0.000000e+00> : vector<16x8xf32>
    %67 = tpu.matmul %63, %66, %cst_27 {dimension_numbers = #tpu.dot_dimension_numbers<[1], [0], [0], [1], [0, 0, 1, 1], [], []>} : vector<16x16xf32>, vector<16x8xf32>, vector<16x8xf32> -> vector<16x8xf32>
    %68 = tpu.reciprocal %65 {approx = true} : vector<16x1xf32> -> vector<16x1xf32>
    %69 = vector.broadcast %68 : vector<16x1xf32> to vector<16x8xf32>
    %70 = arith.mulf %67, %69 : vector<16x8xf32>
    %71 = vector.extract_strided_slice %3 {offsets = [0, 8], sizes = [1, 8], strides = [1, 1]} : vector<1x64xf32> to vector<1x8xf32>
    %72 = vector.broadcast %71 : vector<1x8xf32> to vector<16x8xf32>
    %73 = arith.addf %70, %72 : vector<16x8xf32>
    %c0_28 = arith.constant 0 : index
    %c8 = arith.constant 8 : index
    %74 = vector.load %arg6[%c0_28, %c8] : memref<16x64xf32, #tpu.memory_space<vmem>>, vector<16x8xf32>
    tpu.vector_store %arg6[%c0_28, %c8], %73 {strides = array<i32>} : memref<16x64xf32, #tpu.memory_space<vmem>>, vector<16x8xf32>,
    %75 = vector.extract_strided_slice %6 {offsets = [0, 2], sizes = [16, 1], strides = [1, 1]} : vector<16x8xf32> to vector<16x1xf32>
    %76 = tpu.transpose %75, [1, 0] : vector<16x1xf32> -> vector<1x16xf32>
    %77 = vector.extract_strided_slice %13 {offsets = [0, 2], sizes = [16, 1], strides = [1, 1]} : vector<16x8xf32> to vector<16x1xf32>
    %78 = vector.broadcast %77 : vector<16x1xf32> to vector<16x16xf32>
    %79 = vector.broadcast %76 : vector<1x16xf32> to vector<16x16xf32>
    %80 = arith.addf %78, %79 : vector<16x16xf32>
    %cst_29 = arith.constant 0.000000e+00 : f32
    %81 = vector.broadcast %cst_29 : f32 to vector<16x16xf32>
    %82 = arith.cmpf ogt, %80, %81 : vector<16x16xf32>
    %cst_30 = arith.constant 2.000000e-01 : f32
    %83 = vector.broadcast %cst_30 : f32 to vector<16x16xf32>
    %84 = arith.mulf %83, %80 : vector<16x16xf32>
    %85 = arith.select %82, %80, %84 : vector<16x16xi1>, vector<16x16xf32>
    %cst_31 = arith.constant -1.000000e+30 : f32
    %86 = vector.broadcast %cst_31 : f32 to vector<16x16xf32>
    %87 = arith.select %16, %85, %86 : vector<16x16xi1>, vector<16x16xf32>
    %cst_32 = arith.constant dense<0xFF800000> : vector<16xf32>
    %88 = vector.multi_reduction <maximumf>, %87, %cst_32 [1] : vector<16x16xf32> to vector<16xf32>
    %89 = vector.shape_cast %88 : vector<16xf32> to vector<16x1xf32>
    %90 = vector.broadcast %89 : vector<16x1xf32> to vector<16x16xf32>
    %91 = arith.subf %87, %90 : vector<16x16xf32>
    %92 = math.exp %91 : vector<16x16xf32>
    %cst_33 = arith.constant dense<0.000000e+00> : vector<16xf32>
    %93 = vector.multi_reduction <add>, %92, %cst_33 [1] : vector<16x16xf32> to vector<16xf32>
    %94 = vector.shape_cast %93 : vector<16xf32> to vector<16x1xf32>
    %95 = vector.extract_strided_slice %4 {offsets = [0, 16], sizes = [16, 8], strides = [1, 1]} : vector<16x64xf32> to vector<16x8xf32>
    %cst_34 = arith.constant dense<0.000000e+00> : vector<16x8xf32>
    %96 = tpu.matmul %92, %95, %cst_34 {dimension_numbers = #tpu.dot_dimension_numbers<[1], [0], [0], [1], [0, 0, 1, 1], [], []>} : vector<16x16xf32>, vector<16x8xf32>, vector<16x8xf32> -> vector<16x8xf32>
    %97 = tpu.reciprocal %94 {approx = true} : vector<16x1xf32> -> vector<16x1xf32>
    %98 = vector.broadcast %97 : vector<16x1xf32> to vector<16x8xf32>
    %99 = arith.mulf %96, %98 : vector<16x8xf32>
    %100 = vector.extract_strided_slice %3 {offsets = [0, 16], sizes = [1, 8], strides = [1, 1]} : vector<1x64xf32> to vector<1x8xf32>
    %101 = vector.broadcast %100 : vector<1x8xf32> to vector<16x8xf32>
    %102 = arith.addf %99, %101 : vector<16x8xf32>
    %c0_35 = arith.constant 0 : index
    %c16 = arith.constant 16 : index
    %103 = vector.load %arg6[%c0_35, %c16] : memref<16x64xf32, #tpu.memory_space<vmem>>, vector<16x8xf32>
    tpu.vector_store %arg6[%c0_35, %c16], %102 {strides = array<i32>} : memref<16x64xf32, #tpu.memory_space<vmem>>, vector<16x8xf32>,
    %104 = vector.extract_strided_slice %6 {offsets = [0, 3], sizes = [16, 1], strides = [1, 1]} : vector<16x8xf32> to vector<16x1xf32>
    %105 = tpu.transpose %104, [1, 0] : vector<16x1xf32> -> vector<1x16xf32>
    %106 = vector.extract_strided_slice %13 {offsets = [0, 3], sizes = [16, 1], strides = [1, 1]} : vector<16x8xf32> to vector<16x1xf32>
    %107 = vector.broadcast %106 : vector<16x1xf32> to vector<16x16xf32>
    %108 = vector.broadcast %105 : vector<1x16xf32> to vector<16x16xf32>
    %109 = arith.addf %107, %108 : vector<16x16xf32>
    %cst_36 = arith.constant 0.000000e+00 : f32
    %110 = vector.broadcast %cst_36 : f32 to vector<16x16xf32>
    %111 = arith.cmpf ogt, %109, %110 : vector<16x16xf32>
    %cst_37 = arith.constant 2.000000e-01 : f32
    %112 = vector.broadcast %cst_37 : f32 to vector<16x16xf32>
    %113 = arith.mulf %112, %109 : vector<16x16xf32>
    %114 = arith.select %111, %109, %113 : vector<16x16xi1>, vector<16x16xf32>
    %cst_38 = arith.constant -1.000000e+30 : f32
    %115 = vector.broadcast %cst_38 : f32 to vector<16x16xf32>
    %116 = arith.select %16, %114, %115 : vector<16x16xi1>, vector<16x16xf32>
    %cst_39 = arith.constant dense<0xFF800000> : vector<16xf32>
    %117 = vector.multi_reduction <maximumf>, %116, %cst_39 [1] : vector<16x16xf32> to vector<16xf32>
    %118 = vector.shape_cast %117 : vector<16xf32> to vector<16x1xf32>
    %119 = vector.broadcast %118 : vector<16x1xf32> to vector<16x16xf32>
    %120 = arith.subf %116, %119 : vector<16x16xf32>
    %121 = math.exp %120 : vector<16x16xf32>
    %cst_40 = arith.constant dense<0.000000e+00> : vector<16xf32>
    %122 = vector.multi_reduction <add>, %121, %cst_40 [1] : vector<16x16xf32> to vector<16xf32>
    %123 = vector.shape_cast %122 : vector<16xf32> to vector<16x1xf32>
    %124 = vector.extract_strided_slice %4 {offsets = [0, 24], sizes = [16, 8], strides = [1, 1]} : vector<16x64xf32> to vector<16x8xf32>
    %cst_41 = arith.constant dense<0.000000e+00> : vector<16x8xf32>
    %125 = tpu.matmul %121, %124, %cst_41 {dimension_numbers = #tpu.dot_dimension_numbers<[1], [0], [0], [1], [0, 0, 1, 1], [], []>} : vector<16x16xf32>, vector<16x8xf32>, vector<16x8xf32> -> vector<16x8xf32>
    %126 = tpu.reciprocal %123 {approx = true} : vector<16x1xf32> -> vector<16x1xf32>
    %127 = vector.broadcast %126 : vector<16x1xf32> to vector<16x8xf32>
    %128 = arith.mulf %125, %127 : vector<16x8xf32>
    %129 = vector.extract_strided_slice %3 {offsets = [0, 24], sizes = [1, 8], strides = [1, 1]} : vector<1x64xf32> to vector<1x8xf32>
    %130 = vector.broadcast %129 : vector<1x8xf32> to vector<16x8xf32>
    %131 = arith.addf %128, %130 : vector<16x8xf32>
    %c0_42 = arith.constant 0 : index
    %c24 = arith.constant 24 : index
    %132 = vector.load %arg6[%c0_42, %c24] : memref<16x64xf32, #tpu.memory_space<vmem>>, vector<16x8xf32>
    tpu.vector_store %arg6[%c0_42, %c24], %131 {strides = array<i32>} : memref<16x64xf32, #tpu.memory_space<vmem>>, vector<16x8xf32>,
    %133 = vector.extract_strided_slice %6 {offsets = [0, 4], sizes = [16, 1], strides = [1, 1]} : vector<16x8xf32> to vector<16x1xf32>
    %134 = tpu.transpose %133, [1, 0] : vector<16x1xf32> -> vector<1x16xf32>
    %135 = vector.extract_strided_slice %13 {offsets = [0, 4], sizes = [16, 1], strides = [1, 1]} : vector<16x8xf32> to vector<16x1xf32>
    %136 = vector.broadcast %135 : vector<16x1xf32> to vector<16x16xf32>
    %137 = vector.broadcast %134 : vector<1x16xf32> to vector<16x16xf32>
    %138 = arith.addf %136, %137 : vector<16x16xf32>
    %cst_43 = arith.constant 0.000000e+00 : f32
    %139 = vector.broadcast %cst_43 : f32 to vector<16x16xf32>
    %140 = arith.cmpf ogt, %138, %139 : vector<16x16xf32>
    %cst_44 = arith.constant 2.000000e-01 : f32
    %141 = vector.broadcast %cst_44 : f32 to vector<16x16xf32>
    %142 = arith.mulf %141, %138 : vector<16x16xf32>
    %143 = arith.select %140, %138, %142 : vector<16x16xi1>, vector<16x16xf32>
    %cst_45 = arith.constant -1.000000e+30 : f32
    %144 = vector.broadcast %cst_45 : f32 to vector<16x16xf32>
    %145 = arith.select %16, %143, %144 : vector<16x16xi1>, vector<16x16xf32>
    %cst_46 = arith.constant dense<0xFF800000> : vector<16xf32>
    %146 = vector.multi_reduction <maximumf>, %145, %cst_46 [1] : vector<16x16xf32> to vector<16xf32>
    %147 = vector.shape_cast %146 : vector<16xf32> to vector<16x1xf32>
    %148 = vector.broadcast %147 : vector<16x1xf32> to vector<16x16xf32>
    %149 = arith.subf %145, %148 : vector<16x16xf32>
    %150 = math.exp %149 : vector<16x16xf32>
    %cst_47 = arith.constant dense<0.000000e+00> : vector<16xf32>
    %151 = vector.multi_reduction <add>, %150, %cst_47 [1] : vector<16x16xf32> to vector<16xf32>
    %152 = vector.shape_cast %151 : vector<16xf32> to vector<16x1xf32>
    %153 = vector.extract_strided_slice %4 {offsets = [0, 32], sizes = [16, 8], strides = [1, 1]} : vector<16x64xf32> to vector<16x8xf32>
    %cst_48 = arith.constant dense<0.000000e+00> : vector<16x8xf32>
    %154 = tpu.matmul %150, %153, %cst_48 {dimension_numbers = #tpu.dot_dimension_numbers<[1], [0], [0], [1], [0, 0, 1, 1], [], []>} : vector<16x16xf32>, vector<16x8xf32>, vector<16x8xf32> -> vector<16x8xf32>
    %155 = tpu.reciprocal %152 {approx = true} : vector<16x1xf32> -> vector<16x1xf32>
    %156 = vector.broadcast %155 : vector<16x1xf32> to vector<16x8xf32>
    %157 = arith.mulf %154, %156 : vector<16x8xf32>
    %158 = vector.extract_strided_slice %3 {offsets = [0, 32], sizes = [1, 8], strides = [1, 1]} : vector<1x64xf32> to vector<1x8xf32>
    %159 = vector.broadcast %158 : vector<1x8xf32> to vector<16x8xf32>
    %160 = arith.addf %157, %159 : vector<16x8xf32>
    %c0_49 = arith.constant 0 : index
    %c32 = arith.constant 32 : index
    %161 = vector.load %arg6[%c0_49, %c32] : memref<16x64xf32, #tpu.memory_space<vmem>>, vector<16x8xf32>
    tpu.vector_store %arg6[%c0_49, %c32], %160 {strides = array<i32>} : memref<16x64xf32, #tpu.memory_space<vmem>>, vector<16x8xf32>,
    %162 = vector.extract_strided_slice %6 {offsets = [0, 5], sizes = [16, 1], strides = [1, 1]} : vector<16x8xf32> to vector<16x1xf32>
    %163 = tpu.transpose %162, [1, 0] : vector<16x1xf32> -> vector<1x16xf32>
    %164 = vector.extract_strided_slice %13 {offsets = [0, 5], sizes = [16, 1], strides = [1, 1]} : vector<16x8xf32> to vector<16x1xf32>
    %165 = vector.broadcast %164 : vector<16x1xf32> to vector<16x16xf32>
    %166 = vector.broadcast %163 : vector<1x16xf32> to vector<16x16xf32>
    %167 = arith.addf %165, %166 : vector<16x16xf32>
    %cst_50 = arith.constant 0.000000e+00 : f32
    %168 = vector.broadcast %cst_50 : f32 to vector<16x16xf32>
    %169 = arith.cmpf ogt, %167, %168 : vector<16x16xf32>
    %cst_51 = arith.constant 2.000000e-01 : f32
    %170 = vector.broadcast %cst_51 : f32 to vector<16x16xf32>
    %171 = arith.mulf %170, %167 : vector<16x16xf32>
    %172 = arith.select %169, %167, %171 : vector<16x16xi1>, vector<16x16xf32>
    %cst_52 = arith.constant -1.000000e+30 : f32
    %173 = vector.broadcast %cst_52 : f32 to vector<16x16xf32>
    %174 = arith.select %16, %172, %173 : vector<16x16xi1>, vector<16x16xf32>
    %cst_53 = arith.constant dense<0xFF800000> : vector<16xf32>
    %175 = vector.multi_reduction <maximumf>, %174, %cst_53 [1] : vector<16x16xf32> to vector<16xf32>
    %176 = vector.shape_cast %175 : vector<16xf32> to vector<16x1xf32>
    %177 = vector.broadcast %176 : vector<16x1xf32> to vector<16x16xf32>
    %178 = arith.subf %174, %177 : vector<16x16xf32>
    %179 = math.exp %178 : vector<16x16xf32>
    %cst_54 = arith.constant dense<0.000000e+00> : vector<16xf32>
    %180 = vector.multi_reduction <add>, %179, %cst_54 [1] : vector<16x16xf32> to vector<16xf32>
    %181 = vector.shape_cast %180 : vector<16xf32> to vector<16x1xf32>
    %182 = vector.extract_strided_slice %4 {offsets = [0, 40], sizes = [16, 8], strides = [1, 1]} : vector<16x64xf32> to vector<16x8xf32>
    %cst_55 = arith.constant dense<0.000000e+00> : vector<16x8xf32>
    %183 = tpu.matmul %179, %182, %cst_55 {dimension_numbers = #tpu.dot_dimension_numbers<[1], [0], [0], [1], [0, 0, 1, 1], [], []>} : vector<16x16xf32>, vector<16x8xf32>, vector<16x8xf32> -> vector<16x8xf32>
    %184 = tpu.reciprocal %181 {approx = true} : vector<16x1xf32> -> vector<16x1xf32>
    %185 = vector.broadcast %184 : vector<16x1xf32> to vector<16x8xf32>
    %186 = arith.mulf %183, %185 : vector<16x8xf32>
    %187 = vector.extract_strided_slice %3 {offsets = [0, 40], sizes = [1, 8], strides = [1, 1]} : vector<1x64xf32> to vector<1x8xf32>
    %188 = vector.broadcast %187 : vector<1x8xf32> to vector<16x8xf32>
    %189 = arith.addf %186, %188 : vector<16x8xf32>
    %c0_56 = arith.constant 0 : index
    %c40 = arith.constant 40 : index
    %190 = vector.load %arg6[%c0_56, %c40] : memref<16x64xf32, #tpu.memory_space<vmem>>, vector<16x8xf32>
    tpu.vector_store %arg6[%c0_56, %c40], %189 {strides = array<i32>} : memref<16x64xf32, #tpu.memory_space<vmem>>, vector<16x8xf32>,
    %191 = vector.extract_strided_slice %6 {offsets = [0, 6], sizes = [16, 1], strides = [1, 1]} : vector<16x8xf32> to vector<16x1xf32>
    %192 = tpu.transpose %191, [1, 0] : vector<16x1xf32> -> vector<1x16xf32>
    %193 = vector.extract_strided_slice %13 {offsets = [0, 6], sizes = [16, 1], strides = [1, 1]} : vector<16x8xf32> to vector<16x1xf32>
    %194 = vector.broadcast %193 : vector<16x1xf32> to vector<16x16xf32>
    %195 = vector.broadcast %192 : vector<1x16xf32> to vector<16x16xf32>
    %196 = arith.addf %194, %195 : vector<16x16xf32>
    %cst_57 = arith.constant 0.000000e+00 : f32
    %197 = vector.broadcast %cst_57 : f32 to vector<16x16xf32>
    %198 = arith.cmpf ogt, %196, %197 : vector<16x16xf32>
    %cst_58 = arith.constant 2.000000e-01 : f32
    %199 = vector.broadcast %cst_58 : f32 to vector<16x16xf32>
    %200 = arith.mulf %199, %196 : vector<16x16xf32>
    %201 = arith.select %198, %196, %200 : vector<16x16xi1>, vector<16x16xf32>
    %cst_59 = arith.constant -1.000000e+30 : f32
    %202 = vector.broadcast %cst_59 : f32 to vector<16x16xf32>
    %203 = arith.select %16, %201, %202 : vector<16x16xi1>, vector<16x16xf32>
    %cst_60 = arith.constant dense<0xFF800000> : vector<16xf32>
    %204 = vector.multi_reduction <maximumf>, %203, %cst_60 [1] : vector<16x16xf32> to vector<16xf32>
    %205 = vector.shape_cast %204 : vector<16xf32> to vector<16x1xf32>
    %206 = vector.broadcast %205 : vector<16x1xf32> to vector<16x16xf32>
    %207 = arith.subf %203, %206 : vector<16x16xf32>
    %208 = math.exp %207 : vector<16x16xf32>
    %cst_61 = arith.constant dense<0.000000e+00> : vector<16xf32>
    %209 = vector.multi_reduction <add>, %208, %cst_61 [1] : vector<16x16xf32> to vector<16xf32>
    %210 = vector.shape_cast %209 : vector<16xf32> to vector<16x1xf32>
    %211 = vector.extract_strided_slice %4 {offsets = [0, 48], sizes = [16, 8], strides = [1, 1]} : vector<16x64xf32> to vector<16x8xf32>
    %cst_62 = arith.constant dense<0.000000e+00> : vector<16x8xf32>
    %212 = tpu.matmul %208, %211, %cst_62 {dimension_numbers = #tpu.dot_dimension_numbers<[1], [0], [0], [1], [0, 0, 1, 1], [], []>} : vector<16x16xf32>, vector<16x8xf32>, vector<16x8xf32> -> vector<16x8xf32>
    %213 = tpu.reciprocal %210 {approx = true} : vector<16x1xf32> -> vector<16x1xf32>
    %214 = vector.broadcast %213 : vector<16x1xf32> to vector<16x8xf32>
    %215 = arith.mulf %212, %214 : vector<16x8xf32>
    %216 = vector.extract_strided_slice %3 {offsets = [0, 48], sizes = [1, 8], strides = [1, 1]} : vector<1x64xf32> to vector<1x8xf32>
    %217 = vector.broadcast %216 : vector<1x8xf32> to vector<16x8xf32>
    %218 = arith.addf %215, %217 : vector<16x8xf32>
    %c0_63 = arith.constant 0 : index
    %c48 = arith.constant 48 : index
    %219 = vector.load %arg6[%c0_63, %c48] : memref<16x64xf32, #tpu.memory_space<vmem>>, vector<16x8xf32>
    tpu.vector_store %arg6[%c0_63, %c48], %218 {strides = array<i32>} : memref<16x64xf32, #tpu.memory_space<vmem>>, vector<16x8xf32>,
    %220 = vector.extract_strided_slice %6 {offsets = [0, 7], sizes = [16, 1], strides = [1, 1]} : vector<16x8xf32> to vector<16x1xf32>
    %221 = tpu.transpose %220, [1, 0] : vector<16x1xf32> -> vector<1x16xf32>
    %222 = vector.extract_strided_slice %13 {offsets = [0, 7], sizes = [16, 1], strides = [1, 1]} : vector<16x8xf32> to vector<16x1xf32>
    %223 = vector.broadcast %222 : vector<16x1xf32> to vector<16x16xf32>
    %224 = vector.broadcast %221 : vector<1x16xf32> to vector<16x16xf32>
    %225 = arith.addf %223, %224 : vector<16x16xf32>
    %cst_64 = arith.constant 0.000000e+00 : f32
    %226 = vector.broadcast %cst_64 : f32 to vector<16x16xf32>
    %227 = arith.cmpf ogt, %225, %226 : vector<16x16xf32>
    %cst_65 = arith.constant 2.000000e-01 : f32
    %228 = vector.broadcast %cst_65 : f32 to vector<16x16xf32>
    %229 = arith.mulf %228, %225 : vector<16x16xf32>
    %230 = arith.select %227, %225, %229 : vector<16x16xi1>, vector<16x16xf32>
    %cst_66 = arith.constant -1.000000e+30 : f32
    %231 = vector.broadcast %cst_66 : f32 to vector<16x16xf32>
    %232 = arith.select %16, %230, %231 : vector<16x16xi1>, vector<16x16xf32>
    %cst_67 = arith.constant dense<0xFF800000> : vector<16xf32>
    %233 = vector.multi_reduction <maximumf>, %232, %cst_67 [1] : vector<16x16xf32> to vector<16xf32>
    %234 = vector.shape_cast %233 : vector<16xf32> to vector<16x1xf32>
    %235 = vector.broadcast %234 : vector<16x1xf32> to vector<16x16xf32>
    %236 = arith.subf %232, %235 : vector<16x16xf32>
    %237 = math.exp %236 : vector<16x16xf32>
    %cst_68 = arith.constant dense<0.000000e+00> : vector<16xf32>
    %238 = vector.multi_reduction <add>, %237, %cst_68 [1] : vector<16x16xf32> to vector<16xf32>
    %239 = vector.shape_cast %238 : vector<16xf32> to vector<16x1xf32>
    %240 = vector.extract_strided_slice %4 {offsets = [0, 56], sizes = [16, 8], strides = [1, 1]} : vector<16x64xf32> to vector<16x8xf32>
    %cst_69 = arith.constant dense<0.000000e+00> : vector<16x8xf32>
    %241 = tpu.matmul %237, %240, %cst_69 {dimension_numbers = #tpu.dot_dimension_numbers<[1], [0], [0], [1], [0, 0, 1, 1], [], []>} : vector<16x16xf32>, vector<16x8xf32>, vector<16x8xf32> -> vector<16x8xf32>
    %242 = tpu.reciprocal %239 {approx = true} : vector<16x1xf32> -> vector<16x1xf32>
    %243 = vector.broadcast %242 : vector<16x1xf32> to vector<16x8xf32>
    %244 = arith.mulf %241, %243 : vector<16x8xf32>
    %245 = vector.extract_strided_slice %3 {offsets = [0, 56], sizes = [1, 8], strides = [1, 1]} : vector<1x64xf32> to vector<1x8xf32>
    %246 = vector.broadcast %245 : vector<1x8xf32> to vector<16x8xf32>
    %247 = arith.addf %244, %246 : vector<16x8xf32>
    %c0_70 = arith.constant 0 : index
    %c56 = arith.constant 56 : index
    %248 = vector.load %arg6[%c0_70, %c56] : memref<16x64xf32, #tpu.memory_space<vmem>>, vector<16x8xf32>
    tpu.vector_store %arg6[%c0_70, %c56], %247 {strides = array<i32>} : memref<16x64xf32, #tpu.memory_space<vmem>>, vector<16x8xf32>,
    return
  }
  func.func @transform_0(%arg0: i32) -> (i32, i32) {
    %c0_i32 = arith.constant 0 : i32
    %c0_i32_0 = arith.constant 0 : i32
    %c0_i32_1 = arith.constant 0 : i32
    return %c0_i32, %c0_i32_0 : i32, i32
  }
  func.func @transform_1(%arg0: i32) -> (i32, i32) {
    %c0_i32 = arith.constant 0 : i32
    %c0_i32_0 = arith.constant 0 : i32
    return %arg0, %c0_i32 : i32, i32
  }
  func.func @transform_2(%arg0: i32) -> (i32, i32) {
    %c0_i32 = arith.constant 0 : i32
    %c0_i32_0 = arith.constant 0 : i32
    %c0_i32_1 = arith.constant 0 : i32
    return %c0_i32, %c0_i32_0 : i32, i32
  }
  func.func @transform_3(%arg0: i32) -> (i32, i32) {
    %c0_i32 = arith.constant 0 : i32
    %c0_i32_0 = arith.constant 0 : i32
    %c0_i32_1 = arith.constant 0 : i32
    return %c0_i32, %c0_i32_0 : i32, i32
  }
  func.func @transform_4(%arg0: i32) -> (i32, i32) {
    %c0_i32 = arith.constant 0 : i32
    %c0_i32_0 = arith.constant 0 : i32
    %c0_i32_1 = arith.constant 0 : i32
    return %c0_i32, %c0_i32_0 : i32, i32
  }
  func.func @transform_5(%arg0: i32) -> (i32, i32) {
    %c0_i32 = arith.constant 0 : i32
    %c0_i32_0 = arith.constant 0 : i32
    return %arg0, %c0_i32 : i32, i32
  }
}

</mosaic_0001>

<bundles_post_ra>
// kernel: multitask_gat_forward.3
= control target key start
LH: loop header
LB: loop body
LE: loop exit
PB: predicated region body
PF: predicated region fallthrough
CT: control target
= control target key end

     0   :  { %vm35_vm0 = vcmask 64512   ;;  %s2438_s13 = smov 120   ;;  %vm117_vm1 = vcmask 523264   ;;  %s2440_s15 = smov 96   ;;  %v2443_v56 = vmov 0   ;;  %v2451_v61 = vmov 1   ;;  %s2917_s2 = inlined_call_operand.vmem [shape: f32[8,64], index: 2, kind: input, shape index: {}]   ;;  %s2918_s0 = inlined_call_operand.vmem [shape: f32[16,8], index: 0, kind: input, shape index: {}]   ;;  %s2919_s3 = inlined_call_operand.vmem [shape: f32[64,16], index: 3, kind: input, shape index: {}]   ;;  %s2920_s4 = inlined_call_operand.vmem [shape: f32[1,64], index: 4, kind: input, shape index: {}]   ;;  %s2921_s1 = inlined_call_operand.vmem [shape: bf16[16,16], index: 1, kind: input, shape index: {}]   ;;  %s2922_s5 = inlined_call_operand.vmem [shape: f32[16,64], index: 5, kind: output, shape index: {}]  }
   0x1   :  { %v25_v0 = vld [vmem:[%s2917_s2] sm:$0xff]  ;;  %v24_v2 = vld [vmem:[%s2918_s0 + $0x8] sm:$0xff]  ;;  %v28_v5 = vld [vmem:[%s2919_s3 + $0x10] sm:$0xff]  ;;  %s2441_s16 = smov 112   ;;  %s2442_s17 = smov 88   ;;  %2316 = vset.pattern.permute.xlu1 %v2443_v56  ;;  %v2452_v62 = vmov 2  }
   0x2   :  { %v23_v1 = vld [vmem:[%s2918_s0] sm:$0xff]  ;;  %2073 = vmatprep.subr.mxu0 %v25_v0  ;;  %v27_v4 = vld [vmem:[%s2919_s3 + $0x8] sm:$0xff]  ;;  %v29_v7 = vld [vmem:[%s2919_s3 + $0x18] sm:$0xff]  ;;  %s2444_s18 = smov 126   ;;  %s2445_s19 = smov 127   ;;  %v2453_v63 = vmov 3  }
   0x3   :  { %2075 = vmatprep.mubr.msk.f32.mxu0 %vm35_vm0, %v23_v1  ;;  %v26_v3 = vld [vmem:[%s2919_s3] sm:$0xff]  ;;  %2074 = vmatpush3.msra.mxu0 %v25_v0  ;;  %v31_v9 = vld [vmem:[%s2919_s3 + $0x28] sm:$0xff]  ;;  %v32_v12 = vld [vmem:[%s2919_s3 + $0x30] sm:$0xff]  ;;  %v2181_v14 = vpack.c.bf16 %v29_v7, %v28_v5  ;;  %v2276_v15 = vpack.i.bf16 %v29_v7, %v28_v5  ;;  %s2446_s20 = smov 122   ;;  %s2447_s21 = smov 125   ;;  %vm463_vm6 = vcmask 130048  }
   0x4   :  { %v2271_v6 = vpack.i.bf16 %v27_v4, %v26_v3  ;;  %v30_v8 = vld [vmem:[%s2919_s3 + $0x20] sm:$0xff]  ;;  %v2177_v10 = vpack.c.bf16 %v27_v4, %v26_v3  ;;  %2076 = vmatmul.mubr.msk.f32.vlgmr.msra.gmra.mrb[0].mxu0 %vm35_vm0, %v24_v2  ;;  %2097 = vmatprep.subr.mxu0 %v25_v0  ;;  %v33_v13 = vld [vmem:[%s2919_s3 + $0x38] sm:$0xff]  ;;  %s2448_s22 = smov 124   ;;  %s2449_s23 = smov 123   ;;  %v2457_v3 = vmov 7  }
   0x5   :  { %v2281_v11 = vpack.i.bf16 %v31_v9, %v30_v8  ;;  %2098 = vmatpush3.msra.mxu0 %v25_v0  ;;  %2099 = vmatprep.mubr.msk.f32.mxu0 %vm35_vm0, %v23_v1  ;;  %v2286_v16 = vpack.i.bf16 %v33_v13, %v32_v12  ;;  %v2185_v17 = vpack.c.bf16 %v31_v9, %v30_v8  ;;  %v2541_v18 = vld [vmem:[%s2920_s4] ss:$0 sm:$0xff]  ;;  %s2439_s4 = smov 104   ;;  %s2450_s24 = smov 121   ;;  %v2454_v0 = vmov 4  }
   0x6   :  { %2272 = vrot.lane.b32.xlu0 %v2271_v6, %s2438_s13  ;;  %2178 = vmatprep.subr.bf16.mxu1 %v2177_v10  ;;  %v2189_v19 = vpack.c.bf16 %v33_v13, %v32_v12  ;;  %v2455_v1 = vmov 5   ;;  %s2459_s28 = smov 80   ;;  %s2460_s7 = smov 8  }
   0x7   :  { %2282 = vrot.lane.b32.xlu1 %v2281_v11, %s2438_s13  ;;  %2180 = vmatpush3.bf16.msra.mxu1 %v2177_v10  ;;  %s2461_s8 = smov 16   ;;  %s2462_s9 = smov 24  }
   0x8   :  { %2100 = vmatmul.mubr.msk.f32.vlgmr.msra.gmra.mrb[2].mxu0 %vm35_vm0, %v24_v2  ;;  %2182 = vmatprep.subr.bf16.mxu1 %v2181_v14  ;;  %v2456_v2 = vmov 6   ;;  %s2463_s10 = smov 32   ;;  %s2464_s11 = smov 40  }
   0x9   :  { %s2465_s12 = smov 56  }
   0xa   :  { %2277 = vrot.lane.b32.xlu0 %v2276_v15, %s2438_s13 }
   0xb   :  { %2287 = vrot.lane.b32.xlu1 %v2286_v16, %s2438_s13  ;;  %2184 = vmatpush3.bf16.msra.mxu1 %v2181_v14 }
   0xc   :  { %2186 = vmatprep.subr.bf16.mxu1 %v2185_v17 }
   0xe   :  { %760 = vrot.lane.b32.xlu0 %v2541_v18, %s2438_s13 }
   0xf   :  { %2188 = vmatpush3.bf16.msra.mxu1 %v2185_v17 }
  0x10   :  { %2190 = vmatprep.subr.bf16.mxu1 %v2189_v19 }
  0x13   :  { %2192 = vmatpush3.bf16.msra.mxu1 %v2189_v19 }
  0x78   :  { %v2273_v20 = vpop.permute.xlu0 %2272 }
  0x79   :  { %v2283_v21 = vpop.permute.xlu1 %2282  ;;  %v2275_v22 = vunpack.i.h.bf16 %v2273_v20  ;;  %v2274_v23 = vunpack.i.l.bf16 %v2273_v20 }
  0x7a   :  { %v2285_v25 = vunpack.i.h.bf16 %v2283_v21  ;;  %v2284_v26 = vunpack.i.l.bf16 %v2283_v21 }
  0x7b   :  { %v2193_v24 = vpack.c.bf16 %v2275_v22, %v2274_v23  ;;  %v443_v22 = vlaneseq }
  0x7c   :  { %v2278_v27 = vpop.permute.xlu0 %2277  ;;  %v2201_v34 = vpack.c.bf16 %v2285_v25, %v2284_v26 }
  0x7d   :  { %v2288_v28 = vpop.permute.xlu1 %2287  ;;  %v2280_v29 = vunpack.i.h.bf16 %v2278_v27  ;;  %v2279_v30 = vunpack.i.l.bf16 %v2278_v27  ;;  %2194 = vmatprep.subr.bf16.mxu0 %v2193_v24  ;;  %v444_v23 = vshrl.u32 %v443_v22, 7 }
  0x7e   :  { %2196 = vmatpush3.bf16.msra.mxu0 %v2193_v24  ;;  %v2290_v32 = vunpack.i.h.bf16 %v2288_v28  ;;  %v2289_v33 = vunpack.i.l.bf16 %v2288_v28  ;;  %v398_v28 = vld [vmem:[%s2921_s1 + $0x4] sm:$0xf] }
  0x7f   :  { %v2197_v31 = vpack.c.bf16 %v2280_v29, %v2279_v30  ;;  %v2571_v25 = vsub.s32 0, %v444_v23  ;;  %vm400_vm2 = vcmp.gt.bf16.partialorder %v398_v28, 0 }
  0x80   :  { %v2205_v35 = vpack.c.bf16 %v2290_v32, %v2289_v33  ;;  %v2557_v42 = vpop.permute.xlu0 %760  ;;  %v456_v32 = vsel %vm400_vm2, 65537, %v2443_v56 }
  0x81   :  { %2198 = vmatprep.subr.bf16.mxu0 %v2197_v31 }
  0x82   :  { %2200 = vmatpush3.bf16.msra.mxu0 %v2197_v31 }
  0x83   :  { %2202 = vmatprep.subr.bf16.mxu0 %v2201_v34 }
  0x86   :  { %2204 = vmatpush3.bf16.msra.mxu0 %v2201_v34  ;;  %v458_v34 = vunpack.c.l.b16 %v456_v32 }
  0x87   :  { %2206 = vmatprep.subr.bf16.mxu0 %v2205_v35 }
  0x88   :  { %vm2587_vm4 = vcmp.ne.s32.totalorder %v458_v34, 0 }
  0x8a   :  { %2208 = vmatpush3.bf16.msra.mxu0 %v2205_v35 }
  0xd7   :  { %v2077_v36 = vpop.f32.mrb[0].mxu0 }
  0xd8   :  { %v108_v37 = vpop.f32.mrb[1].mxu0 }
  0xd9   :  { %2094 = vmatprep.mubr.msk.f32.mxu1 %vm117_vm1, %v108_v37  ;;  %v2545_v38 = vpack.i.bf16 %v2077_v36, %v108_v37  ;;  %v2209_v39 = vpack.c.bf16 %v2077_v36, %v108_v37 }
  0xda   :  { %2095 = vmatmul.mubr.msk.f32.vlgmr.msra.gmra.mrb[0].mxu1 %vm117_vm1, %v2077_v36  ;;  %v397_v36 = vld [vmem:[%s2921_s1] sm:$0xf]  ;;  %s2458_s1 = smov 72  }
  0xdb   :  { %2302 = vrot.lane.b32.xlu1 %v2545_v38, %s2439_s4  ;;  %2292 = vrot.lane.b32.xlu0 %v2545_v38, %s2438_s13  ;;  %v2101_v40 = vpop.f32.mrb[2].mxu0  ;;  %vm399_vm5 = vcmp.gt.bf16.partialorder %v397_v36, 0  ;;  %s2466_s13 = smov 48  }
  0xdc   :  { %2210 = vmatprep.subr.bf16.mxu1 %v2209_v39  ;;  %v275_v41 = vpop.f32.mrb[3].mxu0 }
  0xdd   :  { %2212 = vmatpush3.bf16.msra.mxu1 %v2209_v39  ;;  %2118 = vmatprep.mubr.msk.f32.mxu0 %vm117_vm1, %v275_v41 }
  0xde   :  { %2119 = vmatmul.mubr.msk.f32.vlgmr.msra.gmra.mrb[4].mxu0 %vm117_vm1, %v2101_v40 }
  0xdf   :  { %2307 = vrot.lane.b32.xlu1 %v2545_v38, %s2440_s15  ;;  %2297 = vrot.lane.b32.xlu0 %v2545_v38, %s2441_s16 }
  0xe3   :  { %2312 = vrot.lane.b32.xlu0 %v2545_v38, %s2442_s17 }
 0x14d   :  { %v2559_v43 = vpop.permute.xlu1 %2302  ;;  %v2293_v44 = vpop.permute.xlu0 %2292 }
 0x14e   :  { %v2295_v45 = vunpack.i.h.bf16 %v2293_v44  ;;  %v2294_v46 = vunpack.i.l.bf16 %v2293_v44 }
 0x150   :  { %v2561_v47 = vpack.c.bf16 %v2295_v45, %v2294_v46  ;;  %v455_v45 = vsel %vm399_vm5, 65537, %v2443_v56 }
 0x151   :  { %v2308_v48 = vpop.permute.xlu1 %2307  ;;  %v2298_v49 = vpop.permute.xlu0 %2297 }
 0x152   :  { %v2310_v50 = vunpack.i.h.bf16 %v2308_v48  ;;  %v2309_v51 = vunpack.i.l.bf16 %v2308_v48  ;;  %v2300_v52 = vunpack.i.h.bf16 %v2298_v49  ;;  %v2299_v53 = vunpack.i.l.bf16 %v2298_v49  ;;  %2214 = vmatprep.subr.bf16.mxu1 %v2561_v47 }
 0x153   :  { %v457_v48 = vunpack.c.l.b16 %v455_v45 }
 0x154   :  { %v2217_v54 = vpack.c.bf16 %v2300_v52, %v2299_v53  ;;  %v2564_v55 = vpack.c.bf16 %v2310_v50, %v2309_v51 }
 0x155   :  { %v2569_v4 = vpop.permute.xlu0 %2312  ;;  %vm2602_vm7 = vcmp.ne.s32.totalorder %v457_v48, 0 }
 0x156   :  { %2218 = vmatprep.subr.bf16.mxu0 %v2217_v54 }
 0x157   :  { %2220 = vmatpush3.bf16.msra.mxu0 %v2217_v54 }
 0x158   :  { %2226 = vmatprep.subr.bf16.mxu0 %v2564_v55 }
 0x1ad   :  { %v2096_v57 = vpop.f32.mrb[0].mxu1 }
 0x1ae   :  { %790 = vrot.lane.b32.xlu0 %v2096_v57, %s2444_s18  ;;  %593 = vrot.lane.b32.xlu1 %v2096_v57, %s2445_s19  ;;  %v190_v58 = vpop.f32.mrb[1].mxu1 }
 0x1b1   :  { %v2120_v59 = vpop.f32.mrb[4].mxu0 }
 0x1b2   :  { %1578 = vrot.lane.b32.xlu0 %v2096_v57, %s2446_s20  ;;  %987 = vrot.lane.b32.xlu1 %v2096_v57, %s2447_s21  ;;  %v388_v60 = vpop.f32.mrb[5].mxu0 }
 0x1b6   :  { %1184 = vrot.lane.b32.xlu1 %v2096_v57, %s2448_s22  ;;  %788 = vrot.lane.b32.xlu0 %v190_v58, %s2444_s18 }
 0x1ba   :  { %1381 = vrot.lane.b32.xlu1 %v2096_v57, %s2449_s23 }
 0x1be   :  { %1775 = vrot.lane.b32.xlu1 %v2096_v57, %s2450_s24 }
 0x1c2   :  { %591 = vrot.lane.b32.xlu1 %v190_v58, %s2445_s19 }
 0x1c6   :  { %985 = vrot.lane.b32.xlu1 %v190_v58, %s2447_s21 }
 0x1ca   :  { %1182 = vrot.lane.b32.xlu1 %v190_v58, %s2448_s22 }
 0x1ce   :  { %1379 = vrot.lane.b32.xlu1 %v190_v58, %s2449_s23 }
 0x1d2   :  { %1576 = vrot.lane.b32.xlu1 %v190_v58, %s2446_s20 }
 0x1d4   :  { %401 = vxpose.xlu0.b32.start [1/2] (short) (narrow) %v190_v58, 8 }
 0x1d6   :  { %1773 = vrot.lane.b32.xlu1 %v190_v58, %s2450_s24 }
 0x1d8   :  { %402 = vxpose.xlu0.b32.end [2/2] (short) (narrow) %v2096_v57, 8 }
 0x1da   :  { %440 = vperm.xlu1 %2316, %v2120_v59  }
 0x1de   :  { %2317 = vset.pattern.permute.xlu1 %v2451_v61 }
 0x1df   :  { %634 = vperm.xlu1 %2317, %v2120_v59  }
 0x1e3   :  { %2318 = vset.pattern.permute.xlu1 %v2452_v62 }
 0x1e4   :  { %831 = vperm.xlu1 %2318, %v2120_v59  }
 0x1e8   :  { %2319 = vset.pattern.permute.xlu1 %v2453_v63 }
 0x1e9   :  { %1028 = vperm.xlu1 %2319, %v2120_v59  }
 0x1ed   :  { %2320 = vset.pattern.permute.xlu1 %v2454_v0 }
 0x1ee   :  { %1225 = vperm.xlu1 %2320, %v2120_v59  }
 0x1f2   :  { %2321 = vset.pattern.permute.xlu1 %v2455_v1 }
 0x1f3   :  { %1422 = vperm.xlu1 %2321, %v2120_v59  }
 0x1f7   :  { %2322 = vset.pattern.permute.xlu1 %v2456_v2 }
 0x1f8   :  { %1619 = vperm.xlu1 %2322, %v2120_v59  }
 0x1fc   :  { %2323 = vset.pattern.permute.xlu1 %v2457_v3 }
 0x1fd   :  { %1816 = vperm.xlu1 %2323, %v2120_v59  }
 0x201   :  { %2325 = vset.pattern.permute.xlu0 %v2451_v61  ;;  %2324 = vset.pattern.permute.xlu1 %v2443_v56 }
 0x202   :  { %630 = vperm.xlu0 %2325, %v388_v60   ;;  %435 = vperm.xlu1 %2324, %v388_v60  }
 0x206   :  { %2331 = vset.pattern.permute.xlu0 %v2457_v3  ;;  %2326 = vset.pattern.permute.xlu1 %v2452_v62 }
 0x207   :  { %1812 = vperm.xlu0 %2331, %v388_v60   ;;  %827 = vperm.xlu1 %2326, %v388_v60  }
 0x20b   :  { %2327 = vset.pattern.permute.xlu1 %v2453_v63 }
 0x20c   :  { %1024 = vperm.xlu1 %2327, %v388_v60  }
 0x210   :  { %2328 = vset.pattern.permute.xlu1 %v2454_v0 }
 0x211   :  { %1221 = vperm.xlu1 %2328, %v388_v60  }
 0x215   :  { %2329 = vset.pattern.permute.xlu1 %v2455_v1 }
 0x216   :  { %1418 = vperm.xlu1 %2329, %v388_v60  }
 0x21a   :  { %2330 = vset.pattern.permute.xlu1 %v2456_v2 }
 0x21b   :  { %1615 = vperm.xlu1 %2330, %v388_v60  }
 0x220   :  { %v791_v5 = vpop.permute.xlu0 %790  ;;  %v594_v6 = vpop.permute.xlu1 %593 }
 0x224   :  { %v1579_v7 = vpop.permute.xlu0 %1578  ;;  %v988_v8 = vpop.permute.xlu1 %987 }
 0x228   :  { %v1185_v9 = vpop.permute.xlu1 %1184  ;;  %v789_v10 = vpop.permute.xlu0 %788 }
 0x229   :  { %794 = vxpose.xlu0.b32.start [1/2] (short) (narrow) %v789_v10, 8 }
 0x22c   :  { %v1382_v11 = vpop.permute.xlu1 %1381 }
 0x22d   :  { %795 = vxpose.xlu0.b32.end [2/2] (short) (narrow) %v791_v5, 8 }
 0x230   :  { %v1776_v12 = vpop.permute.xlu1 %1775 }
 0x234   :  { %v592_v13 = vpop.permute.xlu1 %591 }
 0x238   :  { %v986_v14 = vpop.permute.xlu1 %985 }
 0x23c   :  { %v1183_v15 = vpop.permute.xlu1 %1182 }
 0x23d   :  { %1188 = vxpose.xlu0.b32.start [1/2] (short) (narrow) %v1183_v15, 8 }
 0x240   :  { %v1380_v16 = vpop.permute.xlu1 %1379 }
 0x241   :  { %1189 = vxpose.xlu0.b32.end [2/2] (short) (narrow) %v1185_v9, 8 }
 0x244   :  { %597 = vxpose.xlu1.b32.start [1/2] (short) (narrow) %v592_v13, 8  ;;  %v1577_v17 = vpop.permute.xlu1 %1576 }
 0x245   :  { %1385 = vxpose.xlu0.b32.start [1/2] (short) (narrow) %v1380_v16, 8 }
 0x248   :  { %598 = vxpose.xlu1.b32.end [2/2] (short) (narrow) %v594_v6, 8  ;;  %v1774_v19 = vpop.permute.xlu1 %1773 }
 0x249   :  { %1386 = vxpose.xlu0.b32.end [2/2] (short) (narrow) %v1382_v11, 8 }
 0x24c   :  { %991 = vxpose.xlu1.b32.start [1/2] (short) (narrow) %v986_v14, 8 }
 0x24d   :  { %1582 = vxpose.xlu0.b32.start [1/2] (short) (narrow) %v1577_v17, 8 }
 0x250   :  { %992 = vxpose.xlu1.b32.end [2/2] (short) (narrow) %v988_v8, 8 }
 0x251   :  { %1583 = vxpose.xlu0.b32.end [2/2] (short) (narrow) %v1579_v7, 8 }
 0x254   :  { %1779 = vxpose.xlu1.b32.start [1/2] (short) (narrow) %v1774_v19, 8  ;;  %v417_v26 = vpop.trf.xlu0 }
 0x255   :  { %v446_v29 = vrot.slane %v417_v26, %v2571_v25 }
 0x258   :  { %1780 = vxpose.xlu1.b32.end [2/2] (short) (narrow) %v1776_v12, 8 }
 0x259   :  { %v441_v20 = vpop.permute.xlu1 %440 }
 0x25a   :  { %v448_v31 = vadd.f32 %v446_v29, %v441_v20 }
 0x25c   :  { %v452_v35 = vmul.f32 0.2, %v448_v31  ;;  %vm450_vm3 = vcmp.gt.f32.partialorder %v448_v31, 0.0 }
 0x25e   :  { %v635_v21 = vpop.permute.xlu1 %634  ;;  %v454_v40 = vsel %vm450_vm3, %v448_v31, %v452_v35 }
 0x25f   :  { %v2595_v41 = vsel %vm2587_vm4, %v454_v40, -1e+30 }
 0x260   :  { %v467_v46 = vsel %vm463_vm6, %v2595_v41, -inf }
 0x263   :  { %v832_v24 = vpop.permute.xlu1 %831 }
 0x268   :  { %v2573_v27 = vpop.permute.xlu1 %1028 }
 0x26d   :  { %v2579_v30 = vpop.permute.xlu1 %1225 }
 0x272   :  { %v2582_v33 = vpop.permute.xlu1 %1422 }
 0x277   :  { %v2591_v39 = vpop.permute.xlu1 %1619 }
 0x27c   :  { %v2597_v44 = vpop.permute.xlu1 %1816 }
 0x27e   :  { %468 = vmax.xlane.f32.xlu0 %v467_v46 }
 0x281   :  { %v436_v49 = vpop.permute.xlu1 %435  ;;  %v631_v58 = vpop.permute.xlu0 %630 }
 0x282   :  { %v447_v50 = vadd.f32 %v446_v29, %v436_v49 }
 0x284   :  { %v451_v52 = vmul.f32 0.2, %v447_v50  ;;  %vm449_vm8 = vcmp.gt.f32.partialorder %v447_v50, 0.0 }
 0x286   :  { %v453_v53 = vsel %vm449_vm8, %v447_v50, %v451_v52  ;;  %v828_v57 = vpop.permute.xlu1 %827  ;;  %v2612_v60 = vpop.permute.xlu0 %1812 }
 0x287   :  { %v2608_v54 = vsel %vm2602_vm7, %v453_v53, -1e+30 }
 0x288   :  { %v464_v56 = vsel %vm463_vm6, %v2608_v54, -inf }
 0x289   :  { %465 = vmax.xlane.f32.xlu1 %v464_v56 }
 0x28b   :  { %v1025_v59 = vpop.permute.xlu1 %1024 }
 0x290   :  { %v1222_v61 = vpop.permute.xlu1 %1221 }
 0x295   :  { %v1419_v63 = vpop.permute.xlu1 %1418 }
 0x29a   :  { %v1616_v2 = vpop.permute.xlu1 %1615 }
 0x2a9   :  { %v810_v62 = vpop.trf.xlu0 }
 0x2aa   :  { %v837_v0 = vrot.slane %v810_v62, %v2571_v25 }
 0x2ac   :  { %v839_v1 = vadd.f32 %v837_v0, %v832_v24  ;;  %v838_v5 = vadd.f32 %v837_v0, %v828_v57 }
 0x2ae   :  { %v843_v6 = vmul.f32 0.2, %v839_v1  ;;  %vm841_vm9 = vcmp.gt.f32.partialorder %v839_v1, 0.0  ;;  %vm840_vm10 = vcmp.gt.f32.partialorder %v838_v5, 0.0  ;;  %v842_v12 = vmul.f32 0.2, %v838_v5 }
 0x2b0   :  { %v845_v11 = vsel %vm841_vm9, %v839_v1, %v843_v6  ;;  %v844_v22 = vsel %vm840_vm10, %v838_v5, %v842_v12 }
 0x2b1   :  { %v2620_v20 = vsel %vm2587_vm4, %v845_v11, -1e+30  ;;  %v2637_v40 = vsel %vm2602_vm7, %v844_v22, -1e+30 }
 0x2b2   :  { %v851_v56 = vsel %vm463_vm6, %v2620_v20, -inf  ;;  %v848_v57 = vsel %vm463_vm6, %v2637_v40, -inf }
 0x2bd   :  { %v1204_v3 = vpop.trf.xlu0 }
 0x2be   :  { %v1231_v7 = vrot.slane %v1204_v3, %v2571_v25 }
 0x2c0   :  { %v1232_v13 = vadd.f32 %v1231_v7, %v1222_v61  ;;  %v1233_v45 = vadd.f32 %v1231_v7, %v2579_v30 }
 0x2c2   :  { %v1236_v28 = vmul.f32 0.2, %v1232_v13  ;;  %vm1234_vm13 = vcmp.gt.f32.partialorder %v1232_v13, 0.0  ;;  %vm1235_vm2 = vcmp.gt.f32.partialorder %v1233_v45, 0.0 }
 0x2c4   :  { %v613_v8 = vpop.trf.xlu1  ;;  %v1238_v50 = vsel %vm1234_vm13, %v1232_v13, %v1236_v28 }
 0x2c5   :  { %v640_v9 = vrot.slane %v613_v8, %v2571_v25  ;;  %v1401_v10 = vpop.trf.xlu0 }
 0x2c6   :  { %v1428_v16 = vrot.slane %v1401_v10, %v2571_v25 }
 0x2c7   :  { %v641_v14 = vadd.f32 %v640_v9, %v631_v58  ;;  %v642_v15 = vadd.f32 %v640_v9, %v635_v21 }
 0x2c8   :  { %v1429_v23 = vadd.f32 %v1428_v16, %v1419_v63  ;;  %v1430_v61 = vadd.f32 %v1428_v16, %v2582_v33 }
 0x2c9   :  { %vm644_vm11 = vcmp.gt.f32.partialorder %v642_v15, 0.0  ;;  %v646_v17 = vmul.f32 0.2, %v642_v15  ;;  %vm643_vm12 = vcmp.gt.f32.partialorder %v641_v14, 0.0  ;;  %v645_v19 = vmul.f32 0.2, %v641_v14 }
 0x2ca   :  { %v1433_v52 = vmul.f32 0.2, %v1429_v23  ;;  %vm1431_vm14 = vcmp.gt.f32.partialorder %v1429_v23, 0.0  ;;  %v1434_v12 = vmul.f32 0.2, %v1430_v61  ;;  %vm1432_vm5 = vcmp.gt.f32.partialorder %v1430_v61, 0.0 }
 0x2cb   :  { %v648_v24 = vsel %vm644_vm11, %v642_v15, %v646_v17  ;;  %v647_v26 = vsel %vm643_vm12, %v641_v14, %v645_v19 }
 0x2cc   :  { %v1007_v29 = vpop.trf.xlu1  ;;  %v2624_v31 = vsel %vm2587_vm4, %v648_v24, -1e+30  ;;  %v2628_v21 = vsel %vm2602_vm7, %v647_v26, -1e+30  ;;  %v1435_v63 = vsel %vm1431_vm14, %v1429_v23, %v1433_v52  ;;  %v1436_v17 = vsel %vm1432_vm5, %v1430_v61, %v1434_v12 }
 0x2cd   :  { %v1034_v32 = vrot.slane %v1007_v29, %v2571_v25  ;;  %v1598_v34 = vpop.trf.xlu0  ;;  %v654_v35 = vsel %vm463_vm6, %v2624_v31, -inf  ;;  %v651_v36 = vsel %vm463_vm6, %v2628_v21, -inf  ;;  %v2662_v7 = vsel %vm2602_vm7, %v1435_v63, -1e+30 }
 0x2ce   :  { %v1625_v46 = vrot.slane %v1598_v34, %v2571_v25  ;;  %655 = vmax.xlane.f32.xlu1 %v654_v35  ;;  %652 = vmax.xlane.f32.xlu0 %v651_v36  ;;  %v1439_v13 = vsel %vm463_vm6, %v2662_v7, -inf  ;;  %v2690_v26 = vsel %vm2587_vm4, %v1436_v17, -1e+30  ;;  %v2315_v12 = vunpack.i.h.bf16 %v2569_v4 }
 0x2cf   :  { %v1035_v48 = vadd.f32 %v1034_v32, %v1025_v59  ;;  %v1036_v49 = vadd.f32 %v1034_v32, %v2573_v27  ;;  %v2649_v27 = vsel %vm2602_vm7, %v1238_v50, -1e+30  ;;  %v1237_v59 = vmul.f32 0.2, %v1233_v45 }
 0x2d0   :  { %v1626_v53 = vadd.f32 %v1625_v46, %v1616_v2  ;;  %v1242_v5 = vsel %vm463_vm6, %v2649_v27, -inf  ;;  %v1442_v32 = vsel %vm463_vm6, %v2690_v26, -inf }
 0x2d1   :  { %vm1037_vm15 = vcmp.gt.f32.partialorder %v1035_v48, 0.0  ;;  %v1039_v58 = vmul.f32 0.2, %v1035_v48  ;;  %vm1038_vm1 = vcmp.gt.f32.partialorder %v1036_v49, 0.0  ;;  %v1040_v30 = vmul.f32 0.2, %v1036_v49 }
 0x2d2   :  { %852 = vmax.xlane.f32.xlu1 %v851_v56  ;;  %849 = vmax.xlane.f32.xlu0 %v848_v57  ;;  %v1630_v1 = vmul.f32 0.2, %v1626_v53  ;;  %vm1628_vm3 = vcmp.gt.f32.partialorder %v1626_v53, 0.0  ;;  %v1239_v9 = vsel %vm1235_vm2, %v1233_v45, %v1237_v59  ;;  %v2305_v57 = vunpack.i.h.bf16 %v2559_v43 }
 0x2d3   :  { %v1041_v62 = vsel %vm1037_vm15, %v1035_v48, %v1039_v58  ;;  %v1042_v0 = vsel %vm1038_vm1, %v1036_v49, %v1040_v30  ;;  %v2304_v58 = vunpack.i.l.bf16 %v2559_v43 }
 0x2d4   :  { %v1795_v2 = vpop.trf.xlu1  ;;  %v2653_v3 = vsel %vm2602_vm7, %v1041_v62, -1e+30  ;;  %v2666_v8 = vsel %vm2587_vm4, %v1042_v0, -1e+30  ;;  %v1632_v11 = vsel %vm1628_vm3, %v1626_v53, %v1630_v1 }
 0x2d5   :  { %v1822_v33 = vrot.slane %v1795_v2, %v2571_v25  ;;  %v1045_v6 = vsel %vm463_vm6, %v2653_v3, -inf  ;;  %v1627_v25 = vadd.f32 %v1625_v46, %v2591_v39  ;;  %v1048_v14 = vsel %vm463_vm6, %v2666_v8, -inf }
 0x2d6   :  { %1243 = vmax.xlane.f32.xlu0 %v1242_v5  ;;  %1046 = vmax.xlane.f32.xlu1 %v1045_v6  ;;  %v2677_v16 = vsel %vm2602_vm7, %v1632_v11, -1e+30  ;;  %v2681_v39 = vsel %vm2587_vm4, %v1239_v9, -1e+30  ;;  %v2221_v61 = vpack.c.bf16 %v2305_v57, %v2304_v58 }
 0x2d7   :  { %v1823_v10 = vadd.f32 %v1822_v33, %v2612_v60  ;;  %v1824_v60 = vadd.f32 %v1822_v33, %v2597_v44  ;;  %v1631_v22 = vmul.f32 0.2, %v1627_v25  ;;  %vm1629_vm9 = vcmp.gt.f32.partialorder %v1627_v25, 0.0 }
 0x2d8   :  { %v1636_v23 = vsel %vm463_vm6, %v2677_v16, -inf  ;;  %v1245_v24 = vsel %vm463_vm6, %v2681_v39, -inf }
 0x2d9   :  { %vm1825_vm8 = vcmp.gt.f32.partialorder %v1823_v10, 0.0  ;;  %v1827_v15 = vmul.f32 0.2, %v1823_v10  ;;  %v1633_v44 = vsel %vm1629_vm9, %v1627_v25, %v1631_v22  ;;  %v1828_v29 = vmul.f32 0.2, %v1824_v60 }
 0x2da   :  { %1440 = vmax.xlane.f32.xlu0 %v1439_v13  ;;  %1049 = vmax.xlane.f32.xlu1 %v1048_v14  ;;  %vm1826_vm10 = vcmp.gt.f32.partialorder %v1824_v60, 0.0  ;;  %v2702_v35 = vsel %vm2587_vm4, %v1633_v44, -1e+30 }
 0x2db   :  { %v1829_v19 = vsel %vm1825_vm8, %v1823_v10, %v1827_v15  ;;  %v1830_v36 = vsel %vm1826_vm10, %v1824_v60, %v1828_v29  ;;  %v1639_v51 = vsel %vm463_vm6, %v2702_v35, -inf }
 0x2dc   :  { %v2694_v28 = vsel %vm2602_vm7, %v1829_v19, -1e+30  ;;  %v2708_v45 = vsel %vm2587_vm4, %v1830_v36, -1e+30 }
 0x2dd   :  { %v1833_v34 = vsel %vm463_vm6, %v2694_v28, -inf  ;;  %v1836_v46 = vsel %vm463_vm6, %v2708_v45, -inf }
 0x2de   :  { %1637 = vmax.xlane.f32.xlu0 %v1636_v23  ;;  %1246 = vmax.xlane.f32.xlu1 %v1245_v24 }
 0x2e2   :  { %1443 = vmax.xlane.f32.xlu1 %v1442_v32  ;;  %1834 = vmax.xlane.f32.xlu0 %v1833_v34 }
 0x2e6   :  { %1640 = vmax.xlane.f32.xlu1 %v1639_v51 }
 0x2ea   :  { %1837 = vmax.xlane.f32.xlu1 %v1836_v46 }
 0x2f8   :  { %2338 = vrot.lane.b32.xlu0 %v2545_v38, %s2458_s1 }
 0x2fb   :  { %2333 = vrot.lane.b32.xlu1 %v2545_v38, %s2459_s28 }
 0x2fc   :  { %957 = vrot.lane.b32.xlu0 %v2541_v18, %s2441_s16 }
 0x300   :  { %1154 = vrot.lane.b32.xlu0 %v2541_v18, %s2439_s4 }
 0x304   :  { %1351 = vrot.lane.b32.xlu0 %v2541_v18, %s2440_s15 }
 0x308   :  { %1548 = vrot.lane.b32.xlu0 %v2541_v18, %s2442_s17 }
 0x30b   :  { %v469_v37 = vpop.xlane.xlu0 %468 }
 0x30c   :  { %v471_v48 = vsub.f32 %v2595_v41, %v469_v37 }
 0x30e   :  { %v474_v49 = vmul.f32 1.442695, %v471_v48 }
 0x310   :  { %2342 = vpow2.f32 %v474_v49 }
 0x316   :  { %v466_v50 = vpop.xlane.xlu1 %465 }
 0x317   :  { %v470_v38 = vsub.f32 %v2608_v54, %v466_v50 }
 0x319   :  { %v472_v52 = vmul.f32 1.442695, %v470_v38 }
 0x31a   :  { %v2343_v53 = vpop.eup %2342 }
 0x31b   :  { %2344 = vpow2.f32 %v472_v52  ;;  %v479_v56 = vsel %vm463_vm6, %v2343_v53, 0.0 }
 0x31f   :  { %480 = vadd.xlane.f32.xlu1 %v479_v56 }
 0x325   :  { %v2345_v30 = vpop.eup %2344 }
 0x326   :  { %2125 = vmatprep.mubr.msk.f32.mxu1 %vm463_vm6, %v2345_v30  ;;  %v476_v41 = vsel %vm463_vm6, %v2345_v30, 0.0 }
 0x327   :  { %2126 = vmatmul.mubr.msk.f32.vlgmr.msra.gmra.mrb[2].mxu1 %vm463_vm6, %v2343_v53  ;;  %477 = vadd.xlane.f32.xlu1 %v476_v41 }
 0x328   :  { %2216 = vmatpush3.bf16.msra.mxu1 %v2561_v47 }
 0x329   :  { %2222 = vmatprep.subr.bf16.mxu1 %v2221_v61 }
 0x35b   :  { %v653_v54 = vpop.xlane.xlu0 %652  ;;  %v656_v59 = vpop.xlane.xlu1 %655 }
 0x35c   :  { %v657_v62 = vsub.f32 %v2628_v21, %v653_v54  ;;  %v658_v63 = vsub.f32 %v2624_v31, %v656_v59 }
 0x35e   :  { %v659_v0 = vmul.f32 1.442695, %v657_v62  ;;  %v661_v43 = vmul.f32 1.442695, %v658_v63 }
 0x35f   :  { %v850_v1 = vpop.xlane.xlu0 %849  ;;  %v853_v2 = vpop.xlane.xlu1 %852 }
 0x360   :  { %2346 = vpow2.f32 %v659_v0  ;;  %v854_v33 = vsub.f32 %v2637_v40, %v850_v1  ;;  %v855_v5 = vsub.f32 %v2620_v20, %v853_v2  ;;  %v2314_v40 = vunpack.i.l.bf16 %v2569_v4 }
 0x361   :  { %2348 = vpow2.f32 %v661_v43 }
 0x362   :  { %v856_v6 = vmul.f32 1.442695, %v854_v33  ;;  %v858_v9 = vmul.f32 1.442695, %v855_v5  ;;  %v2229_v24 = vpack.c.bf16 %v2315_v12, %v2314_v40 }
 0x363   :  { %v1244_v47 = vpop.xlane.xlu0 %1243  ;;  %v1047_v25 = vpop.xlane.xlu1 %1046 }
 0x364   :  { %2350 = vpow2.f32 %v856_v6  ;;  %v1248_v10 = vsub.f32 %v2649_v27, %v1244_v47  ;;  %v1051_v21 = vsub.f32 %v2653_v3, %v1047_v25 }
 0x365   :  { %2352 = vpow2.f32 %v858_v9 }
 0x366   :  { %v1250_v31 = vmul.f32 1.442695, %v1248_v10  ;;  %v1053_v11 = vmul.f32 1.442695, %v1051_v21 }
 0x367   :  { %v1441_v13 = vpop.xlane.xlu0 %1440  ;;  %v1050_v14 = vpop.xlane.xlu1 %1049 }
 0x368   :  { %2354 = vpow2.f32 %v1250_v31  ;;  %v1445_v20 = vsub.f32 %v2662_v7, %v1441_v13  ;;  %v1052_v15 = vsub.f32 %v2666_v8, %v1050_v14 }
 0x369   :  { %2356 = vpow2.f32 %v1053_v11 }
 0x36a   :  { %v2347_v60 = vpop.eup %2346  ;;  %v1447_v17 = vmul.f32 1.442695, %v1445_v20  ;;  %v1055_v27 = vmul.f32 1.442695, %v1052_v15 }
 0x36b   :  { %v2349_v19 = vpop.eup %2348  ;;  %v1638_v3 = vpop.xlane.xlu0 %1637  ;;  %2132 = vmatprep.mubr.msk.f32.mxu1 %vm463_vm6, %v2347_v60  ;;  %v663_v23 = vsel %vm463_vm6, %v2347_v60, 0.0 }
 0x36c   :  { %v1247_v22 = vpop.xlane.xlu1 %1246  ;;  %2358 = vpow2.f32 %v1447_v17  ;;  %v1642_v4 = vsub.f32 %v2677_v16, %v1638_v3  ;;  %664 = vadd.xlane.f32.xlu0 %v663_v23  ;;  %2133 = vmatmul.mubr.msk.f32.vlgmr.msra.gmra.mrb[4].mxu1 %vm463_vm6, %v2349_v19  ;;  %v666_v16 = vsel %vm463_vm6, %v2349_v19, 0.0 }
 0x36d   :  { %v1249_v44 = vsub.f32 %v2681_v39, %v1247_v22  ;;  %2360 = vpow2.f32 %v1055_v27  ;;  %2224 = vmatpush3.bf16.msra.mxu1 %v2221_v61 }
 0x36e   :  { %v2351_v7 = vpop.eup %2350  ;;  %v1644_v8 = vmul.f32 1.442695, %v1642_v4  ;;  %2230 = vmatprep.subr.bf16.mxu1 %v2229_v24 }
 0x36f   :  { %v1252_v29 = vmul.f32 1.442695, %v1249_v44  ;;  %v2353_v32 = vpop.eup %2352  ;;  %2139 = vmatprep.mubr.msk.f32.mxu0 %vm463_vm6, %v2351_v7  ;;  %v1835_v34 = vpop.xlane.xlu0 %1834  ;;  %v860_v51 = vsel %vm463_vm6, %v2351_v7, 0.0 }
 0x370   :  { %v1444_v36 = vpop.xlane.xlu1 %1443  ;;  %2362 = vpow2.f32 %v1644_v8  ;;  %v1839_v39 = vsub.f32 %v2694_v28, %v1835_v34  ;;  %861 = vadd.xlane.f32.xlu1 %v860_v51  ;;  %667 = vadd.xlane.f32.xlu0 %v666_v16  ;;  %v863_v53 = vsel %vm463_vm6, %v2353_v32, 0.0 }
 0x371   :  { %v1446_v46 = vsub.f32 %v2690_v26, %v1444_v36  ;;  %2364 = vpow2.f32 %v1252_v29  ;;  %2140 = vmatmul.mubr.msk.f32.vlgmr.msra.gmra.mrb[6].mxu0 %vm463_vm6, %v2353_v32 }
 0x372   :  { %v2355_v37 = vpop.eup %2354  ;;  %v1841_v48 = vmul.f32 1.442695, %v1839_v39  ;;  %2228 = vmatpush3.bf16.msra.mxu0 %v2564_v55 }
 0x373   :  { %v1449_v49 = vmul.f32 1.442695, %v1446_v46  ;;  %v2357_v50 = vpop.eup %2356  ;;  %v2339_v38 = vpop.permute.xlu0 %2338  ;;  %2153 = vmatprep.mubr.msk.f32.mxu0 %vm463_vm6, %v2355_v37 }
 0x374   :  { %v1641_v52 = vpop.xlane.xlu1 %1640  ;;  %2366 = vpow2.f32 %v1841_v48  ;;  %v2341_v28 = vunpack.i.h.bf16 %v2339_v38  ;;  %v2340_v26 = vunpack.i.l.bf16 %v2339_v38  ;;  %2146 = vmatprep.mubr.msk.f32.mxu1 %vm463_vm6, %v2357_v50  ;;  %864 = vadd.xlane.f32.xlu0 %v863_v53  ;;  %v1057_v61 = vsel %vm463_vm6, %v2357_v50, 0.0 }
 0x375   :  { %v1643_v56 = vsub.f32 %v2702_v35, %v1641_v52  ;;  %2368 = vpow2.f32 %v1449_v49 }
 0x376   :  { %v2359_v57 = vpop.eup %2358  ;;  %v2237_v58 = vpack.c.bf16 %v2341_v28, %v2340_v26 }
 0x377   :  { %v1646_v30 = vmul.f32 1.442695, %v1643_v56  ;;  %v2361_v55 = vpop.eup %2360  ;;  %v1451_v9 = vsel %vm463_vm6, %v2359_v57, 0.0  ;;  %v958_v7 = vpop.permute.xlu0 %957 }
 0x378   :  { %v1838_v41 = vpop.xlane.xlu1 %1837  ;;  %2147 = vmatmul.mubr.msk.f32.vlgmr.msra.gmra.mrb[6].mxu1 %vm463_vm6, %v2361_v55  ;;  %1058 = vadd.xlane.f32.xlu0 %v1057_v61  ;;  %v1060_v59 = vsel %vm463_vm6, %v2361_v55, 0.0 }
 0x379   :  { %2370 = vpow2.f32 %v1646_v30  ;;  %v1840_v54 = vsub.f32 %v2708_v45, %v1838_v41  ;;  %2232 = vmatpush3.bf16.msra.mxu1 %v2229_v24  ;;  %2160 = vmatprep.mubr.msk.f32.mxu1 %vm463_vm6, %v2359_v57  ;;  %v1254_v45 = vsel %vm463_vm6, %v2355_v37, 0.0 }
 0x37a   :  { %v2363_v35 = vpop.eup %2362  ;;  %2238 = vmatprep.subr.bf16.mxu1 %v2237_v58  ;;  %1061 = vadd.xlane.f32.xlu1 %v1060_v59 }
 0x37b   :  { %v1843_v62 = vmul.f32 1.442695, %v1840_v54  ;;  %v2365_v63 = vpop.eup %2364  ;;  %v1648_v21 = vsel %vm463_vm6, %v2363_v35, 0.0 }
 0x37c   :  { %v2334_v0 = vpop.permute.xlu1 %2333  ;;  %2154 = vmatmul.mubr.msk.f32.vlgmr.msra.gmra.mrb[8].mxu0 %vm463_vm6, %v2365_v63  ;;  %v1257_v2 = vsel %vm463_vm6, %v2365_v63, 0.0 }
 0x37d   :  { %2372 = vpow2.f32 %v1843_v62  ;;  %v2336_v43 = vunpack.i.h.bf16 %v2334_v0  ;;  %v2335_v1 = vunpack.i.l.bf16 %v2334_v0  ;;  %2167 = vmatprep.mubr.msk.f32.mxu0 %vm463_vm6, %v2363_v35  ;;  %1258 = vadd.xlane.f32.xlu0 %v1257_v2 }
 0x37e   :  { %v2367_v33 = vpop.eup %2366  ;;  %1255 = vadd.xlane.f32.xlu1 %v1254_v45 }
 0x37f   :  { %v2233_v5 = vpack.c.bf16 %v2336_v43, %v2335_v1  ;;  %v2369_v6 = vpop.eup %2368  ;;  %v1845_v12 = vsel %vm463_vm6, %v2367_v33, 0.0 }
 0x380   :  { %2161 = vmatmul.mubr.msk.f32.vlgmr.msra.gmra.mrb[8].mxu1 %vm463_vm6, %v2369_v6  ;;  %v1454_v47 = vsel %vm463_vm6, %v2369_v6, 0.0 }
 0x381   :  { %2234 = vmatprep.subr.bf16.mxu0 %v2233_v5  ;;  %2240 = vmatpush3.bf16.msra.mxu1 %v2237_v58 }
 0x382   :  { %1452 = vadd.xlane.f32.xlu0 %v1451_v9  ;;  %2174 = vmatprep.mubr.msk.f32.mxu1 %vm463_vm6, %v2367_v33 }
 0x383   :  { %v2371_v25 = vpop.eup %2370  ;;  %1455 = vadd.xlane.f32.xlu1 %v1454_v47  ;;  %2236 = vmatpush3.bf16.msra.mxu0 %v2233_v5 }
 0x384   :  { %v1651_v10 = vsel %vm463_vm6, %v2371_v25, 0.0 }
 0x386   :  { %1652 = vadd.xlane.f32.xlu0 %v1651_v10  ;;  %2168 = vmatmul.mubr.msk.f32.vlgmr.msra.gmra.mrb[10].mxu0 %vm463_vm6, %v2371_v25 }
 0x387   :  { %v2373_v31 = vpop.eup %2372  ;;  %1649 = vadd.xlane.f32.xlu1 %v1648_v21 }
 0x388   :  { %2175 = vmatmul.mubr.msk.f32.vlgmr.msra.gmra.mrb[10].mxu1 %vm463_vm6, %v2373_v31  ;;  %v1848_v11 = vsel %vm463_vm6, %v2373_v31, 0.0 }
 0x38a   :  { %1846 = vadd.xlane.f32.xlu0 %v1845_v12 }
 0x38b   :  { %1849 = vadd.xlane.f32.xlu1 %v1848_v11 }
 0x3a0   :  { %1745 = vrot.lane.b32.xlu0 %v2541_v18, %s2459_s28 }
 0x3a4   :  { %1942 = vrot.lane.b32.xlu0 %v2541_v18, %s2458_s1 }
 0x3ac   :  { %v481_v13 = vpop.xlane.xlu1 %480 }
 0x3ad   :  { %2374 = vrcp.f32 %v481_v13 }
 0x3b4   :  { %v478_v14 = vpop.xlane.xlu1 %477 }
 0x3b5   :  { %2376 = vrcp.f32 %v478_v14 }
 0x3b7   :  { %v2375_v40 = vpop.eup %2374 }
 0x3bf   :  { %v2377_v15 = vpop.eup %2376 }
 0x3fa   :  { %v2127_v20 = vpop.f32.mrb[2].mxu1 }
 0x3fb   :  { %v566_v60 = vmul.f32 %v2375_v40, %v2127_v20  ;;  %v554_v17 = vpop.f32.mrb[3].mxu1 }
 0x3fc   :  { %v565_v27 = vmul.f32 %v2377_v15, %v554_v17 }
 0x3fd   :  { %v574_v19 = vadd.f32 %v2541_v18, %v566_v60  ;;  %v862_v37 = vpop.xlane.xlu1 %861 }
 0x3fe   :  { %v573_v3 = vadd.f32 %v2541_v18, %v565_v27  ;;  %v2792_v18 = vpop.permute.xlu0 %1154 }
 0x3ff   :  { %v578_v22 = vmin.f32 %v574_v19, 0.0  ;;  %vm576_vm4 = vcmp.gt.f32.partialorder %v574_v19, 0.0 }
 0x400   :  { %v577_v23 = vmin.f32 %v573_v3, 0.0  ;;  %vm575_vm6 = vcmp.gt.f32.partialorder %v573_v3, 0.0 }
 0x401   :  { %v581_v24 = vmul.f32 1.442695, %v578_v22 }
 0x402   :  { %v579_v4 = vmul.f32 1.442695, %v577_v23  ;;  %v2794_v51 = vpop.permute.xlu0 %1351 }
 0x403   :  { %2378 = vpow2.f32 %v581_v24 }
 0x404   :  { %2380 = vpow2.f32 %v579_v4 }
 0x406   :  { %v2796_v16 = vpop.permute.xlu0 %1548 }
 0x407   :  { %v1062_v49 = vpop.xlane.xlu1 %1061 }
 0x40a   :  { %v665_v39 = vpop.xlane.xlu0 %664 }
 0x40b   :  { %v1256_v38 = vpop.xlane.xlu1 %1255 }
 0x40d   :  { %v2379_v44 = vpop.eup %2378 }
 0x40e   :  { %v2381_v8 = vpop.eup %2380  ;;  %v1986_v29 = vadd.f32 -1.0, %v2379_v44  ;;  %v668_v46 = vpop.xlane.xlu0 %667 }
 0x40f   :  { %v1985_v32 = vadd.f32 -1.0, %v2381_v8  ;;  %2382 = vrcp.f32 %v668_v46 }
 0x410   :  { %v586_v34 = vsel %vm576_vm4, %v574_v19, %v1986_v29  ;;  %2384 = vrcp.f32 %v665_v39  ;;  %v1456_v58 = vpop.xlane.xlu1 %1455  ;;  %vm785_vm4 = vcmask 130112  }
 0x411   :  { %v585_v36 = vsel %vm575_vm6, %v573_v3, %v1985_v32  ;;  %588 = vst.msk [vmem:[%s2922_s5 + $0x8] sm:$0xff] %vm35_vm0, %v586_v34  ;;  %vm982_vm6 = vcmask 195712  }
 0x412   :  { %587 = vst.msk [vmem:[%s2922_s5] sm:$0xff] %vm35_vm0, %v585_v36  ;;  %v865_v48 = vpop.xlane.xlu0 %864 }
 0x413   :  { %2386 = vrcp.f32 %v865_v48 }
 0x414   :  { %2388 = vrcp.f32 %v862_v37  ;;  %v1650_v45 = vpop.xlane.xlu1 %1649 }
 0x415   :  { %2390 = vrcp.f32 %v1062_v49 }
 0x416   :  { %v1059_v50 = vpop.xlane.xlu0 %1058 }
 0x417   :  { %2392 = vrcp.f32 %v1059_v50 }
 0x418   :  { %v1850_v13 = vpop.xlane.xlu1 %1849 }
 0x419   :  { %v2383_v53 = vpop.eup %2382 }
 0x41a   :  { %v1259_v52 = vpop.xlane.xlu0 %1258  ;;  %v2385_v26 = vpop.eup %2384 }
 0x41b   :  { %2394 = vrcp.f32 %v1259_v52 }
 0x41c   :  { %2396 = vrcp.f32 %v1256_v38 }
 0x41d   :  { %v2387_v54 = vpop.eup %2386 }
 0x41e   :  { %v1453_v41 = vpop.xlane.xlu0 %1452  ;;  %v2389_v62 = vpop.eup %2388 }
 0x41f   :  { %v2391_v25 = vpop.eup %2390 }
 0x421   :  { %v2393_v31 = vpop.eup %2392 }
 0x422   :  { %v1653_v6 = vpop.xlane.xlu0 %1652 }
 0x425   :  { %v2395_v15 = vpop.eup %2394 }
 0x426   :  { %v1847_v60 = vpop.xlane.xlu0 %1846  ;;  %v2397_v19 = vpop.eup %2396 }
 0x43f   :  { %v2134_v28 = vpop.f32.mrb[4].mxu1 }
 0x440   :  { %v759_v56 = vmul.f32 %v2383_v53, %v2134_v28  ;;  %v747_v57 = vpop.f32.mrb[5].mxu1 }
 0x441   :  { %v758_v30 = vmul.f32 %v2385_v26, %v747_v57 }
 0x442   :  { %v2799_v55 = vadd.f32 %v2557_v42, %v759_v56 }
 0x443   :  { %v2802_v61 = vadd.f32 %v2557_v42, %v758_v30 }
 0x444   :  { %v768_v59 = vmin.f32 %v2799_v55, 0.0  ;;  %v2141_v35 = vpop.f32.mrb[6].mxu0  ;;  %vm766_vm0 = vcmp.gt.f32.partialorder %v2799_v55, 0.0 }
 0x445   :  { %v767_v63 = vmin.f32 %v2802_v61, 0.0  ;;  %v956_v0 = vmul.f32 %v2387_v54, %v2141_v35  ;;  %v944_v43 = vpop.f32.mrb[7].mxu0  ;;  %vm765_vm11 = vcmp.gt.f32.partialorder %v2802_v61, 0.0 }
 0x446   :  { %v771_v1 = vmul.f32 1.442695, %v768_v59  ;;  %v955_v2 = vmul.f32 %v2389_v62, %v944_v43 }
 0x447   :  { %v2806_v33 = vadd.f32 %v958_v7, %v956_v0  ;;  %v769_v5 = vmul.f32 1.442695, %v767_v63 }
 0x448   :  { %2398 = vpow2.f32 %v771_v1  ;;  %v2808_v42 = vadd.f32 %v958_v7, %v955_v2 }
 0x449   :  { %2400 = vrcp.f32 %v1456_v58  ;;  %v965_v9 = vmin.f32 %v2806_v33, 0.0  ;;  %vm963_vm7 = vcmp.gt.f32.partialorder %v2806_v33, 0.0 }
 0x44a   :  { %2402 = vrcp.f32 %v1453_v41  ;;  %v964_v47 = vmin.f32 %v2808_v42, 0.0  ;;  %vm962_vm13 = vcmp.gt.f32.partialorder %v2808_v42, 0.0 }
 0x44b   :  { %v968_v10 = vmul.f32 1.442695, %v965_v9  ;;  %v2148_v21 = vpop.f32.mrb[6].mxu1  ;;  %2404 = vpow2.f32 %v769_v5 }
 0x44c   :  { %v1153_v11 = vmul.f32 %v2391_v25, %v2148_v21  ;;  %v1141_v12 = vpop.f32.mrb[7].mxu1  ;;  %v966_v14 = vmul.f32 1.442695, %v964_v47 }
 0x44d   :  { %2406 = vpow2.f32 %v968_v10  ;;  %v1152_v40 = vmul.f32 %v2393_v31, %v1141_v12 }
 0x44e   :  { %2408 = vrcp.f32 %v1653_v6  ;;  %v2813_v20 = vadd.f32 %v2792_v18, %v1153_v11 }
 0x44f   :  { %2410 = vrcp.f32 %v1650_v45  ;;  %v2816_v17 = vadd.f32 %v2792_v18, %v1152_v40  ;;  %v2155_v27 = vpop.f32.mrb[8].mxu0  ;;  %v1746_v18 = vpop.permute.xlu0 %1745 }
 0x450   :  { %2412 = vrcp.f32 %v1850_v13  ;;  %v1162_v3 = vmin.f32 %v2813_v20, 0.0  ;;  %v1350_v22 = vmul.f32 %v2395_v15, %v2155_v27  ;;  %v1338_v23 = vpop.f32.mrb[9].mxu0  ;;  %vm1160_vm12 = vcmp.gt.f32.partialorder %v2813_v20, 0.0 }
 0x451   :  { %2414 = vpow2.f32 %v966_v14  ;;  %v1161_v24 = vmin.f32 %v2816_v17, 0.0  ;;  %v1349_v4 = vmul.f32 %v2397_v19, %v1338_v23  ;;  %vm1159_vm1 = vcmp.gt.f32.partialorder %v2816_v17, 0.0 }
 0x452   :  { %v2399_v44 = vpop.eup %2398  ;;  %2416 = vrcp.f32 %v1847_v60  ;;  %v1165_v7 = vmul.f32 1.442695, %v1162_v3  ;;  %v2821_v8 = vadd.f32 %v2794_v51, %v1350_v22 }
 0x453   :  { %v2401_v29 = vpop.eup %2400  ;;  %v2824_v32 = vadd.f32 %v2794_v51, %v1349_v4  ;;  %v2162_v34 = vpop.f32.mrb[8].mxu1  ;;  %v1990_v36 = vadd.f32 -1.0, %v2399_v44  ;;  %v1163_v49 = vmul.f32 1.442695, %v1161_v24 }
 0x454   :  { %v2403_v39 = vpop.eup %2402  ;;  %2418 = vpow2.f32 %v1165_v7  ;;  %v1359_v46 = vmin.f32 %v2821_v8, 0.0  ;;  %v1547_v37 = vmul.f32 %v2401_v29, %v2162_v34  ;;  %v1535_v48 = vpop.f32.mrb[9].mxu1  ;;  %vm1357_vm14 = vcmp.gt.f32.partialorder %v2821_v8, 0.0 }
 0x455   :  { %v1358_v50 = vmin.f32 %v2824_v32, 0.0  ;;  %v1546_v38 = vmul.f32 %v2403_v39, %v1535_v48  ;;  %v776_v52 = vsel %vm766_vm0, %v2799_v55, %v1990_v36  ;;  %v2405_v53 = vpop.eup %2404  ;;  %v1943_v59 = vpop.permute.xlu0 %1942  ;;  %vm1356_vm2 = vcmp.gt.f32.partialorder %v2824_v32, 0.0 }
 0x456   :  { %v1362_v51 = vmul.f32 1.442695, %v1359_v46  ;;  %v2831_v28 = vadd.f32 %v2796_v16, %v1547_v37  ;;  %781 = vrot.lane.b32.xlu0 %v776_v52, %s2460_s7  ;;  %v1989_v2 = vadd.f32 -1.0, %v2405_v53  ;;  %vm1179_vm0 = vcmask 261312  }
 0x457   :  { %v2407_v26 = vpop.eup %2406  ;;  %v2836_v58 = vadd.f32 %v2796_v16, %v1546_v38  ;;  %v1360_v55 = vmul.f32 1.442695, %v1358_v50 }
 0x458   :  { %v2409_v56 = vpop.eup %2408  ;;  %2420 = vpow2.f32 %v1362_v51  ;;  %v1556_v57 = vmin.f32 %v2831_v28, 0.0  ;;  %v1994_v30 = vadd.f32 -1.0, %v2407_v26  ;;  %v775_v12 = vsel %vm765_vm11, %v2802_v61, %v1989_v2 }
 0x459   :  { %v2411_v41 = vpop.eup %2410  ;;  %2422 = vpow2.f32 %v1163_v49  ;;  %v2169_v54 = vpop.f32.mrb[10].mxu0  ;;  %v1555_v47 = vmin.f32 %v2836_v58, 0.0  ;;  %vm1554_vm15 = vcmp.gt.f32.partialorder %v2831_v28, 0.0  ;;  %vm1553_vm8 = vcmp.gt.f32.partialorder %v2836_v58, 0.0 }
 0x45a   :  { %v2413_v35 = vpop.eup %2412  ;;  %v1559_v62 = vmul.f32 1.442695, %v1556_v57  ;;  %v1744_v63 = vmul.f32 %v2409_v56, %v2169_v54  ;;  %v1732_v0 = vpop.f32.mrb[11].mxu0  ;;  %v973_v1 = vsel %vm963_vm7, %v2806_v33, %v1994_v30  ;;  %vm1376_vm7 = vcmask 326912  }
 0x45b   :  { %v2176_v43 = vpop.f32.mrb[10].mxu1  ;;  %v2415_v45 = vpop.eup %2414  ;;  %v1743_v5 = vmul.f32 %v2411_v41, %v1732_v0  ;;  %978 = vrot.lane.b32.xlu1 %v973_v1, %s2461_s8  ;;  %v1557_v15 = vmul.f32 1.442695, %v1555_v47  ;;  %vm1573_vm11 = vcmask 392512  }
 0x45c   :  { %v1941_v16 = vmul.f32 %v2413_v35, %v2176_v43  ;;  %v1929_v6 = vpop.f32.mrb[11].mxu1  ;;  %v2417_v9 = vpop.eup %2416  ;;  %2424 = vpow2.f32 %v1559_v62  ;;  %v2842_v25 = vadd.f32 %v1746_v18, %v1744_v63  ;;  %v1993_v13 = vadd.f32 -1.0, %v2415_v45 }
 0x45d   :  { %2426 = vpow2.f32 %v1360_v55  ;;  %v2845_v10 = vadd.f32 %v1746_v18, %v1743_v5  ;;  %v1940_v33 = vmul.f32 %v2417_v9, %v1929_v6 }
 0x45e   :  { %v1946_v21 = vadd.f32 %v1943_v59, %v1941_v16  ;;  %v2419_v31 = vpop.eup %2418  ;;  %v1753_v11 = vmin.f32 %v2842_v25, 0.0  ;;  %v972_v61 = vsel %vm962_vm13, %v2808_v42, %v1993_v13  ;;  %vm1751_vm5 = vcmp.gt.f32.partialorder %v2842_v25, 0.0 }
 0x45f   :  { %779 = vrot.lane.b32.xlu1 %v775_v12, %s2460_s7  ;;  %v1998_v40 = vadd.f32 -1.0, %v2419_v31  ;;  %v1752_v27 = vmin.f32 %v2845_v10, 0.0  ;;  %v2853_v19 = vadd.f32 %v1943_v59, %v1940_v33  ;;  %vm1750_vm9 = vcmp.gt.f32.partialorder %v2845_v10, 0.0 }
 0x460   :  { %v1950_v14 = vmin.f32 %v1946_v21, 0.0  ;;  %v1756_v60 = vmul.f32 1.442695, %v1753_v11  ;;  %vm1948_vm3 = vcmp.gt.f32.partialorder %v1946_v21, 0.0  ;;  %vm1967_vm13 = vcmask 523712  }
 0x461   :  { %v1170_v22 = vsel %vm1160_vm12, %v2813_v20, %v1998_v40  ;;  %v1754_v44 = vmul.f32 1.442695, %v1752_v27  ;;  %v1949_v7 = vmin.f32 %v2853_v19, 0.0  ;;  %vm1947_vm10 = vcmp.gt.f32.partialorder %v2853_v19, 0.0 }
 0x462   :  { %v1953_v3 = vmul.f32 1.442695, %v1950_v14  ;;  %v2421_v23 = vpop.eup %2420  ;;  %2428 = vpow2.f32 %v1756_v60  ;;  %1175 = vrot.lane.b32.xlu0 %v1170_v22, %s2462_s9  ;;  %vm1770_vm12 = vcmask 458112  }
 0x463   :  { %v2423_v24 = vpop.eup %2422  ;;  %976 = vrot.lane.b32.xlu1 %v972_v61, %s2461_s8  ;;  %v2002_v4 = vadd.f32 -1.0, %v2421_v23  ;;  %2430 = vpow2.f32 %v1557_v15  ;;  %v1951_v42 = vmul.f32 1.442695, %v1949_v7 }
 0x464   :  { %2432 = vpow2.f32 %v1953_v3  ;;  %v1997_v34 = vadd.f32 -1.0, %v2423_v24 }
 0x465   :  { %v1367_v29 = vsel %vm1357_vm14, %v2821_v8, %v2002_v4  ;;  %2434 = vpow2.f32 %v1754_v44 }
 0x466   :  { %v2425_v20 = vpop.eup %2424  ;;  %v1169_v46 = vsel %vm1159_vm1, %v2816_v17, %v1997_v34  ;;  %2436 = vpow2.f32 %v1951_v42 }
 0x467   :  { %v2427_v36 = vpop.eup %2426  ;;  %1372 = vrot.lane.b32.xlu1 %v1367_v29, %s2463_s10  ;;  %v2006_v18 = vadd.f32 -1.0, %v2425_v20 }
 0x468   :  { %v2001_v37 = vadd.f32 -1.0, %v2427_v36 }
 0x469   :  { %v1564_v39 = vsel %vm1554_vm15, %v2831_v28, %v2006_v18 }
 0x46a   :  { %1569 = vrot.lane.b32.xlu0 %v1564_v39, %s2464_s11  ;;  %v1366_v49 = vsel %vm1356_vm2, %v2824_v32, %v2001_v37 }
 0x46b   :  { %1173 = vrot.lane.b32.xlu1 %v1169_v46, %s2462_s9 }
 0x46c   :  { %v2429_v8 = vpop.eup %2428 }
 0x46d   :  { %v2431_v48 = vpop.eup %2430  ;;  %v2010_v50 = vadd.f32 -1.0, %v2429_v8 }
 0x46e   :  { %v2433_v38 = vpop.eup %2432  ;;  %v2005_v17 = vadd.f32 -1.0, %v2431_v48 }
 0x46f   :  { %1370 = vrot.lane.b32.xlu1 %v1366_v49, %s2463_s10  ;;  %v2014_v52 = vadd.f32 -1.0, %v2433_v38  ;;  %v1761_v51 = vsel %vm1751_vm5, %v2842_v25, %v2010_v50  ;;  %v2435_v28 = vpop.eup %2434 }
 0x470   :  { %v1563_v32 = vsel %vm1553_vm8, %v2836_v58, %v2005_v17  ;;  %v2009_v26 = vadd.f32 -1.0, %v2435_v28  ;;  %v2437_v56 = vpop.eup %2436 }
 0x471   :  { %v1958_v53 = vsel %vm1948_vm3, %v1946_v21, %v2014_v52  ;;  %v2013_v30 = vadd.f32 -1.0, %v2437_v56 }
 0x472   :  { %1963 = vrot.lane.b32.xlu0 %v1958_v53, %s2465_s12  ;;  %v1760_v57 = vsel %vm1750_vm9, %v2845_v10, %v2009_v26 }
 0x473   :  { %1766 = vrot.lane.b32.xlu1 %v1761_v51, %s2466_s13  ;;  %v1957_v41 = vsel %vm1947_vm10, %v2853_v19, %v2013_v30 }
 0x477   :  { %1567 = vrot.lane.b32.xlu1 %v1563_v32, %s2464_s11 }
 0x47b   :  { %1764 = vrot.lane.b32.xlu1 %v1760_v57, %s2466_s13 }
 0x47f   :  { %1961 = vrot.lane.b32.xlu1 %v1957_v41, %s2465_s12 }
 0x4c8   :  { %v782_v55 = vpop.permute.xlu0 %781 }
 0x4c9   :  { %787 = vst.msk [vmem:[%s2922_s5 + $0x8] sm:$0xff] %vm785_vm4, %v782_v55 }
 0x4cd   :  { %v979_v58 = vpop.permute.xlu1 %978 }
 0x4ce   :  { %984 = vst.msk [vmem:[%s2922_s5 + $0x8] sm:$0xff] %vm982_vm6, %v979_v58 }
 0x4d1   :  { %v780_v54 = vpop.permute.xlu1 %779 }
 0x4d2   :  { %786 = vst.msk [vmem:[%s2922_s5] sm:$0xff] %vm785_vm4, %v780_v54 }
 0x4d4   :  { %v1176_v59 = vpop.permute.xlu0 %1175 }
 0x4d5   :  { %1181 = vst.msk [vmem:[%s2922_s5 + $0x8] sm:$0xff] %vm1179_vm0, %v1176_v59  ;;  %v977_v35 = vpop.permute.xlu1 %976 }
 0x4d6   :  { %983 = vst.msk [vmem:[%s2922_s5] sm:$0xff] %vm982_vm6, %v977_v35 }
 0x4d9   :  { %v1373_v62 = vpop.permute.xlu1 %1372 }
 0x4da   :  { %1378 = vst.msk [vmem:[%s2922_s5 + $0x8] sm:$0xff] %vm1376_vm7, %v1373_v62 }
 0x4dc   :  { %v1570_v63 = vpop.permute.xlu0 %1569 }
 0x4dd   :  { %1575 = vst.msk [vmem:[%s2922_s5 + $0x8] sm:$0xff] %vm1573_vm11, %v1570_v63  ;;  %v1174_v0 = vpop.permute.xlu1 %1173 }
 0x4de   :  { %1180 = vst.msk [vmem:[%s2922_s5] sm:$0xff] %vm1179_vm0, %v1174_v0 }
 0x4e1   :  { %v1371_v43 = vpop.permute.xlu1 %1370 }
 0x4e2   :  { %1377 = vst.msk [vmem:[%s2922_s5] sm:$0xff] %vm1376_vm7, %v1371_v43 }
 0x4e4   :  { %v1964_v2 = vpop.permute.xlu0 %1963 }
 0x4e5   :  { %v1767_v1 = vpop.permute.xlu1 %1766 }
 0x4e6   :  { %1772 = vst.msk [vmem:[%s2922_s5 + $0x8] sm:$0xff] %vm1770_vm12, %v1767_v1 }
 0x4e7   :  { %1969 = vst.msk [vmem:[%s2922_s5 + $0x8] sm:$0xff] %vm1967_vm13, %v1964_v2 }
 0x4e9   :  { %v1568_v45 = vpop.permute.xlu1 %1567 }
 0x4ea   :  { %1574 = vst.msk [vmem:[%s2922_s5] sm:$0xff] %vm1573_vm11, %v1568_v45 }
 0x4ed   :  { %v1765_v5 = vpop.permute.xlu1 %1764 }
 0x4ee   :  { %1771 = vst.msk [vmem:[%s2922_s5] sm:$0xff] %vm1770_vm12, %v1765_v5 }
 0x4f1   :  { %v1962_v16 = vpop.permute.xlu1 %1961 }
 0x4f2   :  { %1968 = vst.msk [vmem:[%s2922_s5] sm:$0xff] %vm1967_vm13, %v1962_v16 }

// kernel: multitask_gat_forward.5
= control target key start
LH: loop header
LB: loop body
LE: loop exit
PB: predicated region body
PF: predicated region fallthrough
CT: control target
= control target key end

     0   :  { %vm37_vm0 = vcmask 523264   ;;  %s1535_s15 = smov 124   ;;  %vm126_vm1 = vcmask 1041408   ;;  %vm119_vm2 = vcmask 146432   ;;  %v1539_v32 = vmov 0   ;;  %s1544_s24 = smov 113   ;;  %s1798_s2 = inlined_call_operand.vmem [shape: f32[64,18], index: 2, kind: input, shape index: {}]   ;;  %s1799_s0 = inlined_call_operand.vmem [shape: f32[16,64], index: 0, kind: input, shape index: {}]   ;;  %s1800_s3 = inlined_call_operand.vmem [shape: f32[18,8], index: 3, kind: input, shape index: {}]   ;;  %s1801_s1 = inlined_call_operand.vmem [shape: bf16[16,16], index: 1, kind: input, shape index: {}]   ;;  %s1802_s4 = inlined_call_operand.vmem [shape: f32[1,18], index: 4, kind: input, shape index: {}]   ;;  %s1803_s5 = inlined_call_operand.vmem [shape: f32[16,18], index: 5, kind: output, shape index: {}]  }
   0x1   :  { %v25_v0 = vld [vmem:[%s1798_s2] sm:$0xff]  ;;  %v26_v1 = vld [vmem:[%s1798_s2 + $0x8] sm:$0xff]  ;;  %v27_v2 = vld [vmem:[%s1798_s2 + $0x10] sm:$0xff]  ;;  %v1540_v36 = vmov 1   ;;  %v1541_v39 = vmov 2   ;;  %v1542_v40 = vmov 3   ;;  %v429_v44 = vlaneseq }
   0x2   :  { %v1373_v3 = vpack.c.bf16 %v26_v1, %v25_v0  ;;  %v28_v4 = vld [vmem:[%s1798_s2 + $0x18] sm:$0xff]  ;;  %v29_v6 = vld [vmem:[%s1798_s2 + $0x20] sm:$0xff]  ;;  %v30_v7 = vld [vmem:[%s1798_s2 + $0x28] sm:$0xff]  ;;  %vm449_vm8 = vcmask 130048   ;;  %s1545_s28 = smov 4   ;;  %s1546_s6 = smov 9  }
   0x3   :  { %v1377_v5 = vpack.c.bf16 %v28_v4, %v27_v2  ;;  %v23_v8 = vld [vmem:[%s1799_s0] sm:$0xff]  ;;  %v34_v10 = vld [vmem:[%s1800_s3 + $0x8] sm:$0xff]  ;;  %v1381_v13 = vpack.c.bf16 %v30_v7, %v29_v6  ;;  %v31_v14 = vld [vmem:[%s1798_s2 + $0x30] sm:$0xff]  ;;  %v430_v45 = vshrl.u32 %v429_v44, 7  ;;  %s1547_s7 = smov 15  }
   0x4   :  { %1374 = vmatprep.subr.bf16.mxu0 %v1373_v3  ;;  %1305 = vmatprep.mubr.msk.f32.mxu0 %vm37_vm0, %v23_v8  ;;  %v33_v9 = vld [vmem:[%s1800_s3] sm:$0xff]  ;;  %v32_v15 = vld [vmem:[%s1798_s2 + $0x38] sm:$0xff]  ;;  %v35_v16 = vld [vmem:[%s1800_s3 + $0x10] sm:$0x3]  ;;  %s1537_s2 = smov 127   ;;  %s1538_s3 = smov 125  }
   0x5   :  { %1376 = vmatpush3.bf16.msra.mxu0 %v1373_v3  ;;  %v1443_v11 = vpack.i.bf16 %v34_v10, %v33_v9  ;;  %v1389_v12 = vpack.c.bf16 %v34_v10, %v33_v9  ;;  %v1385_v17 = vpack.c.bf16 %v32_v15, %v31_v14  ;;  %v24_v18 = vld [vmem:[%s1799_s0 + $0x8] sm:$0xff]  ;;  %s1536_s0 = smov 126   ;;  %v384_v46 = vld [vmem:[%s1801_s1 + $0x4] sm:$0xf]  ;;  %v1632_v47 = vsub.s32 0, %v430_v45 }
   0x6   :  { %1378 = vmatprep.subr.bf16.mxu0 %v1377_v5  ;;  %vm386_vm3 = vcmp.gt.bf16.partialorder %v384_v46, 0  ;;  %v383_v51 = vld [vmem:[%s1801_s1] sm:$0xf]  ;;  %s1543_s1 = smov 119  }
   0x7   :  { %1444 = vrot.lane.b32.xlu0 %v1443_v11, %s1535_s15  ;;  %1390 = vmatprep.subr.bf16.mxu1 %v1389_v12  ;;  %v442_v50 = vsel %vm386_vm3, 65537, %v1539_v32  ;;  %vm385_vm4 = vcmp.gt.bf16.partialorder %v383_v51, 0  ;;  %vm1184_vm3 = vcmask 23552  }
   0x8   :  { %1392 = vmatpush3.bf16.msra.mxu1 %v1389_v12  ;;  %v444_v54 = vunpack.c.l.b16 %v442_v50  ;;  %v441_v59 = vsel %vm385_vm4, 65537, %v1539_v32  ;;  %vm797_vm4 = vcmask 72736  }
   0x9   :  { %1380 = vmatpush3.bf16.msra.mxu0 %v1377_v5  ;;  %1312 = vmatprep.subr.msk.mxu1 %vm126_vm1, %v35_v16  ;;  %v443_v63 = vunpack.c.l.b16 %v441_v59 }
   0xa   :  { %1382 = vmatprep.subr.bf16.mxu0 %v1381_v13  ;;  %vm1639_vm5 = vcmp.ne.s32.totalorder %v444_v54, 0 }
   0xb   :  { %296 = vrot.lane.b32.xlu0 %v35_v16, %s1535_s15  ;;  %vm1653_vm10 = vcmp.ne.s32.totalorder %v443_v63, 0 }
   0xc   :  { %1313 = vmatpush3.msk.msra.mxu1 %vm126_vm1, %v35_v16 }
   0xd   :  { %1384 = vmatpush3.bf16.msra.mxu0 %v1381_v13  ;;  %1394 = vmatprep.subr.bf16.mxu1 %v1373_v3 }
   0xe   :  { %1386 = vmatprep.subr.bf16.mxu0 %v1385_v17 }
  0x11   :  { %1388 = vmatpush3.bf16.msra.mxu0 %v1385_v17 }
  0x14   :  { %1306 = vmatmul.mubr.msk.f32.vlgmr.msra.gmra.mrb[0].mxu0 %vm37_vm0, %v24_v18 }
  0x79   :  { %v1445_v19 = vpop.permute.xlu0 %1444 }
  0x7a   :  { %v1447_v20 = vunpack.i.h.bf16 %v1445_v19  ;;  %v1446_v21 = vunpack.i.l.bf16 %v1445_v19 }
  0x7c   :  { %v1409_v22 = vpack.c.bf16 %v1447_v20, %v1446_v21 }
  0x7d   :  { %v297_v23 = vpop.permute.xlu0 %296 }
  0x7e   :  { %1410 = vmatprep.subr.bf16.mxu0 %v1409_v22 }
  0x7f   :  { %1412 = vmatpush3.bf16.msra.mxu0 %v1409_v22 }
  0x80   :  { %1340 = vmatprep.subr.msk.mxu0 %vm126_vm1, %v297_v23 }
  0x83   :  { %1341 = vmatpush3.msk.msra.mxu0 %vm126_vm1, %v297_v23  ;;  %vm764_vm1 = vcmask 39936  }
  0xe7   :  { %v1307_v24 = vpop.f32.mrb[0].mxu0 }
  0xe8   :  { %v110_v25 = vpop.f32.mrb[1].mxu0 }
  0xe9   :  { %1314 = vmatprep.mubr.msk.f32.mxu1 %vm119_vm2, %v110_v25  ;;  %v1413_v26 = vpack.c.bf16 %v1307_v24, %v110_v25  ;;  %v1622_v27 = vpack.i.bf16 %v1307_v24, %v110_v25 }
  0xea   :  { %1315 = vmatmul.mubr.msk.f32.vlgmr.msra.gmra.mrb[0].mxu1 %vm119_vm2, %v1307_v24 }
  0xeb   :  { %1396 = vmatpush3.bf16.msra.mxu1 %v1373_v3  ;;  %1414 = vmatprep.subr.bf16.mxu0 %v1413_v26 }
  0xec   :  { %1398 = vmatprep.subr.bf16.mxu1 %v1377_v5  ;;  %1333 = vmatprep.mubr.msk.f32.mxu1 %vm37_vm0, %v23_v8 }
  0xef   :  { %1400 = vmatpush3.bf16.msra.mxu1 %v1377_v5 }
  0xf0   :  { %1402 = vmatprep.subr.bf16.mxu1 %v1381_v13 }
  0xf3   :  { %1404 = vmatpush3.bf16.msra.mxu1 %v1381_v13 }
  0xf4   :  { %1406 = vmatprep.subr.bf16.mxu1 %v1385_v17 }
  0xf7   :  { %1408 = vmatpush3.bf16.msra.mxu1 %v1385_v17 }
  0xfa   :  { %1334 = vmatmul.mubr.msk.f32.vlgmr.msra.gmra.mrb[2].mxu1 %vm37_vm0, %v24_v18  ;;  %vm561_vm0 = vcmask 31744  }
 0x1bd   :  { %v1316_v28 = vpop.f32.mrb[0].mxu1 }
 0x1be   :  { %802 = vrot.lane.b32.xlu0 %v1316_v28, %s1536_s0  ;;  %592 = vrot.lane.b32.xlu1 %v1316_v28, %s1537_s2  ;;  %v196_v29 = vpop.f32.mrb[1].mxu1 }
 0x1c2   :  { %1012 = vrot.lane.b32.xlu1 %v1316_v28, %s1538_s3  ;;  %800 = vrot.lane.b32.xlu0 %v196_v29, %s1536_s0 }
 0x1c6   :  { %590 = vrot.lane.b32.xlu1 %v196_v29, %s1537_s2 }
 0x1ca   :  { %1010 = vrot.lane.b32.xlu1 %v196_v29, %s1538_s3 }
 0x1cd   :  { %v1335_v30 = vpop.f32.mrb[2].mxu1 }
 0x1ce   :  { %v281_v31 = vpop.f32.mrb[3].mxu1 }
 0x1cf   :  { %1342 = vmatprep.mubr.msk.f32.mxu0 %vm119_vm2, %v281_v31 }
 0x1d0   :  { %1343 = vmatmul.mubr.msk.f32.vlgmr.msra.gmra.mrb[2].mxu0 %vm119_vm2, %v1335_v30  ;;  %vm974_vm2 = vcmask 48128  }
 0x1d1   :  { %1416 = vmatpush3.bf16.msra.mxu0 %v1413_v26 }
 0x1f3   :  { %387 = vxpose.xlu1.b32.start [1/2] (short) (narrow) %v196_v29, 8 }
 0x1f7   :  { %388 = vxpose.xlu1.b32.end [2/2] (short) (narrow) %v1316_v28, 8 }
 0x215   :  { %1448 = vset.pattern.permute.xlu1 %v1539_v32 }
 0x230   :  { %v593_v33 = vpop.permute.xlu1 %592  ;;  %v803_v41 = vpop.permute.xlu0 %802 }
 0x234   :  { %v1013_v34 = vpop.permute.xlu1 %1012  ;;  %v801_v42 = vpop.permute.xlu0 %800 }
 0x238   :  { %v591_v35 = vpop.permute.xlu1 %590 }
 0x239   :  { %596 = vxpose.xlu0.b32.start [1/2] (short) (narrow) %v591_v35, 8 }
 0x23c   :  { %v1011_v43 = vpop.permute.xlu1 %1010 }
 0x23d   :  { %597 = vxpose.xlu0.b32.end [2/2] (short) (narrow) %v593_v33, 8 }
 0x266   :  { %1449 = vset.pattern.permute.xlu0 %v1540_v36 }
 0x273   :  { %v403_v49 = vpop.trf.xlu1 }
 0x274   :  { %v432_v53 = vrot.slane %v403_v49, %v1632_v47 }
 0x2a3   :  { %v1344_v37 = vpop.f32.mrb[2].mxu0 }
 0x2a4   :  { %633 = vperm.xlu0 %1449, %v1344_v37   ;;  %426 = vperm.xlu1 %1448, %v1344_v37   ;;  %v374_v38 = vpop.f32.mrb[3].mxu0 }
 0x2a8   :  { %1452 = vset.pattern.permute.xlu0 %v1539_v32  ;;  %1450 = vset.pattern.permute.xlu1 %v1541_v39 }
 0x2a9   :  { %843 = vperm.xlu1 %1450, %v1344_v37   ;;  %421 = vperm.xlu0 %1452, %v374_v38  }
 0x2ad   :  { %1451 = vset.pattern.permute.xlu1 %v1542_v40  ;;  %1455 = vset.pattern.permute.xlu0 %v1542_v40 }
 0x2ae   :  { %1053 = vperm.xlu1 %1451, %v1344_v37   ;;  %1049 = vperm.xlu0 %1455, %v374_v38  }
 0x2b2   :  { %1453 = vset.pattern.permute.xlu1 %v1540_v36 }
 0x2b3   :  { %629 = vperm.xlu1 %1453, %v374_v38  }
 0x2b7   :  { %1454 = vset.pattern.permute.xlu1 %v1541_v39 }
 0x2b8   :  { %839 = vperm.xlu1 %1454, %v374_v38  }
 0x2b9   :  { %v612_v48 = vpop.trf.xlu0 }
 0x2ba   :  { %v639_v52 = vrot.slane %v612_v48, %v1632_v47 }
 0x2cc   :  { %806 = vxpose.xlu0.b32.start [1/2] (short) (narrow) %v801_v42, 8 }
 0x2d0   :  { %807 = vxpose.xlu0.b32.end [2/2] (short) (narrow) %v803_v41, 8 }
 0x2e1   :  { %1016 = vxpose.xlu1.b32.start [1/2] (short) (narrow) %v1011_v43, 8 }
 0x2e5   :  { %1017 = vxpose.xlu1.b32.end [2/2] (short) (narrow) %v1013_v34, 8 }
 0x323   :  { %v634_v55 = vpop.permute.xlu0 %633  ;;  %v427_v56 = vpop.permute.xlu1 %426 }
 0x324   :  { %v641_v57 = vadd.f32 %v639_v52, %v634_v55  ;;  %v434_v58 = vadd.f32 %v432_v53, %v427_v56 }
 0x326   :  { %v645_v61 = vmul.f32 0.2, %v641_v57  ;;  %v438_v62 = vmul.f32 0.2, %v434_v58  ;;  %vm436_vm6 = vcmp.gt.f32.partialorder %v434_v58, 0.0  ;;  %vm643_vm7 = vcmp.gt.f32.partialorder %v641_v57, 0.0 }
 0x328   :  { %v844_v0 = vpop.permute.xlu1 %843  ;;  %v422_v1 = vpop.permute.xlu0 %421  ;;  %v440_v2 = vsel %vm436_vm6, %v434_v58, %v438_v62  ;;  %v647_v3 = vsel %vm643_vm7, %v641_v57, %v645_v61  ;;  %vm1217_vm6 = vcmask 146552  }
 0x329   :  { %v433_v4 = vadd.f32 %v432_v53, %v422_v1  ;;  %v1645_v5 = vsel %vm1639_vm5, %v440_v2, -1e+30  ;;  %v1651_v8 = vsel %vm1639_vm5, %v647_v3, -1e+30 }
 0x32a   :  { %v453_v6 = vsel %vm449_vm8, %v1645_v5, -inf  ;;  %v653_v12 = vsel %vm449_vm8, %v1651_v8, -inf }
 0x32b   :  { %v437_v7 = vmul.f32 0.2, %v433_v4  ;;  %454 = vmax.xlane.f32.xlu1 %v453_v6  ;;  %vm435_vm9 = vcmp.gt.f32.partialorder %v433_v4, 0.0 }
 0x32d   :  { %v1054_v10 = vpop.permute.xlu1 %1053  ;;  %v439_v11 = vsel %vm435_vm9, %v433_v4, %v437_v7  ;;  %v1050_v21 = vpop.permute.xlu0 %1049 }
 0x32e   :  { %v447_v13 = vsel %vm1653_vm10, %v439_v11, -1e+30 }
 0x32f   :  { %654 = vmax.xlane.f32.xlu1 %v653_v12  ;;  %v450_v14 = vsel %vm449_vm8, %v447_v13, -inf }
 0x330   :  { %451 = vmax.xlane.f32.xlu0 %v450_v14 }
 0x332   :  { %v630_v15 = vpop.permute.xlu1 %629 }
 0x333   :  { %v640_v16 = vadd.f32 %v639_v52, %v630_v15 }
 0x335   :  { %v644_v17 = vmul.f32 0.2, %v640_v16  ;;  %vm642_vm11 = vcmp.gt.f32.partialorder %v640_v16, 0.0 }
 0x337   :  { %v646_v18 = vsel %vm642_vm11, %v640_v16, %v644_v17  ;;  %v840_v24 = vpop.permute.xlu1 %839 }
 0x338   :  { %v648_v19 = vsel %vm1653_vm10, %v646_v18, -1e+30 }
 0x339   :  { %v650_v20 = vsel %vm449_vm8, %v648_v19, -inf }
 0x33a   :  { %651 = vmax.xlane.f32.xlu0 %v650_v20 }
 0x34c   :  { %v822_v22 = vpop.trf.xlu0 }
 0x34d   :  { %v849_v23 = vrot.slane %v822_v22, %v1632_v47 }
 0x34f   :  { %v850_v25 = vadd.f32 %v849_v23, %v840_v24  ;;  %v851_v26 = vadd.f32 %v849_v23, %v844_v0 }
 0x351   :  { %vm853_vm12 = vcmp.gt.f32.partialorder %v851_v26, 0.0  ;;  %v855_v28 = vmul.f32 0.2, %v851_v26  ;;  %vm852_vm13 = vcmp.gt.f32.partialorder %v850_v25, 0.0  ;;  %v854_v29 = vmul.f32 0.2, %v850_v25 }
 0x353   :  { %v857_v30 = vsel %vm853_vm12, %v851_v26, %v855_v28  ;;  %v856_v31 = vsel %vm852_vm13, %v850_v25, %v854_v29 }
 0x354   :  { %v859_v32 = vsel %vm1639_vm5, %v857_v30, -1e+30  ;;  %v858_v33 = vsel %vm1653_vm10, %v856_v31, -1e+30 }
 0x355   :  { %v863_v34 = vsel %vm449_vm8, %v859_v32, -inf  ;;  %v860_v35 = vsel %vm449_vm8, %v858_v33, -inf }
 0x356   :  { %864 = vmax.xlane.f32.xlu1 %v863_v34  ;;  %861 = vmax.xlane.f32.xlu0 %v860_v35 }
 0x361   :  { %v1032_v36 = vpop.trf.xlu1 }
 0x362   :  { %v1059_v37 = vrot.slane %v1032_v36, %v1632_v47  ;;  %v1688_v47 = vld [vmem:[%s1802_s4] ss:$0 sm:$0xff] }
 0x364   :  { %v1060_v38 = vadd.f32 %v1059_v37, %v1050_v21  ;;  %v1061_v39 = vadd.f32 %v1059_v37, %v1054_v10 }
 0x366   :  { %vm1063_vm14 = vcmp.gt.f32.partialorder %v1061_v39, 0.0  ;;  %v1065_v40 = vmul.f32 0.2, %v1061_v39  ;;  %vm1062_vm15 = vcmp.gt.f32.partialorder %v1060_v38, 0.0  ;;  %v1064_v41 = vmul.f32 0.2, %v1060_v38 }
 0x368   :  { %v1067_v42 = vsel %vm1063_vm14, %v1061_v39, %v1065_v40  ;;  %v1066_v43 = vsel %vm1062_vm15, %v1060_v38, %v1064_v41 }
 0x369   :  { %v1069_v44 = vsel %vm1639_vm5, %v1067_v42, -1e+30  ;;  %v1068_v45 = vsel %vm1653_vm10, %v1066_v43, -1e+30  ;;  %vm1007_vm5 = vcmask 121928  }
 0x36a   :  { %v1073_v46 = vsel %vm449_vm8, %v1069_v44, -inf  ;;  %v1070_v48 = vsel %vm449_vm8, %v1068_v45, -inf }
 0x36b   :  { %1074 = vmax.xlane.f32.xlu1 %v1073_v46  ;;  %1071 = vmax.xlane.f32.xlu0 %v1070_v48 }
 0x37c   :  { %1462 = vrot.lane.b32.xlu1 %v1622_v27, %s1543_s1 }
 0x380   :  { %1467 = vrot.lane.b32.xlu1 %v1622_v27, %s1544_s24 }
 0x381   :  { %1457 = vrot.lane.b32.xlu0 %v1622_v27, %s1535_s15 }
 0x384   :  { %759 = vrot.lane.b32.xlu1 %v1688_v47, %s1535_s15 }
 0x3b8   :  { %v455_v49 = vpop.xlane.xlu1 %454 }
 0x3b9   :  { %v457_v50 = vsub.f32 %v1645_v5, %v455_v49 }
 0x3bb   :  { %v460_v55 = vmul.f32 1.442695, %v457_v50 }
 0x3bc   :  { %v655_v51 = vpop.xlane.xlu1 %654 }
 0x3bd   :  { %v657_v52 = vsub.f32 %v1651_v8, %v655_v51  ;;  %v452_v53 = vpop.xlane.xlu0 %451 }
 0x3be   :  { %v456_v54 = vsub.f32 %v447_v13, %v452_v53 }
 0x3bf   :  { %v660_v56 = vmul.f32 1.442695, %v657_v52 }
 0x3c0   :  { %v458_v57 = vmul.f32 1.442695, %v456_v54 }
 0x3c1   :  { %1471 = vpow2.f32 %v660_v56 }
 0x3c2   :  { %1473 = vpow2.f32 %v458_v57 }
 0x3c3   :  { %1475 = vpow2.f32 %v460_v55 }
 0x3c7   :  { %v652_v27 = vpop.xlane.xlu0 %651 }
 0x3c8   :  { %v656_v58 = vsub.f32 %v648_v19, %v652_v27 }
 0x3ca   :  { %v658_v59 = vmul.f32 1.442695, %v656_v58 }
 0x3cb   :  { %v1472_v60 = vpop.eup %1471 }
 0x3cc   :  { %v1694_v61 = vpop.eup %1473  ;;  %1477 = vpow2.f32 %v658_v59  ;;  %v665_v62 = vsel %vm449_vm8, %v1472_v60, 0.0 }
 0x3cd   :  { %v1697_v63 = vpop.eup %1475  ;;  %666 = vadd.xlane.f32.xlu1 %v665_v62  ;;  %1349 = vmatprep.mubr.msk.f32.mxu0 %vm449_vm8, %v1694_v61  ;;  %v462_v35 = vsel %vm449_vm8, %v1694_v61, 0.0 }
 0x3ce   :  { %1350 = vmatmul.mubr.msk.f32.vlgmr.msra.gmra.mrb[4].mxu0 %vm449_vm8, %v1697_v63  ;;  %v465_v36 = vsel %vm449_vm8, %v1697_v63, 0.0 }
 0x3d6   :  { %v1478_v0 = vpop.eup %1477 }
 0x3d7   :  { %1356 = vmatprep.mubr.msk.f32.mxu1 %vm449_vm8, %v1478_v0 }
 0x3e3   :  { %v865_v1 = vpop.xlane.xlu1 %864  ;;  %v862_v2 = vpop.xlane.xlu0 %861 }
 0x3e4   :  { %v867_v3 = vsub.f32 %v859_v32, %v865_v1  ;;  %v866_v4 = vsub.f32 %v858_v33, %v862_v2  ;;  %v662_v33 = vsel %vm449_vm8, %v1478_v0, 0.0 }
 0x3e6   :  { %v870_v5 = vmul.f32 1.442695, %v867_v3  ;;  %v868_v6 = vmul.f32 1.442695, %v866_v4 }
 0x3e8   :  { %1479 = vpow2.f32 %v870_v5 }
 0x3e9   :  { %1481 = vpow2.f32 %v868_v6 }
 0x3f2   :  { %v1480_v7 = vpop.eup %1479 }
 0x3f3   :  { %v1482_v8 = vpop.eup %1481  ;;  %v875_v9 = vsel %vm449_vm8, %v1480_v7, 0.0 }
 0x3f4   :  { %1363 = vmatprep.mubr.msk.f32.mxu0 %vm449_vm8, %v1482_v8  ;;  %876 = vadd.xlane.f32.xlu0 %v875_v9  ;;  %v872_v34 = vsel %vm449_vm8, %v1482_v8, 0.0 }
 0x3f8   :  { %v1075_v10 = vpop.xlane.xlu1 %1074  ;;  %v1072_v11 = vpop.xlane.xlu0 %1071 }
 0x3f9   :  { %v1077_v12 = vsub.f32 %v1069_v44, %v1075_v10  ;;  %v1076_v13 = vsub.f32 %v1068_v45, %v1072_v11 }
 0x3fb   :  { %v1080_v14 = vmul.f32 1.442695, %v1077_v12  ;;  %v1078_v15 = vmul.f32 1.442695, %v1076_v13 }
 0x3fc   :  { %v1463_v16 = vpop.permute.xlu1 %1462  ;;  %v1458_v17 = vpop.permute.xlu0 %1457 }
 0x3fd   :  { %1483 = vpow2.f32 %v1080_v14  ;;  %v1465_v18 = vunpack.i.h.bf16 %v1463_v16  ;;  %v1464_v19 = vunpack.i.l.bf16 %v1463_v16  ;;  %v1460_v20 = vunpack.i.h.bf16 %v1458_v17 }
 0x3fe   :  { %1485 = vpow2.f32 %v1078_v15  ;;  %v1459_v21 = vunpack.i.l.bf16 %v1458_v17 }
 0x3ff   :  { %v1421_v22 = vpack.c.bf16 %v1465_v18, %v1464_v19 }
 0x400   :  { %v1417_v23 = vpack.c.bf16 %v1460_v20, %v1459_v21  ;;  %v1468_v24 = vpop.permute.xlu1 %1467 }
 0x401   :  { %v1470_v25 = vunpack.i.h.bf16 %v1468_v24  ;;  %v1469_v26 = vunpack.i.l.bf16 %v1468_v24  ;;  %1422 = vmatprep.subr.bf16.mxu0 %v1421_v22 }
 0x402   :  { %1418 = vmatprep.subr.bf16.mxu1 %v1417_v23  ;;  %1424 = vmatpush3.bf16.msra.mxu0 %v1421_v22 }
 0x403   :  { %v1425_v28 = vpack.c.bf16 %v1470_v25, %v1469_v26  ;;  %1420 = vmatpush3.bf16.msra.mxu1 %v1417_v23 }
 0x404   :  { %v760_v39 = vpop.permute.xlu1 %759 }
 0x405   :  { %1364 = vmatmul.mubr.msk.f32.vlgmr.msra.gmra.mrb[6].mxu0 %vm449_vm8, %v1480_v7  ;;  %1426 = vmatprep.subr.bf16.mxu1 %v1425_v28 }
 0x406   :  { %1357 = vmatmul.mubr.msk.f32.vlgmr.msra.gmra.mrb[4].mxu1 %vm449_vm8, %v1472_v60 }
 0x407   :  { %v1484_v29 = vpop.eup %1483  ;;  %1428 = vmatpush3.bf16.msra.mxu1 %v1425_v28 }
 0x408   :  { %v1486_v30 = vpop.eup %1485  ;;  %v1085_v31 = vsel %vm449_vm8, %v1484_v29, 0.0 }
 0x409   :  { %1370 = vmatprep.mubr.msk.f32.mxu1 %vm449_vm8, %v1486_v30  ;;  %1086 = vadd.xlane.f32.xlu0 %v1085_v31  ;;  %v1082_v32 = vsel %vm449_vm8, %v1486_v30, 0.0 }
 0x40a   :  { %1083 = vadd.xlane.f32.xlu1 %v1082_v32  ;;  %1371 = vmatmul.mubr.msk.f32.vlgmr.msra.gmra.mrb[6].mxu1 %vm449_vm8, %v1484_v29 }
 0x40d   :  { %663 = vadd.xlane.f32.xlu0 %v662_v33 }
 0x411   :  { %873 = vadd.xlane.f32.xlu0 %v872_v34 }
 0x41b   :  { %1179 = vrot.lane.b32.xlu1 %v1688_v47, %s1544_s24 }
 0x427   :  { %969 = vrot.lane.b32.xlu0 %v1688_v47, %s1543_s1 }
 0x43f   :  { %463 = vadd.xlane.f32.xlu1 %v462_v35 }
 0x446   :  { %466 = vadd.xlane.f32.xlu0 %v465_v36 }
 0x45a   :  { %v667_v42 = vpop.xlane.xlu1 %666 }
 0x481   :  { %v877_v40 = vpop.xlane.xlu0 %876 }
 0x496   :  { %v1087_v41 = vpop.xlane.xlu0 %1086 }
 0x497   :  { %v1084_v43 = vpop.xlane.xlu1 %1083 }
 0x49a   :  { %v664_v44 = vpop.xlane.xlu0 %663 }
 0x49b   :  { %v1180_v45 = vpop.permute.xlu1 %1179 }
 0x49e   :  { %v874_v46 = vpop.xlane.xlu0 %873 }
 0x4a1   :  { %v1351_v37 = vpop.f32.mrb[4].mxu0 }
 0x4a2   :  { %v540_v38 = vpop.f32.mrb[5].mxu0  ;;  %v970_v49 = vpop.permute.xlu0 %969 }
 0x4cc   :  { %v464_v48 = vpop.xlane.xlu1 %463 }
 0x4cd   :  { %1487 = vrcp.f32 %v464_v48 }
 0x4ce   :  { %1489 = vrcp.f32 %v664_v44 }
 0x4cf   :  { %1491 = vrcp.f32 %v874_v46 }
 0x4d0   :  { %1493 = vrcp.f32 %v667_v42 }
 0x4d3   :  { %v467_v50 = vpop.xlane.xlu0 %466 }
 0x4d4   :  { %1495 = vrcp.f32 %v467_v50 }
 0x4d5   :  { %1497 = vrcp.f32 %v1084_v43 }
 0x4d6   :  { %1499 = vrcp.f32 %v877_v40 }
 0x4d7   :  { %v1488_v51 = vpop.eup %1487  ;;  %1501 = vrcp.f32 %v1087_v41 }
 0x4d8   :  { %v1365_v52 = vpop.f32.mrb[6].mxu0  ;;  %v551_v53 = vmul.f32 %v1488_v51, %v540_v38  ;;  %v1490_v56 = vpop.eup %1489 }
 0x4d9   :  { %v1358_v54 = vpop.f32.mrb[4].mxu1  ;;  %v956_v55 = vpop.f32.mrb[7].mxu0 }
 0x4da   :  { %v746_v57 = vpop.f32.mrb[5].mxu1  ;;  %v559_v27 = vadd.f32 %v1688_v47, %v551_v53  ;;  %v1492_v58 = vpop.eup %1491 }
 0x4db   :  { %v757_v59 = vmul.f32 %v1490_v56, %v746_v57  ;;  %v967_v60 = vmul.f32 %v1492_v58, %v956_v55  ;;  %v1494_v62 = vpop.eup %1493 }
 0x4dc   :  { %v562_v61 = vsel %vm561_vm0, %v559_v27, -inf  ;;  %v758_v4 = vmul.f32 %v1494_v62, %v1358_v54 }
 0x4dd   :  { %563 = vmax.xlane.f32.xlu0 %v562_v61  ;;  %v1372_v63 = vpop.f32.mrb[6].mxu1  ;;  %v762_v0 = vadd.f32 %v760_v39, %v757_v59  ;;  %v972_v8 = vadd.f32 %v970_v49, %v967_v60 }
 0x4de   :  { %v1496_v1 = vpop.eup %1495  ;;  %v1166_v2 = vpop.f32.mrb[7].mxu1  ;;  %v763_v13 = vadd.f32 %v760_v39, %v758_v4 }
 0x4df   :  { %v1498_v3 = vpop.eup %1497  ;;  %v765_v5 = vsel %vm764_vm1, %v762_v0, -inf  ;;  %v552_v6 = vmul.f32 %v1496_v1, %v1351_v37  ;;  %v975_v14 = vsel %vm974_vm2, %v972_v8, -inf }
 0x4e0   :  { %v1177_v7 = vmul.f32 %v1498_v3, %v1166_v2  ;;  %v1500_v10 = vpop.eup %1499  ;;  %v768_v18 = vsel %vm764_vm1, %v763_v13, -inf }
 0x4e1   :  { %766 = vmax.xlane.f32.xlu0 %v765_v5  ;;  %v560_v9 = vadd.f32 %v1688_v47, %v552_v6  ;;  %v968_v11 = vmul.f32 %v1500_v10, %v1365_v52  ;;  %v1502_v16 = vpop.eup %1501 }
 0x4e2   :  { %v1182_v15 = vadd.f32 %v1180_v45, %v1177_v7  ;;  %v1178_v17 = vmul.f32 %v1502_v16, %v1372_v63 }
 0x4e3   :  { %v565_v12 = vsel %vm561_vm0, %v560_v9, -inf  ;;  %v973_v19 = vadd.f32 %v970_v49, %v968_v11 }
 0x4e4   :  { %566 = vmax.xlane.f32.xlu1 %v565_v12  ;;  %v1185_v47 = vsel %vm1184_vm3, %v1182_v15, -inf  ;;  %v1183_v21 = vadd.f32 %v1180_v45, %v1178_v17 }
 0x4e5   :  { %976 = vmax.xlane.f32.xlu0 %v975_v14  ;;  %v978_v20 = vsel %vm974_vm2, %v973_v19, -inf }
 0x4e6   :  { %v1188_v22 = vsel %vm1184_vm3, %v1183_v21, -inf }
 0x4e8   :  { %769 = vmax.xlane.f32.xlu1 %v768_v18 }
 0x4e9   :  { %1186 = vmax.xlane.f32.xlu0 %v1185_v47 }
 0x4ec   :  { %979 = vmax.xlane.f32.xlu1 %v978_v20 }
 0x4f0   :  { %1189 = vmax.xlane.f32.xlu1 %v1188_v22 }
 0x56a   :  { %v564_v23 = vpop.xlane.xlu0 %563 }
 0x56b   :  { %v1732_v24 = vsub.f32 %v559_v27, %v564_v23 }
 0x56d   :  { %v570_v25 = vmul.f32 1.442695, %v1732_v24 }
 0x56e   :  { %v767_v26 = vpop.xlane.xlu0 %766 }
 0x56f   :  { %1503 = vpow2.f32 %v570_v25  ;;  %v1735_v28 = vsub.f32 %v762_v0, %v767_v26 }
 0x571   :  { %v773_v29 = vmul.f32 1.442695, %v1735_v28  ;;  %v567_v30 = vpop.xlane.xlu1 %566 }
 0x572   :  { %v1738_v31 = vsub.f32 %v560_v9, %v567_v30  ;;  %v977_v32 = vpop.xlane.xlu0 %976 }
 0x573   :  { %1505 = vpow2.f32 %v773_v29  ;;  %v1741_v34 = vsub.f32 %v972_v8, %v977_v32 }
 0x574   :  { %v572_v33 = vmul.f32 1.442695, %v1738_v31 }
 0x575   :  { %v770_v35 = vpop.xlane.xlu1 %769  ;;  %v983_v38 = vmul.f32 1.442695, %v1741_v34 }
 0x576   :  { %1507 = vpow2.f32 %v572_v33  ;;  %v1743_v36 = vsub.f32 %v763_v13, %v770_v35  ;;  %v1187_v37 = vpop.xlane.xlu0 %1186 }
 0x577   :  { %v1747_v40 = vsub.f32 %v1182_v15, %v1187_v37 }
 0x578   :  { %v775_v39 = vmul.f32 1.442695, %v1743_v36 }
 0x579   :  { %v1504_v41 = vpop.eup %1503  ;;  %v980_v42 = vpop.xlane.xlu1 %979  ;;  %v1193_v45 = vmul.f32 1.442695, %v1747_v40 }
 0x57a   :  { %1509 = vpow2.f32 %v775_v39  ;;  %v1749_v43 = vsub.f32 %v973_v19, %v980_v42  ;;  %v574_v44 = vsel %vm561_vm0, %v1504_v41, 0.0 }
 0x57b   :  { %575 = vadd.xlane.f32.xlu0 %v574_v44  ;;  %1511 = vpow2.f32 %v983_v38 }
 0x57c   :  { %v985_v46 = vmul.f32 1.442695, %v1749_v43 }
 0x57d   :  { %v1506_v48 = vpop.eup %1505  ;;  %v1190_v49 = vpop.xlane.xlu1 %1189 }
 0x57e   :  { %1513 = vpow2.f32 %v985_v46  ;;  %v1754_v50 = vsub.f32 %v1183_v21, %v1190_v49  ;;  %v777_v51 = vsel %vm764_vm1, %v1506_v48, 0.0 }
 0x57f   :  { %778 = vadd.xlane.f32.xlu0 %v777_v51  ;;  %1515 = vpow2.f32 %v1193_v45 }
 0x580   :  { %v1508_v52 = vpop.eup %1507  ;;  %v1195_v53 = vmul.f32 1.442695, %v1754_v50 }
 0x581   :  { %v577_v54 = vsel %vm561_vm0, %v1508_v52, 0.0 }
 0x582   :  { %1517 = vpow2.f32 %v1195_v53  ;;  %578 = vadd.xlane.f32.xlu1 %v577_v54 }
 0x584   :  { %v1510_v55 = vpop.eup %1509 }
 0x585   :  { %v780_v56 = vsel %vm764_vm1, %v1510_v55, 0.0  ;;  %v1512_v57 = vpop.eup %1511 }
 0x586   :  { %781 = vadd.xlane.f32.xlu1 %v780_v56  ;;  %v987_v59 = vsel %vm974_vm2, %v1512_v57, 0.0 }
 0x588   :  { %v1514_v27 = vpop.eup %1513 }
 0x589   :  { %v990_v58 = vsel %vm974_vm2, %v1514_v27, 0.0  ;;  %v1516_v60 = vpop.eup %1515 }
 0x58a   :  { %991 = vadd.xlane.f32.xlu0 %v990_v58  ;;  %988 = vadd.xlane.f32.xlu1 %v987_v59  ;;  %v1197_v63 = vsel %vm1184_vm3, %v1516_v60, 0.0 }
 0x58c   :  { %v1518_v61 = vpop.eup %1517 }
 0x58d   :  { %v1200_v62 = vsel %vm1184_vm3, %v1518_v61, 0.0 }
 0x58e   :  { %1201 = vadd.xlane.f32.xlu0 %v1200_v62  ;;  %1198 = vadd.xlane.f32.xlu1 %v1197_v63 }
 0x608   :  { %v576_v0 = vpop.xlane.xlu0 %575 }
 0x609   :  { %1519 = vlog2.f32 %v576_v0 }
 0x60c   :  { %v779_v1 = vpop.xlane.xlu0 %778 }
 0x60d   :  { %1521 = vlog2.f32 %v779_v1 }
 0x60f   :  { %v579_v2 = vpop.xlane.xlu1 %578 }
 0x610   :  { %1523 = vlog2.f32 %v579_v2 }
 0x613   :  { %v1520_v3 = vpop.eup %1519  ;;  %v782_v4 = vpop.xlane.xlu1 %781 }
 0x614   :  { %v581_v5 = vmul.f32 0.6931472, %v1520_v3  ;;  %1525 = vlog2.f32 %v782_v4 }
 0x616   :  { %v584_v6 = vsub.f32 %v1732_v24, %v581_v5 }
 0x617   :  { %v1522_v7 = vpop.eup %1521  ;;  %v989_v8 = vpop.xlane.xlu1 %988 }
 0x618   :  { %v992_v9 = vpop.xlane.xlu0 %991  ;;  %v784_v10 = vmul.f32 0.6931472, %v1522_v7  ;;  %1527 = vlog2.f32 %v989_v8  ;;  %586 = vst.msk [vmem:[%s1803_s5] sm:$0xff] %vm561_vm0, %v584_v6 }
 0x619   :  { %1529 = vlog2.f32 %v992_v9 }
 0x61a   :  { %v1524_v11 = vpop.eup %1523  ;;  %v787_v12 = vsub.f32 %v1735_v28, %v784_v10 }
 0x61b   :  { %v583_v13 = vmul.f32 0.6931472, %v1524_v11  ;;  %v1199_v14 = vpop.xlane.xlu1 %1198 }
 0x61c   :  { %v1202_v15 = vpop.xlane.xlu0 %1201  ;;  %1531 = vlog2.f32 %v1199_v14  ;;  %791 = vrot.lane.b32.xlu0 %v787_v12, %s1545_s28 }
 0x61d   :  { %v585_v16 = vsub.f32 %v1738_v31, %v583_v13  ;;  %1533 = vlog2.f32 %v1202_v15 }
 0x61e   :  { %v1526_v17 = vpop.eup %1525 }
 0x61f   :  { %v786_v18 = vmul.f32 0.6931472, %v1526_v17  ;;  %587 = vst.msk [vmem:[%s1803_s5 + $0x8] sm:$0xff] %vm561_vm0, %v585_v16 }
 0x621   :  { %v788_v19 = vsub.f32 %v1743_v36, %v786_v18 }
 0x622   :  { %v1528_v47 = vpop.eup %1527 }
 0x623   :  { %v1530_v20 = vpop.eup %1529  ;;  %v994_v21 = vmul.f32 0.6931472, %v1528_v47  ;;  %793 = vrot.lane.b32.xlu1 %v788_v19, %s1545_s28 }
 0x624   :  { %v996_v22 = vmul.f32 0.6931472, %v1530_v20 }
 0x625   :  { %v997_v23 = vsub.f32 %v1741_v34, %v994_v21 }
 0x626   :  { %v1532_v24 = vpop.eup %1531  ;;  %v998_v25 = vsub.f32 %v1749_v43, %v996_v22 }
 0x627   :  { %v1534_v26 = vpop.eup %1533  ;;  %v1204_v28 = vmul.f32 0.6931472, %v1532_v24  ;;  %1001 = vrot.lane.b32.xlu0 %v997_v23, %s1546_s6 }
 0x628   :  { %v1206_v29 = vmul.f32 0.6931472, %v1534_v26  ;;  %1003 = vrot.lane.b32.xlu1 %v998_v25, %s1546_s6 }
 0x629   :  { %v1207_v30 = vsub.f32 %v1747_v40, %v1204_v28 }
 0x62a   :  { %v1208_v31 = vsub.f32 %v1754_v50, %v1206_v29 }
 0x62b   :  { %1211 = vrot.lane.b32.xlu0 %v1207_v30, %s1547_s7 }
 0x62c   :  { %1213 = vrot.lane.b32.xlu1 %v1208_v31, %s1547_s7 }
 0x68e   :  { %v792_v32 = vpop.permute.xlu0 %791 }
 0x68f   :  { %798 = vst.msk [vmem:[%s1803_s5] sm:$0xff] %vm797_vm4, %v792_v32 }
 0x695   :  { %v794_v33 = vpop.permute.xlu1 %793 }
 0x696   :  { %799 = vst.msk [vmem:[%s1803_s5 + $0x8] sm:$0xff] %vm797_vm4, %v794_v33 }
 0x699   :  { %v1002_v34 = vpop.permute.xlu0 %1001 }
 0x69a   :  { %v1004_v35 = vpop.permute.xlu1 %1003  ;;  %1008 = vst.msk [vmem:[%s1803_s5] sm:$0xff] %vm1007_vm5, %v1002_v34 }
 0x69b   :  { %1009 = vst.msk [vmem:[%s1803_s5 + $0x8] sm:$0xff] %vm1007_vm5, %v1004_v35 }
 0x69d   :  { %v1212_v36 = vpop.permute.xlu0 %1211 }
 0x69e   :  { %v1214_v37 = vpop.permute.xlu1 %1213  ;;  %1218 = vst.msk [vmem:[%s1803_s5] sm:$0xff] %vm1217_vm6, %v1212_v36 }
 0x69f   :  { %1219 = vst.msk [vmem:[%s1803_s5 + $0x8] sm:$0xff] %vm1217_vm6, %v1214_v37 }

// kernel: multitask_gat_forward.4
= control target key start
LH: loop header
LB: loop body
LE: loop exit
PB: predicated region body
PF: predicated region fallthrough
CT: control target
= control target key end

     0   :  { %vm42_vm0 = vcmask 523264   ;;  %s2377_s27 = smov 120   ;;  %s2379_s30 = smov 96   ;;  %v2382_v62 = vmov 0   ;;  %vm469_vm5 = vcmask 130048   ;;  %s2820_s2 = inlined_call_operand.vmem [shape: f32[64,64], index: 2, kind: input, shape index: {}]   ;;  %s2821_s0 = inlined_call_operand.vmem [shape: f32[16,64], index: 0, kind: input, shape index: {}]   ;;  %s2822_s3 = inlined_call_operand.vmem [shape: f32[64,16], index: 3, kind: input, shape index: {}]   ;;  %s2823_s4 = inlined_call_operand.vmem [shape: f32[1,64], index: 4, kind: input, shape index: {}]   ;;  %s2824_s1 = inlined_call_operand.vmem [shape: bf16[16,16], index: 1, kind: input, shape index: {}]   ;;  %s2825_s5 = inlined_call_operand.vmem [shape: f32[16,64], index: 5, kind: output, shape index: {}]  }
   0x1   :  { %v25_v0 = vld [vmem:[%s2820_s2] sm:$0xff]  ;;  %v26_v1 = vld [vmem:[%s2820_s2 + $0x8] sm:$0xff]  ;;  %v27_v2 = vld [vmem:[%s2820_s2 + $0x10] sm:$0xff]  ;;  %s2380_s6 = smov 104   ;;  %s2381_s7 = smov 88   ;;  %2285 = vset.pattern.permute.xlu1 %v2382_v62 }
   0x2   :  { %v2114_v3 = vpack.c.bf16 %v26_v1, %v25_v0  ;;  %v28_v4 = vld [vmem:[%s2820_s2 + $0x18] sm:$0xff]  ;;  %v29_v6 = vld [vmem:[%s2820_s2 + $0x20] sm:$0xff]  ;;  %v30_v7 = vld [vmem:[%s2820_s2 + $0x28] sm:$0xff]  ;;  %s2383_s8 = smov 126   ;;  %s2384_s9 = smov 127  }
   0x3   :  { %v2118_v5 = vpack.c.bf16 %v28_v4, %v27_v2  ;;  %v23_v8 = vld [vmem:[%s2821_s0] sm:$0xff]  ;;  %v34_v10 = vld [vmem:[%s2822_s3 + $0x8] sm:$0xff]  ;;  %v35_v12 = vld [vmem:[%s2822_s3 + $0x10] sm:$0xff]  ;;  %v2122_v16 = vpack.c.bf16 %v30_v7, %v29_v6  ;;  %s2385_s10 = smov 122   ;;  %s2386_s11 = smov 125   ;;  %v2390_v7 = vmov 1  }
   0x4   :  { %2115 = vmatprep.subr.bf16.mxu0 %v2114_v3  ;;  %1998 = vmatprep.mubr.msk.f32.mxu0 %vm42_vm0, %v23_v8  ;;  %v33_v9 = vld [vmem:[%s2822_s3] sm:$0xff]  ;;  %v36_v13 = vld [vmem:[%s2822_s3 + $0x18] sm:$0xff]  ;;  %v38_v17 = vld [vmem:[%s2822_s3 + $0x28] sm:$0xff]  ;;  %s2387_s12 = smov 124   ;;  %s2388_s13 = smov 123  }
   0x5   :  { %2117 = vmatpush3.bf16.msra.mxu0 %v2114_v3  ;;  %v2240_v11 = vpack.i.bf16 %v34_v10, %v33_v9  ;;  %v37_v14 = vld [vmem:[%s2822_s3 + $0x20] sm:$0xff]  ;;  %v2130_v15 = vpack.c.bf16 %v34_v10, %v33_v9  ;;  %v39_v18 = vld [vmem:[%s2822_s3 + $0x30] sm:$0xff]  ;;  %v40_v19 = vld [vmem:[%s2822_s3 + $0x38] sm:$0xff]  ;;  %v2134_v20 = vpack.c.bf16 %v36_v13, %v35_v12  ;;  %v2245_v23 = vpack.i.bf16 %v36_v13, %v35_v12  ;;  %s2389_s14 = smov 121   ;;  %s2398_s19 = smov 72  }
   0x6   :  { %2119 = vmatprep.subr.bf16.mxu0 %v2118_v5  ;;  %v31_v21 = vld [vmem:[%s2820_s2 + $0x30] sm:$0xff]  ;;  %v32_v22 = vld [vmem:[%s2820_s2 + $0x38] sm:$0xff]  ;;  %v2250_v24 = vpack.i.bf16 %v38_v17, %v37_v14  ;;  %v2255_v25 = vpack.i.bf16 %v40_v19, %v39_v18  ;;  %v2138_v27 = vpack.c.bf16 %v38_v17, %v37_v14  ;;  %v2494_v28 = vld [vmem:[%s2823_s4] ss:$0 sm:$0xff]  ;;  %v2142_v29 = vpack.c.bf16 %v40_v19, %v39_v18  ;;  %s2400_s26 = smov 16   ;;  %s2402_s3 = smov 32  }
   0x7   :  { %2241 = vrot.lane.b32.xlu0 %v2240_v11, %s2377_s27  ;;  %2131 = vmatprep.subr.bf16.mxu1 %v2130_v15  ;;  %v2126_v26 = vpack.c.bf16 %v32_v22, %v31_v21  ;;  %v24_v30 = vld [vmem:[%s2821_s0 + $0x8] sm:$0xff]  ;;  %s2378_s0 = smov 112   ;;  %v2392_v9 = vmov 3   ;;  %v2393_v10 = vmov 5   ;;  %v2394_v11 = vmov 6   ;;  %s2403_s2 = smov 40  }
   0x8   :  { %2133 = vmatpush3.bf16.msra.mxu1 %v2130_v15  ;;  %2251 = vrot.lane.b32.xlu1 %v2250_v24, %s2377_s27  ;;  %v2395_v12 = vmov 4   ;;  %v2396_v13 = vmov 7   ;;  %s2404_s28 = smov 56   ;;  %s2405_s29 = smov 48  }
   0x9   :  { %2121 = vmatpush3.bf16.msra.mxu0 %v2118_v5  ;;  %2135 = vmatprep.subr.bf16.mxu1 %v2134_v20 }
   0xa   :  { %2123 = vmatprep.subr.bf16.mxu0 %v2122_v16 }
   0xb   :  { %2246 = vrot.lane.b32.xlu0 %v2245_v23, %s2377_s27 }
   0xc   :  { %2137 = vmatpush3.bf16.msra.mxu1 %v2134_v20  ;;  %2256 = vrot.lane.b32.xlu1 %v2255_v25, %s2377_s27 }
   0xd   :  { %2125 = vmatpush3.bf16.msra.mxu0 %v2122_v16  ;;  %2139 = vmatprep.subr.bf16.mxu1 %v2138_v27 }
   0xe   :  { %2127 = vmatprep.subr.bf16.mxu0 %v2126_v26 }
   0xf   :  { %755 = vrot.lane.b32.xlu0 %v2494_v28, %s2377_s27 }
  0x10   :  { %2141 = vmatpush3.bf16.msra.mxu1 %v2138_v27 }
  0x11   :  { %2129 = vmatpush3.bf16.msra.mxu0 %v2126_v26  ;;  %2143 = vmatprep.subr.bf16.mxu1 %v2142_v29 }
  0x12   :  { %2147 = vmatprep.subr.bf16.mxu0 %v2114_v3 }
  0x14   :  { %1999 = vmatmul.mubr.msk.f32.vlgmr.msra.gmra.mrb[0].mxu0 %vm42_vm0, %v24_v30  ;;  %2145 = vmatpush3.bf16.msra.mxu1 %v2142_v29 }
  0x15   :  { %2149 = vmatpush3.bf16.msra.mxu0 %v2114_v3  ;;  %2036 = vmatprep.mubr.msk.f32.mxu0 %vm42_vm0, %v23_v8  ;;  %v2391_v8 = vmov 2  }
  0x16   :  { %2151 = vmatprep.subr.bf16.mxu0 %v2118_v5 }
  0x19   :  { %2153 = vmatpush3.bf16.msra.mxu0 %v2118_v5 }
  0x1a   :  { %2155 = vmatprep.subr.bf16.mxu0 %v2122_v16 }
  0x1d   :  { %2157 = vmatpush3.bf16.msra.mxu0 %v2122_v16 }
  0x1e   :  { %2159 = vmatprep.subr.bf16.mxu0 %v2126_v26 }
  0x21   :  { %2161 = vmatpush3.bf16.msra.mxu0 %v2126_v26 }
  0x24   :  { %2037 = vmatmul.mubr.msk.f32.vlgmr.msra.gmra.mrb[2].mxu0 %vm42_vm0, %v24_v30 }
  0x79   :  { %v2242_v31 = vpop.permute.xlu0 %2241 }
  0x7a   :  { %v2244_v32 = vunpack.i.h.bf16 %v2242_v31  ;;  %v2243_v33 = vunpack.i.l.bf16 %v2242_v31  ;;  %v2252_v38 = vpop.permute.xlu1 %2251 }
  0x7b   :  { %v2254_v42 = vunpack.i.h.bf16 %v2252_v38  ;;  %v2253_v43 = vunpack.i.l.bf16 %v2252_v38 }
  0x7c   :  { %v2162_v34 = vpack.c.bf16 %v2244_v32, %v2243_v33 }
  0x7d   :  { %v2247_v35 = vpop.permute.xlu0 %2246  ;;  %v2170_v49 = vpack.c.bf16 %v2254_v42, %v2253_v43 }
  0x7e   :  { %2163 = vmatprep.subr.bf16.mxu1 %v2162_v34  ;;  %v2249_v36 = vunpack.i.h.bf16 %v2247_v35  ;;  %v2248_v37 = vunpack.i.l.bf16 %v2247_v35  ;;  %v2257_v46 = vpop.permute.xlu1 %2256  ;;  %v449_v35 = vlaneseq }
  0x7f   :  { %v2259_v47 = vunpack.i.h.bf16 %v2257_v46  ;;  %v2258_v48 = vunpack.i.l.bf16 %v2257_v46 }
  0x80   :  { %v2166_v41 = vpack.c.bf16 %v2249_v36, %v2248_v37  ;;  %v403_v36 = vld [vmem:[%s2824_s1] sm:$0xf]  ;;  %v450_v38 = vshrl.u32 %v449_v35, 7 }
  0x81   :  { %v2174_v50 = vpack.c.bf16 %v2259_v47, %v2258_v48  ;;  %v2521_v53 = vpop.permute.xlu0 %755  ;;  %vm405_vm1 = vcmp.gt.bf16.partialorder %v403_v36, 0  ;;  %v404_v48 = vld [vmem:[%s2824_s1 + $0x4] sm:$0xf]  ;;  %s2397_s1 = smov 80  }
  0x82   :  { %vm406_vm4 = vcmp.gt.bf16.partialorder %v404_v48, 0 }
  0xe7   :  { %v2000_v39 = vpop.f32.mrb[0].mxu0 }
  0xe8   :  { %v115_v40 = vpop.f32.mrb[1].mxu0 }
  0xe9   :  { %2017 = vmatprep.mubr.msk.f32.mxu1 %vm42_vm0, %v115_v40  ;;  %v2506_v44 = vpack.i.bf16 %v2000_v39, %v115_v40  ;;  %v2178_v45 = vpack.c.bf16 %v2000_v39, %v115_v40 }
  0xea   :  { %2018 = vmatmul.mubr.msk.f32.vlgmr.msra.gmra.mrb[0].mxu1 %vm42_vm0, %v2000_v39  ;;  %v2546_v39 = vsub.s32 0, %v450_v38 }
  0xeb   :  { %2266 = vrot.lane.b32.xlu1 %v2506_v44, %s2378_s0  ;;  %2261 = vrot.lane.b32.xlu0 %v2506_v44, %s2377_s27  ;;  %s2401_s27 = smov 24  }
  0xec   :  { %2179 = vmatprep.subr.bf16.mxu0 %v2178_v45  ;;  %2165 = vmatpush3.bf16.msra.mxu1 %v2162_v34 }
  0xed   :  { %2181 = vmatpush3.bf16.msra.mxu0 %v2178_v45  ;;  %2167 = vmatprep.subr.bf16.mxu1 %v2166_v41 }
  0xef   :  { %2276 = vrot.lane.b32.xlu1 %v2506_v44, %s2379_s30  ;;  %2271 = vrot.lane.b32.xlu0 %v2506_v44, %s2380_s6 }
  0xf0   :  { %2169 = vmatpush3.bf16.msra.mxu1 %v2166_v41  ;;  %v461_v41 = vsel %vm405_vm1, 65537, %v2382_v62 }
  0xf1   :  { %2171 = vmatprep.subr.bf16.mxu1 %v2170_v49  ;;  %v463_v43 = vunpack.c.l.b16 %v461_v41 }
  0xf3   :  { %2281 = vrot.lane.b32.xlu1 %v2506_v44, %s2381_s7  ;;  %vm2555_vm2 = vcmp.ne.s32.totalorder %v463_v43, 0 }
  0xf4   :  { %2173 = vmatpush3.bf16.msra.mxu1 %v2170_v49 }
  0xf5   :  { %2175 = vmatprep.subr.bf16.mxu1 %v2174_v50 }
  0xf7   :  { %v2038_v51 = vpop.f32.mrb[2].mxu0 }
  0xf8   :  { %2177 = vmatpush3.bf16.msra.mxu1 %v2174_v50  ;;  %v281_v52 = vpop.f32.mrb[3].mxu0 }
  0xf9   :  { %2055 = vmatprep.mubr.msk.f32.mxu1 %vm42_vm0, %v281_v52 }
  0xfb   :  { %2056 = vmatmul.mubr.msk.f32.vlgmr.msra.gmra.mrb[2].mxu1 %vm42_vm0, %v2038_v51 }
 0x15d   :  { %v2267_v54 = vpop.permute.xlu1 %2266  ;;  %v2262_v55 = vpop.permute.xlu0 %2261 }
 0x15e   :  { %v2269_v56 = vunpack.i.h.bf16 %v2267_v54  ;;  %v2268_v57 = vunpack.i.l.bf16 %v2267_v54  ;;  %v2264_v58 = vunpack.i.h.bf16 %v2262_v55  ;;  %v2263_v59 = vunpack.i.l.bf16 %v2262_v55 }
 0x160   :  { %v2182_v60 = vpack.c.bf16 %v2264_v58, %v2263_v59  ;;  %v2523_v61 = vpack.c.bf16 %v2269_v56, %v2268_v57  ;;  %v462_v56 = vsel %vm406_vm4, 65537, %v2382_v62 }
 0x161   :  { %v2272_v63 = vpop.permute.xlu0 %2271  ;;  %v2533_v14 = vpop.permute.xlu1 %2276  ;;  %v464_v57 = vunpack.c.l.b16 %v462_v56 }
 0x162   :  { %v2274_v0 = vunpack.i.h.bf16 %v2272_v63  ;;  %v2273_v1 = vunpack.i.l.bf16 %v2272_v63  ;;  %2183 = vmatprep.subr.bf16.mxu1 %v2182_v60  ;;  %2187 = vmatprep.subr.bf16.mxu0 %v2523_v61 }
 0x163   :  { %2185 = vmatpush3.bf16.msra.mxu1 %v2182_v60  ;;  %vm2566_vm7 = vcmp.ne.s32.totalorder %v464_v57, 0 }
 0x164   :  { %v2527_v2 = vpack.c.bf16 %v2274_v0, %v2273_v1 }
 0x165   :  { %v2535_v15 = vpop.permute.xlu1 %2281 }
 0x166   :  { %2191 = vmatprep.subr.bf16.mxu1 %v2527_v2 }
 0x1bd   :  { %v2019_v3 = vpop.f32.mrb[0].mxu1 }
 0x1be   :  { %773 = vrot.lane.b32.xlu0 %v2019_v3, %s2383_s8  ;;  %588 = vrot.lane.b32.xlu1 %v2019_v3, %s2384_s9  ;;  %v196_v4 = vpop.f32.mrb[1].mxu1 }
 0x1c2   :  { %1513 = vrot.lane.b32.xlu0 %v2019_v3, %s2385_s10  ;;  %958 = vrot.lane.b32.xlu1 %v2019_v3, %s2386_s11 }
 0x1c6   :  { %1143 = vrot.lane.b32.xlu1 %v2019_v3, %s2387_s12  ;;  %771 = vrot.lane.b32.xlu0 %v196_v4, %s2383_s8 }
 0x1ca   :  { %1328 = vrot.lane.b32.xlu1 %v2019_v3, %s2388_s13  ;;  %956 = vrot.lane.b32.xlu0 %v196_v4, %s2386_s11 }
 0x1ce   :  { %1698 = vrot.lane.b32.xlu1 %v2019_v3, %s2389_s14  ;;  %1511 = vrot.lane.b32.xlu0 %v196_v4, %s2385_s10  ;;  %v2057_v5 = vpop.f32.mrb[2].mxu1 }
 0x1cf   :  { %v394_v6 = vpop.f32.mrb[3].mxu1 }
 0x1d2   :  { %586 = vrot.lane.b32.xlu1 %v196_v4, %s2384_s9 }
 0x1d6   :  { %1141 = vrot.lane.b32.xlu1 %v196_v4, %s2387_s12 }
 0x1da   :  { %1326 = vrot.lane.b32.xlu1 %v196_v4, %s2388_s13 }
 0x1de   :  { %1696 = vrot.lane.b32.xlu1 %v196_v4, %s2389_s14 }
 0x1e2   :  { %446 = vperm.xlu1 %2285, %v2057_v5  }
 0x1e6   :  { %2286 = vset.pattern.permute.xlu1 %v2390_v7 }
 0x1e7   :  { %629 = vperm.xlu1 %2286, %v2057_v5  }
 0x1eb   :  { %2287 = vset.pattern.permute.xlu1 %v2391_v8 }
 0x1ec   :  { %407 = vxpose.xlu0.b32.start [1/2] (short) (narrow) %v196_v4, 8  ;;  %814 = vperm.xlu1 %2287, %v2057_v5  }
 0x1f0   :  { %408 = vxpose.xlu0.b32.end [2/2] (short) (narrow) %v2019_v3, 8  ;;  %2288 = vset.pattern.permute.xlu1 %v2392_v9 }
 0x1f1   :  { %999 = vperm.xlu1 %2288, %v2057_v5  }
 0x1f5   :  { %2290 = vset.pattern.permute.xlu1 %v2393_v10 }
 0x1f6   :  { %1369 = vperm.xlu1 %2290, %v2057_v5  }
 0x1fa   :  { %2291 = vset.pattern.permute.xlu1 %v2394_v11 }
 0x1fb   :  { %1554 = vperm.xlu1 %2291, %v2057_v5  }
 0x1ff   :  { %2293 = vset.pattern.permute.xlu1 %v2382_v62 }
 0x200   :  { %441 = vperm.xlu1 %2293, %v394_v6  }
 0x204   :  { %2295 = vset.pattern.permute.xlu1 %v2391_v8 }
 0x205   :  { %810 = vperm.xlu1 %2295, %v394_v6  }
 0x209   :  { %2297 = vset.pattern.permute.xlu1 %v2395_v12 }
 0x20a   :  { %1180 = vperm.xlu1 %2297, %v394_v6  }
 0x20e   :  { %2298 = vset.pattern.permute.xlu1 %v2393_v10 }
 0x20f   :  { %1365 = vperm.xlu1 %2298, %v394_v6  }
 0x213   :  { %2300 = vset.pattern.permute.xlu1 %v2396_v13 }
 0x214   :  { %1735 = vperm.xlu1 %2300, %v394_v6  }
 0x219   :  { %2289 = vset.pattern.permute.xlu0 %v2395_v12 }
 0x21a   :  { %1184 = vperm.xlu0 %2289, %v2057_v5  }
 0x21e   :  { %2292 = vset.pattern.permute.xlu0 %v2396_v13 }
 0x21f   :  { %1739 = vperm.xlu0 %2292, %v2057_v5  }
 0x223   :  { %2294 = vset.pattern.permute.xlu0 %v2390_v7 }
 0x224   :  { %625 = vperm.xlu0 %2294, %v394_v6  }
 0x228   :  { %2296 = vset.pattern.permute.xlu0 %v2392_v9 }
 0x229   :  { %995 = vperm.xlu0 %2296, %v394_v6  }
 0x22d   :  { %2299 = vset.pattern.permute.xlu0 %v2394_v11 }
 0x22e   :  { %1550 = vperm.xlu0 %2299, %v394_v6  }
 0x230   :  { %v589_v16 = vpop.permute.xlu1 %588  ;;  %v774_v19 = vpop.permute.xlu0 %773 }
 0x234   :  { %v959_v17 = vpop.permute.xlu1 %958  ;;  %v1514_v21 = vpop.permute.xlu0 %1513 }
 0x238   :  { %v1144_v18 = vpop.permute.xlu1 %1143  ;;  %v772_v24 = vpop.permute.xlu0 %771 }
 0x23c   :  { %v1329_v20 = vpop.permute.xlu1 %1328  ;;  %v957_v25 = vpop.permute.xlu0 %956 }
 0x240   :  { %v1699_v22 = vpop.permute.xlu1 %1698  ;;  %v1512_v27 = vpop.permute.xlu0 %1511 }
 0x244   :  { %v587_v23 = vpop.permute.xlu1 %586 }
 0x245   :  { %592 = vxpose.xlu1.b32.start [1/2] (short) (narrow) %v587_v23, 8 }
 0x248   :  { %v1142_v26 = vpop.permute.xlu1 %1141 }
 0x249   :  { %593 = vxpose.xlu1.b32.end [2/2] (short) (narrow) %v589_v16, 8 }
 0x24c   :  { %777 = vxpose.xlu0.b32.start [1/2] (short) (narrow) %v772_v24, 8  ;;  %v1327_v29 = vpop.permute.xlu1 %1326 }
 0x24d   :  { %962 = vxpose.xlu1.b32.start [1/2] (short) (narrow) %v957_v25, 8 }
 0x250   :  { %778 = vxpose.xlu0.b32.end [2/2] (short) (narrow) %v774_v19, 8  ;;  %v1697_v30 = vpop.permute.xlu1 %1696 }
 0x251   :  { %963 = vxpose.xlu1.b32.end [2/2] (short) (narrow) %v959_v17, 8 }
 0x254   :  { %1147 = vxpose.xlu0.b32.start [1/2] (short) (narrow) %v1142_v26, 8 }
 0x255   :  { %1517 = vxpose.xlu1.b32.start [1/2] (short) (narrow) %v1512_v27, 8 }
 0x258   :  { %1148 = vxpose.xlu0.b32.end [2/2] (short) (narrow) %v1144_v18, 8 }
 0x259   :  { %1518 = vxpose.xlu1.b32.end [2/2] (short) (narrow) %v1514_v21, 8 }
 0x25c   :  { %1332 = vxpose.xlu0.b32.start [1/2] (short) (narrow) %v1327_v29, 8 }
 0x260   :  { %1333 = vxpose.xlu0.b32.end [2/2] (short) (narrow) %v1329_v20, 8 }
 0x261   :  { %v447_v31 = vpop.permute.xlu1 %446 }
 0x264   :  { %1702 = vxpose.xlu0.b32.start [1/2] (short) (narrow) %v1697_v30, 8 }
 0x266   :  { %v630_v32 = vpop.permute.xlu1 %629 }
 0x268   :  { %1703 = vxpose.xlu0.b32.end [2/2] (short) (narrow) %v1699_v22, 8 }
 0x26b   :  { %v2537_v33 = vpop.permute.xlu1 %814 }
 0x26c   :  { %v423_v42 = vpop.trf.xlu0 }
 0x26d   :  { %v452_v45 = vrot.slane %v423_v42, %v2546_v39 }
 0x26f   :  { %v454_v54 = vadd.f32 %v452_v45, %v447_v31 }
 0x270   :  { %v2539_v34 = vpop.permute.xlu1 %999 }
 0x271   :  { %v458_v58 = vmul.f32 0.2, %v454_v54  ;;  %vm456_vm6 = vcmp.gt.f32.partialorder %v454_v54, 0.0 }
 0x273   :  { %v460_v60 = vsel %vm456_vm6, %v454_v54, %v458_v58 }
 0x274   :  { %v2572_v63 = vsel %vm2566_vm7, %v460_v60, -1e+30 }
 0x275   :  { %v2544_v37 = vpop.permute.xlu1 %1369  ;;  %v473_v0 = vsel %vm469_vm5, %v2572_v63, -inf }
 0x27a   :  { %v2548_v40 = vpop.permute.xlu1 %1554 }
 0x27f   :  { %v442_v46 = vpop.permute.xlu1 %441 }
 0x280   :  { %v453_v47 = vadd.f32 %v452_v45, %v442_v46 }
 0x282   :  { %v457_v50 = vmul.f32 0.2, %v453_v47  ;;  %vm455_vm3 = vcmp.gt.f32.partialorder %v453_v47, 0.0 }
 0x284   :  { %v459_v51 = vsel %vm455_vm3, %v453_v47, %v457_v50  ;;  %v811_v62 = vpop.permute.xlu1 %810 }
 0x285   :  { %v2561_v52 = vsel %vm2555_vm2, %v459_v51, -1e+30 }
 0x286   :  { %v470_v55 = vsel %vm469_vm5, %v2561_v52, -inf }
 0x287   :  { %471 = vmax.xlane.f32.xlu1 %v470_v55 }
 0x289   :  { %v1181_v3 = vpop.permute.xlu1 %1180 }
 0x28e   :  { %v2579_v5 = vpop.permute.xlu1 %1365 }
 0x291   :  { %2311 = vset.pattern.permute.xlu0 %v2396_v13 }
 0x293   :  { %v2581_v7 = vpop.permute.xlu1 %1735 }
 0x295   :  { %474 = vmax.xlane.f32.xlu0 %v473_v0 }
 0x299   :  { %v1185_v1 = vpop.permute.xlu0 %1184 }
 0x29e   :  { %v2577_v4 = vpop.permute.xlu0 %1739 }
 0x2a3   :  { %v626_v6 = vpop.permute.xlu0 %625 }
 0x2a8   :  { %v996_v8 = vpop.permute.xlu0 %995 }
 0x2ad   :  { %v1551_v11 = vpop.permute.xlu0 %1550 }
 0x2c5   :  { %v608_v9 = vpop.trf.xlu1 }
 0x2c6   :  { %v635_v10 = vrot.slane %v608_v9, %v2546_v39 }
 0x2c8   :  { %v636_v12 = vadd.f32 %v635_v10, %v626_v6  ;;  %v637_v13 = vadd.f32 %v635_v10, %v630_v32 }
 0x2ca   :  { %vm639_vm8 = vcmp.gt.f32.partialorder %v637_v13, 0.0  ;;  %v641_v16 = vmul.f32 0.2, %v637_v13  ;;  %vm638_vm9 = vcmp.gt.f32.partialorder %v636_v12, 0.0  ;;  %v640_v17 = vmul.f32 0.2, %v636_v12 }
 0x2cc   :  { %v793_v18 = vpop.trf.xlu0  ;;  %v643_v19 = vsel %vm639_vm8, %v637_v13, %v641_v16  ;;  %v642_v20 = vsel %vm638_vm9, %v636_v12, %v640_v17  ;;  %vm1138_vm9 = vcmask 261312  }
 0x2cd   :  { %v820_v21 = vrot.slane %v793_v18, %v2546_v39  ;;  %v978_v22 = vpop.trf.xlu1  ;;  %v2587_v23 = vsel %vm2566_vm7, %v643_v19, -1e+30  ;;  %v2591_v24 = vsel %vm2555_vm2, %v642_v20, -1e+30 }
 0x2ce   :  { %v1005_v25 = vrot.slane %v978_v22, %v2546_v39  ;;  %v649_v26 = vsel %vm469_vm5, %v2587_v23, -inf  ;;  %v646_v27 = vsel %vm469_vm5, %v2591_v24, -inf }
 0x2cf   :  { %v821_v29 = vadd.f32 %v820_v21, %v811_v62  ;;  %v822_v30 = vadd.f32 %v820_v21, %v2537_v33  ;;  %650 = vmax.xlane.f32.xlu1 %v649_v26  ;;  %647 = vmax.xlane.f32.xlu0 %v646_v27 }
 0x2d0   :  { %v1006_v31 = vadd.f32 %v1005_v25, %v996_v8  ;;  %v1007_v32 = vadd.f32 %v1005_v25, %v2539_v34 }
 0x2d1   :  { %vm823_vm10 = vcmp.gt.f32.partialorder %v821_v29, 0.0  ;;  %v825_v35 = vmul.f32 0.2, %v821_v29  ;;  %vm824_vm11 = vcmp.gt.f32.partialorder %v822_v30, 0.0  ;;  %v826_v36 = vmul.f32 0.2, %v822_v30 }
 0x2d2   :  { %vm1008_vm12 = vcmp.gt.f32.partialorder %v1006_v31, 0.0  ;;  %v1010_v38 = vmul.f32 0.2, %v1006_v31  ;;  %vm1009_vm13 = vcmp.gt.f32.partialorder %v1007_v32, 0.0  ;;  %v1011_v41 = vmul.f32 0.2, %v1007_v32 }
 0x2d3   :  { %v827_v42 = vsel %vm823_vm10, %v821_v29, %v825_v35  ;;  %v828_v43 = vsel %vm824_vm11, %v822_v30, %v826_v36  ;;  %vm1323_vm10 = vcmask 326912   ;;  %vm1508_vm11 = vcmask 392512  }
 0x2d4   :  { %v1163_v45 = vpop.trf.xlu0  ;;  %v2602_v46 = vsel %vm2555_vm2, %v827_v42, -1e+30  ;;  %v1012_v33 = vsel %vm1008_vm12, %v1006_v31, %v1010_v38  ;;  %v2606_v47 = vsel %vm2566_vm7, %v828_v43, -1e+30  ;;  %v1013_v54 = vsel %vm1009_vm13, %v1007_v32, %v1011_v41 }
 0x2d5   :  { %v1190_v34 = vrot.slane %v1163_v45, %v2546_v39  ;;  %v1533_v48 = vpop.trf.xlu1  ;;  %v831_v50 = vsel %vm469_vm5, %v2602_v46, -inf  ;;  %v2613_v51 = vsel %vm2555_vm2, %v1012_v33, -1e+30  ;;  %v834_v0 = vsel %vm469_vm5, %v2606_v47, -inf }
 0x2d6   :  { %v1560_v55 = vrot.slane %v1533_v48, %v2546_v39  ;;  %832 = vmax.xlane.f32.xlu1 %v831_v50  ;;  %v1016_v56 = vsel %vm469_vm5, %v2613_v51, -inf  ;;  %v2623_v62 = vsel %vm2566_vm7, %v1013_v54, -1e+30  ;;  %vm1693_vm12 = vcmask 458112  }
 0x2d7   :  { %v1191_v57 = vadd.f32 %v1190_v34, %v1181_v3  ;;  %v1192_v58 = vadd.f32 %v1190_v34, %v1185_v1  ;;  %1017 = vmax.xlane.f32.xlu0 %v1016_v56  ;;  %v1019_v1 = vsel %vm469_vm5, %v2623_v62, -inf  ;;  %vm1878_vm13 = vcmask 523712  }
 0x2d8   :  { %v1562_v60 = vadd.f32 %v1560_v55, %v2548_v40  ;;  %v1561_v9 = vadd.f32 %v1560_v55, %v1551_v11 }
 0x2d9   :  { %vm1194_vm14 = vcmp.gt.f32.partialorder %v1192_v58, 0.0  ;;  %v1196_v6 = vmul.f32 0.2, %v1192_v58  ;;  %vm1193_vm15 = vcmp.gt.f32.partialorder %v1191_v57, 0.0  ;;  %v1195_v8 = vmul.f32 0.2, %v1191_v57 }
 0x2da   :  { %835 = vmax.xlane.f32.xlu1 %v834_v0  ;;  %v1566_v13 = vmul.f32 0.2, %v1562_v60  ;;  %vm1564_vm0 = vcmp.gt.f32.partialorder %v1562_v60, 0.0  ;;  %v1565_v18 = vmul.f32 0.2, %v1561_v9  ;;  %vm1563_vm1 = vcmp.gt.f32.partialorder %v1561_v9, 0.0 }
 0x2db   :  { %v1198_v10 = vsel %vm1194_vm14, %v1192_v58, %v1196_v6  ;;  %v1197_v12 = vsel %vm1193_vm15, %v1191_v57, %v1195_v8  ;;  %v2279_v0 = vunpack.i.h.bf16 %v2533_v14  ;;  %v2278_v6 = vunpack.i.l.bf16 %v2533_v14 }
 0x2dc   :  { %v1348_v3 = vpop.trf.xlu0  ;;  %v2629_v40 = vsel %vm2566_vm7, %v1198_v10, -1e+30  ;;  %v2636_v11 = vsel %vm2555_vm2, %v1197_v12, -1e+30  ;;  %v1568_v22 = vsel %vm1564_vm0, %v1562_v60, %v1566_v13  ;;  %v1567_v27 = vsel %vm1563_vm1, %v1561_v9, %v1565_v18 }
 0x2dd   :  { %v1375_v16 = vrot.slane %v1348_v3, %v2546_v39  ;;  %v1204_v17 = vsel %vm469_vm5, %v2629_v40, -inf  ;;  %v1201_v21 = vsel %vm469_vm5, %v2636_v11, -inf  ;;  %v2661_v41 = vsel %vm2555_vm2, %v1567_v27, -1e+30 }
 0x2de   :  { %1020 = vmax.xlane.f32.xlu1 %v1019_v1  ;;  %1205 = vmax.xlane.f32.xlu0 %v1204_v17 }
 0x2df   :  { %v1376_v19 = vadd.f32 %v1375_v16, %v2579_v5  ;;  %v1377_v20 = vadd.f32 %v1375_v16, %v2544_v37  ;;  %v2652_v5 = vsel %vm2566_vm7, %v1568_v22, -1e+30 }
 0x2e0   :  { %v1574_v45 = vsel %vm469_vm5, %v2652_v5, -inf }
 0x2e1   :  { %vm1378_vm3 = vcmp.gt.f32.partialorder %v1376_v19, 0.0  ;;  %v1380_v25 = vmul.f32 0.2, %v1376_v19  ;;  %vm1379_vm4 = vcmp.gt.f32.partialorder %v1377_v20, 0.0  ;;  %v1381_v26 = vmul.f32 0.2, %v1377_v20 }
 0x2e2   :  { %1202 = vmax.xlane.f32.xlu1 %v1201_v21 }
 0x2e3   :  { %v1382_v29 = vsel %vm1378_vm3, %v1376_v19, %v1380_v25  ;;  %v1383_v30 = vsel %vm1379_vm4, %v1377_v20, %v1381_v26 }
 0x2e4   :  { %v1718_v31 = vpop.trf.xlu0  ;;  %v2644_v32 = vsel %vm2555_vm2, %v1382_v29, -1e+30  ;;  %v2648_v37 = vsel %vm2566_vm7, %v1383_v30, -1e+30 }
 0x2e5   :  { %v1745_v35 = vrot.slane %v1718_v31, %v2546_v39  ;;  %v1386_v36 = vsel %vm469_vm5, %v2644_v32, -inf  ;;  %v1389_v38 = vsel %vm469_vm5, %v2648_v37, -inf  ;;  %v1571_v39 = vsel %vm469_vm5, %v2661_v41, -inf }
 0x2e6   :  { %1387 = vmax.xlane.f32.xlu1 %v1386_v36  ;;  %1390 = vmax.xlane.f32.xlu0 %v1389_v38 }
 0x2e7   :  { %v1746_v42 = vadd.f32 %v1745_v35, %v2581_v7  ;;  %v1747_v43 = vadd.f32 %v1745_v35, %v2577_v4 }
 0x2e9   :  { %vm1749_vm6 = vcmp.gt.f32.partialorder %v1747_v43, 0.0  ;;  %v1751_v33 = vmul.f32 0.2, %v1747_v43  ;;  %vm1748_vm8 = vcmp.gt.f32.partialorder %v1746_v42, 0.0  ;;  %v1750_v34 = vmul.f32 0.2, %v1746_v42 }
 0x2ea   :  { %1575 = vmax.xlane.f32.xlu0 %v1574_v45  ;;  %1572 = vmax.xlane.f32.xlu1 %v1571_v39 }
 0x2eb   :  { %v1753_v48 = vsel %vm1749_vm6, %v1747_v43, %v1751_v33  ;;  %v1752_v50 = vsel %vm1748_vm8, %v1746_v42, %v1750_v34 }
 0x2ec   :  { %v2671_v54 = vsel %vm2566_vm7, %v1753_v48, -1e+30  ;;  %v2675_v4 = vsel %vm2555_vm2, %v1752_v50, -1e+30  ;;  %vm581_vm2 = vcmask 64512   ;;  %vm953_vm7 = vcmask 195712  }
 0x2ed   :  { %v1759_v7 = vsel %vm469_vm5, %v2671_v54, -inf  ;;  %v1756_v55 = vsel %vm469_vm5, %v2675_v4, -inf }
 0x2ee   :  { %1760 = vmax.xlane.f32.xlu0 %v1759_v7  ;;  %1757 = vmax.xlane.f32.xlu1 %v1756_v55 }
 0x2ff   :  { %2302 = vrot.lane.b32.xlu1 %v2506_v44, %s2397_s1 }
 0x304   :  { %2307 = vrot.lane.b32.xlu0 %v2506_v44, %s2398_s19 }
 0x308   :  { %940 = vrot.lane.b32.xlu0 %v2494_v28, %s2378_s0 }
 0x30c   :  { %1125 = vrot.lane.b32.xlu0 %v2494_v28, %s2380_s6 }
 0x310   :  { %1310 = vrot.lane.b32.xlu0 %v2494_v28, %s2379_s30 }
 0x314   :  { %v472_v49 = vpop.xlane.xlu1 %471  ;;  %1495 = vrot.lane.b32.xlu0 %v2494_v28, %s2381_s7 }
 0x315   :  { %v476_v59 = vsub.f32 %v2561_v52, %v472_v49  ;;  %v2700_v52 = vpack.c.bf16 %v2279_v0, %v2278_v6 }
 0x317   :  { %v478_v56 = vmul.f32 1.442695, %v476_v59 }
 0x319   :  { %2312 = vpow2.f32 %v478_v56 }
 0x322   :  { %v475_v57 = vpop.xlane.xlu0 %474 }
 0x323   :  { %v2313_v58 = vpop.eup %2312  ;;  %v477_v44 = vsub.f32 %v2572_v63, %v475_v57 }
 0x324   :  { %2062 = vmatprep.mubr.msk.f32.mxu0 %vm469_vm5, %v2313_v58  ;;  %v482_v63 = vsel %vm469_vm5, %v2313_v58, 0.0 }
 0x325   :  { %v480_v60 = vmul.f32 1.442695, %v477_v44 }
 0x327   :  { %2314 = vpow2.f32 %v480_v60 }
 0x331   :  { %v2315_v8 = vpop.eup %2314 }
 0x332   :  { %2063 = vmatmul.mubr.msk.f32.vlgmr.msra.gmra.mrb[4].mxu0 %vm469_vm5, %v2315_v8  ;;  %v485_v9 = vsel %vm469_vm5, %v2315_v8, 0.0 }
 0x333   :  { %2189 = vmatpush3.bf16.msra.mxu0 %v2523_v61  ;;  %486 = vadd.xlane.f32.xlu1 %v485_v9 }
 0x334   :  { %2195 = vmatprep.subr.bf16.mxu0 %v2700_v52 }
 0x337   :  { %483 = vadd.xlane.f32.xlu1 %v482_v63 }
 0x35c   :  { %v648_v10 = vpop.xlane.xlu0 %647  ;;  %v651_v12 = vpop.xlane.xlu1 %650 }
 0x35d   :  { %v652_v3 = vsub.f32 %v2591_v24, %v648_v10  ;;  %v653_v14 = vsub.f32 %v2587_v23, %v651_v12  ;;  %v2284_v24 = vunpack.i.h.bf16 %v2535_v15  ;;  %v2283_v23 = vunpack.i.l.bf16 %v2535_v15 }
 0x35f   :  { %v654_v1 = vmul.f32 1.442695, %v652_v3  ;;  %v656_v13 = vmul.f32 1.442695, %v653_v14 }
 0x361   :  { %2316 = vpow2.f32 %v654_v1 }
 0x362   :  { %2318 = vpow2.f32 %v656_v13 }
 0x363   :  { %v833_v16 = vpop.xlane.xlu1 %832 }
 0x364   :  { %v837_v17 = vsub.f32 %v2602_v46, %v833_v16  ;;  %v1018_v61 = vpop.xlane.xlu0 %1017 }
 0x365   :  { %v1022_v18 = vsub.f32 %v2613_v51, %v1018_v61 }
 0x366   :  { %v839_v19 = vmul.f32 1.442695, %v837_v17 }
 0x367   :  { %v1024_v20 = vmul.f32 1.442695, %v1022_v18  ;;  %v836_v21 = vpop.xlane.xlu1 %835 }
 0x368   :  { %2320 = vpow2.f32 %v839_v19  ;;  %v838_v22 = vsub.f32 %v2606_v47, %v836_v21  ;;  %v2198_v47 = vpack.c.bf16 %v2284_v24, %v2283_v23 }
 0x369   :  { %2322 = vpow2.f32 %v1024_v20 }
 0x36a   :  { %v841_v25 = vmul.f32 1.442695, %v838_v22 }
 0x36b   :  { %v2317_v26 = vpop.eup %2316  ;;  %v1206_v27 = vpop.xlane.xlu0 %1205 }
 0x36c   :  { %v1021_v29 = vpop.xlane.xlu1 %1020  ;;  %v2319_v30 = vpop.eup %2318  ;;  %2324 = vpow2.f32 %v841_v25  ;;  %v1208_v46 = vsub.f32 %v2629_v40, %v1206_v27  ;;  %2069 = vmatprep.mubr.msk.f32.mxu1 %vm469_vm5, %v2317_v26  ;;  %v658_v31 = vsel %vm469_vm5, %v2317_v26, 0.0 }
 0x36d   :  { %v1023_v51 = vsub.f32 %v2623_v62, %v1021_v29  ;;  %659 = vadd.xlane.f32.xlu0 %v658_v31  ;;  %2070 = vmatmul.mubr.msk.f32.vlgmr.msra.gmra.mrb[4].mxu1 %vm469_vm5, %v2319_v30  ;;  %v661_v40 = vsel %vm469_vm5, %v2319_v30, 0.0 }
 0x36e   :  { %v1211_v15 = vmul.f32 1.442695, %v1208_v46  ;;  %2193 = vmatpush3.bf16.msra.mxu1 %v2527_v2 }
 0x36f   :  { %v1026_v35 = vmul.f32 1.442695, %v1023_v51  ;;  %2199 = vmatprep.subr.bf16.mxu1 %v2198_v47 }
 0x370   :  { %v1203_v36 = vpop.xlane.xlu1 %1202 }
 0x371   :  { %v1207_v38 = vsub.f32 %v2636_v11, %v1203_v36  ;;  %2326 = vpow2.f32 %v1026_v35  ;;  %662 = vadd.xlane.f32.xlu0 %v661_v40  ;;  %v2376_v36 = vld [vmem:[%s2823_s4] ss:$0 sm:$0xff]  ;;  %s2399_s4 = smov 8  }
 0x372   :  { %v2321_v62 = vpop.eup %2320  ;;  %2328 = vpow2.f32 %v1211_v15 }
 0x373   :  { %v1209_v42 = vmul.f32 1.442695, %v1207_v38  ;;  %v2323_v43 = vpop.eup %2322  ;;  %v1391_v45 = vpop.xlane.xlu0 %1390  ;;  %2076 = vmatprep.mubr.msk.f32.mxu0 %vm469_vm5, %v2321_v62  ;;  %v843_v33 = vsel %vm469_vm5, %v2321_v62, 0.0 }
 0x374   :  { %v1388_v39 = vpop.xlane.xlu1 %1387  ;;  %v1393_v2 = vsub.f32 %v2648_v37, %v1391_v45  ;;  %2083 = vmatprep.mubr.msk.f32.mxu1 %vm469_vm5, %v2323_v43  ;;  %844 = vadd.xlane.f32.xlu1 %v843_v33  ;;  %v1028_v60 = vsel %vm469_vm5, %v2323_v43, 0.0 }
 0x375   :  { %2330 = vpow2.f32 %v1209_v42  ;;  %v1392_v34 = vsub.f32 %v2644_v32, %v1388_v39 }
 0x376   :  { %v2325_v11 = vpop.eup %2324  ;;  %v1396_v48 = vmul.f32 1.442695, %v1393_v2 }
 0x377   :  { %v1394_v50 = vmul.f32 1.442695, %v1392_v34  ;;  %v1576_v7 = vpop.xlane.xlu0 %1575  ;;  %2077 = vmatmul.mubr.msk.f32.vlgmr.msra.gmra.mrb[6].mxu0 %vm469_vm5, %v2325_v11  ;;  %v846_v49 = vsel %vm469_vm5, %v2325_v11, 0.0 }
 0x378   :  { %v1573_v55 = vpop.xlane.xlu1 %1572  ;;  %2332 = vpow2.f32 %v1396_v48  ;;  %v1578_v59 = vsub.f32 %v2652_v5, %v1576_v7  ;;  %2197 = vmatpush3.bf16.msra.mxu0 %v2700_v52  ;;  %847 = vadd.xlane.f32.xlu0 %v846_v49 }
 0x379   :  { %v1577_v37 = vsub.f32 %v2661_v41, %v1573_v55  ;;  %2334 = vpow2.f32 %v1394_v50 }
 0x37a   :  { %v1581_v32 = vmul.f32 1.442695, %v1578_v59 }
 0x37b   :  { %v1579_v56 = vmul.f32 1.442695, %v1577_v37  ;;  %v2327_v57 = vpop.eup %2326  ;;  %v1761_v58 = vpop.xlane.xlu0 %1760 }
 0x37c   :  { %v1758_v44 = vpop.xlane.xlu1 %1757  ;;  %v2329_v0 = vpop.eup %2328  ;;  %2336 = vpow2.f32 %v1581_v32  ;;  %v1763_v6 = vsub.f32 %v2671_v54, %v1761_v58  ;;  %2084 = vmatmul.mubr.msk.f32.vlgmr.msra.gmra.mrb[6].mxu1 %vm469_vm5, %v2327_v57  ;;  %1029 = vadd.xlane.f32.xlu0 %v1028_v60  ;;  %v1031_v41 = vsel %vm469_vm5, %v2327_v57, 0.0 }
 0x37d   :  { %v1762_v5 = vsub.f32 %v2675_v4, %v1758_v44  ;;  %2338 = vpow2.f32 %v1579_v56  ;;  %2201 = vmatpush3.bf16.msra.mxu1 %v2198_v47  ;;  %1032 = vadd.xlane.f32.xlu1 %v1031_v41  ;;  %v1216_v12 = vsel %vm469_vm5, %v2329_v0, 0.0 }
 0x37e   :  { %v1766_v9 = vmul.f32 1.442695, %v1763_v6 }
 0x37f   :  { %v2331_v8 = vpop.eup %2330  ;;  %v1764_v52 = vmul.f32 1.442695, %v1762_v5  ;;  %v2308_v63 = vpop.permute.xlu0 %2307 }
 0x380   :  { %2090 = vmatprep.mubr.msk.f32.mxu0 %vm469_vm5, %v2331_v8  ;;  %v2303_v10 = vpop.permute.xlu1 %2302  ;;  %v1213_v54 = vsel %vm469_vm5, %v2331_v8, 0.0  ;;  %2340 = vpow2.f32 %v1766_v9  ;;  %v2310_v3 = vunpack.i.h.bf16 %v2308_v63  ;;  %v2309_v4 = vunpack.i.l.bf16 %v2308_v63  ;;  %1217 = vadd.xlane.f32.xlu0 %v1216_v12 }
 0x381   :  { %v2305_v14 = vunpack.i.h.bf16 %v2303_v10  ;;  %2091 = vmatmul.mubr.msk.f32.vlgmr.msra.gmra.mrb[8].mxu0 %vm469_vm5, %v2329_v0  ;;  %2342 = vpow2.f32 %v1764_v52  ;;  %v2304_v1 = vunpack.i.l.bf16 %v2303_v10  ;;  %1214 = vadd.xlane.f32.xlu1 %v1213_v54 }
 0x382   :  { %v2333_v13 = vpop.eup %2332  ;;  %v2206_v16 = vpack.c.bf16 %v2310_v3, %v2309_v4 }
 0x383   :  { %v2335_v17 = vpop.eup %2334  ;;  %v2202_v61 = vpack.c.bf16 %v2305_v14, %v2304_v1  ;;  %v1401_v18 = vsel %vm469_vm5, %v2333_v13, 0.0 }
 0x384   :  { %2097 = vmatprep.mubr.msk.f32.mxu1 %vm469_vm5, %v2335_v17  ;;  %2207 = vmatprep.subr.bf16.mxu1 %v2206_v16  ;;  %v1398_v19 = vsel %vm469_vm5, %v2335_v17, 0.0 }
 0x385   :  { %1402 = vadd.xlane.f32.xlu1 %v1401_v18  ;;  %2098 = vmatmul.mubr.msk.f32.vlgmr.msra.gmra.mrb[8].mxu1 %vm469_vm5, %v2333_v13 }
 0x386   :  { %v2337_v20 = vpop.eup %2336  ;;  %1399 = vadd.xlane.f32.xlu0 %v1398_v19  ;;  %2203 = vmatprep.subr.bf16.mxu0 %v2202_v61 }
 0x387   :  { %v2339_v21 = vpop.eup %2338  ;;  %2205 = vmatpush3.bf16.msra.mxu0 %v2202_v61  ;;  %2209 = vmatpush3.bf16.msra.mxu1 %v2206_v16  ;;  %v1586_v22 = vsel %vm469_vm5, %v2337_v20, 0.0 }
 0x388   :  { %2104 = vmatprep.mubr.msk.f32.mxu0 %vm469_vm5, %v2339_v21  ;;  %v1583_v24 = vsel %vm469_vm5, %v2339_v21, 0.0 }
 0x389   :  { %1584 = vadd.xlane.f32.xlu1 %v1583_v24 }
 0x38a   :  { %v2341_v23 = vpop.eup %2340  ;;  %1587 = vadd.xlane.f32.xlu0 %v1586_v22  ;;  %2105 = vmatmul.mubr.msk.f32.vlgmr.msra.gmra.mrb[10].mxu0 %vm469_vm5, %v2337_v20 }
 0x38b   :  { %v2343_v25 = vpop.eup %2342  ;;  %v1771_v27 = vsel %vm469_vm5, %v2341_v23, 0.0 }
 0x38c   :  { %2111 = vmatprep.mubr.msk.f32.mxu1 %vm469_vm5, %v2343_v25  ;;  %v1768_v26 = vsel %vm469_vm5, %v2343_v25, 0.0 }
 0x38d   :  { %2112 = vmatmul.mubr.msk.f32.vlgmr.msra.gmra.mrb[10].mxu1 %vm469_vm5, %v2341_v23  ;;  %vm768_vm5 = vcmask 130112  }
 0x38e   :  { %1769 = vadd.xlane.f32.xlu0 %v1768_v26 }
 0x392   :  { %1772 = vadd.xlane.f32.xlu0 %v1771_v27 }
 0x39a   :  { %1680 = vrot.lane.b32.xlu1 %v2494_v28, %s2397_s1 }
 0x3a8   :  { %1865 = vrot.lane.b32.xlu0 %v2494_v28, %s2398_s19  ;;  %v941_v28 = vpop.permute.xlu0 %940 }
 0x3ac   :  { %v2764_v62 = vpop.permute.xlu0 %1125 }
 0x3b0   :  { %v2766_v42 = vpop.permute.xlu0 %1310 }
 0x3b4   :  { %v2768_v43 = vpop.permute.xlu0 %1495 }
 0x3c0   :  { %v487_v29 = vpop.xlane.xlu1 %486 }
 0x3c1   :  { %2344 = vrcp.f32 %v487_v29 }
 0x3c4   :  { %v484_v30 = vpop.xlane.xlu1 %483 }
 0x3c5   :  { %2346 = vrcp.f32 %v484_v30 }
 0x3cb   :  { %v2345_v46 = vpop.eup %2344 }
 0x3cf   :  { %v2347_v31 = vpop.eup %2346 }
 0x3fa   :  { %v660_v45 = vpop.xlane.xlu0 %659 }
 0x3fe   :  { %v663_v39 = vpop.xlane.xlu0 %662 }
 0x3ff   :  { %2348 = vrcp.f32 %v663_v39 }
 0x401   :  { %v845_v34 = vpop.xlane.xlu1 %844 }
 0x405   :  { %v2064_v51 = vpop.f32.mrb[4].mxu0  ;;  %v848_v33 = vpop.xlane.xlu0 %847 }
 0x406   :  { %v572_v47 = vmul.f32 %v2345_v46, %v2064_v51  ;;  %v560_v15 = vpop.f32.mrb[5].mxu0  ;;  %2350 = vrcp.f32 %v848_v33 }
 0x407   :  { %v571_v35 = vmul.f32 %v2347_v31, %v560_v15  ;;  %2352 = vrcp.f32 %v660_v45 }
 0x408   :  { %v580_v38 = vadd.f32 %v2376_v36, %v572_v47 }
 0x409   :  { %v579_v40 = vadd.f32 %v2376_v36, %v571_v35  ;;  %v1030_v2 = vpop.xlane.xlu0 %1029  ;;  %v2349_v50 = vpop.eup %2348 }
 0x40a   :  { %583 = vst.msk [vmem:[%s2825_s5 + $0x8] sm:$0xff] %vm581_vm2, %v580_v38  ;;  %v1033_v48 = vpop.xlane.xlu1 %1032 }
 0x40b   :  { %582 = vst.msk [vmem:[%s2825_s5] sm:$0xff] %vm581_vm2, %v579_v40  ;;  %2354 = vrcp.f32 %v1033_v48 }
 0x40c   :  { %2356 = vrcp.f32 %v845_v34 }
 0x40d   :  { %v1218_v11 = vpop.xlane.xlu0 %1217 }
 0x40e   :  { %v1215_v32 = vpop.xlane.xlu1 %1214  ;;  %2358 = vrcp.f32 %v1218_v11 }
 0x40f   :  { %2360 = vrcp.f32 %v1030_v2 }
 0x410   :  { %v2351_v57 = vpop.eup %2350 }
 0x411   :  { %v2353_v6 = vpop.eup %2352 }
 0x412   :  { %v1403_v44 = vpop.xlane.xlu1 %1402 }
 0x413   :  { %v1400_v55 = vpop.xlane.xlu0 %1399  ;;  %2362 = vrcp.f32 %v1403_v44 }
 0x414   :  { %2364 = vrcp.f32 %v1215_v32 }
 0x415   :  { %v2355_v9 = vpop.eup %2354 }
 0x416   :  { %v2357_v63 = vpop.eup %2356  ;;  %v1585_v23 = vpop.xlane.xlu1 %1584 }
 0x417   :  { %v1588_v56 = vpop.xlane.xlu0 %1587 }
 0x418   :  { %v2359_v13 = vpop.eup %2358  ;;  %2366 = vrcp.f32 %v1588_v56 }
 0x419   :  { %v2361_v18 = vpop.eup %2360 }
 0x41b   :  { %v1770_v5 = vpop.xlane.xlu0 %1769 }
 0x41d   :  { %v2363_v19 = vpop.eup %2362 }
 0x41e   :  { %v2365_v26 = vpop.eup %2364 }
 0x41f   :  { %v1773_v14 = vpop.xlane.xlu0 %1772 }
 0x420   :  { %2368 = vrcp.f32 %v1773_v14 }
 0x421   :  { %2370 = vrcp.f32 %v1400_v55 }
 0x422   :  { %2372 = vrcp.f32 %v1585_v23  ;;  %v2367_v51 = vpop.eup %2366 }
 0x423   :  { %v1866_v15 = vpop.permute.xlu0 %1865  ;;  %2374 = vrcp.f32 %v1770_v5 }
 0x42a   :  { %v2369_v31 = vpop.eup %2368 }
 0x440   :  { %v2071_v7 = vpop.f32.mrb[4].mxu1 }
 0x441   :  { %v754_v49 = vmul.f32 %v2349_v50, %v2071_v7  ;;  %v742_v59 = vpop.f32.mrb[5].mxu1 }
 0x442   :  { %v753_v41 = vmul.f32 %v2353_v6, %v742_v59 }
 0x443   :  { %v759_v37 = vadd.f32 %v2521_v53, %v754_v49 }
 0x444   :  { %v758_v54 = vadd.f32 %v2521_v53, %v753_v41 }
 0x445   :  { %764 = vrot.lane.b32.xlu0 %v759_v37, %s2399_s4 }
 0x44a   :  { %v2078_v58 = vpop.f32.mrb[6].mxu0 }
 0x44b   :  { %v939_v60 = vmul.f32 %v2351_v57, %v2078_v58  ;;  %v927_v0 = vpop.f32.mrb[7].mxu0 }
 0x44c   :  { %v938_v3 = vmul.f32 %v2357_v63, %v927_v0 }
 0x44d   :  { %v944_v8 = vadd.f32 %v941_v28, %v939_v60 }
 0x44e   :  { %v943_v17 = vadd.f32 %v941_v28, %v938_v3  ;;  %v1681_v28 = vpop.permute.xlu1 %1680 }
 0x44f   :  { %v2085_v52 = vpop.f32.mrb[6].mxu1  ;;  %949 = vrot.lane.b32.xlu1 %v944_v8, %s2400_s26 }
 0x450   :  { %v1124_v10 = vmul.f32 %v2355_v9, %v2085_v52  ;;  %v1112_v12 = vpop.f32.mrb[7].mxu1 }
 0x451   :  { %v1123_v53 = vmul.f32 %v2361_v18, %v1112_v12 }
 0x452   :  { %v1129_v4 = vadd.f32 %v2764_v62, %v1124_v10 }
 0x453   :  { %762 = vrot.lane.b32.xlu1 %v758_v54, %s2399_s4  ;;  %v1128_v27 = vadd.f32 %v2764_v62, %v1123_v53  ;;  %v2371_v62 = vpop.eup %2370 }
 0x454   :  { %v2092_v1 = vpop.f32.mrb[8].mxu0  ;;  %1134 = vrot.lane.b32.xlu0 %v1129_v4, %s2401_s27  ;;  %v2373_v2 = vpop.eup %2372 }
 0x455   :  { %v1297_v16 = vpop.f32.mrb[9].mxu0  ;;  %v1309_v61 = vmul.f32 %v2359_v13, %v2092_v1 }
 0x456   :  { %v1308_v29 = vmul.f32 %v2365_v26, %v1297_v16 }
 0x457   :  { %947 = vrot.lane.b32.xlu1 %v943_v17, %s2400_s26  ;;  %v1314_v21 = vadd.f32 %v2766_v42, %v1309_v61 }
 0x458   :  { %v2099_v20 = vpop.f32.mrb[8].mxu1  ;;  %v1313_v35 = vadd.f32 %v2766_v42, %v1308_v29  ;;  %v2375_v42 = vpop.eup %2374 }
 0x459   :  { %v1494_v22 = vmul.f32 %v2363_v19, %v2099_v20  ;;  %v1482_v24 = vpop.f32.mrb[9].mxu1 }
 0x45a   :  { %v1493_v39 = vmul.f32 %v2371_v62, %v1482_v24 }
 0x45b   :  { %v1499_v25 = vadd.f32 %v2768_v43, %v1494_v22  ;;  %1319 = vrot.lane.b32.xlu1 %v1314_v21, %s2402_s3 }
 0x45c   :  { %v1498_v34 = vadd.f32 %v2768_v43, %v1493_v39 }
 0x45d   :  { %v2106_v30 = vpop.f32.mrb[10].mxu0  ;;  %1504 = vrot.lane.b32.xlu0 %v1499_v25, %s2403_s2 }
 0x45e   :  { %v1667_v46 = vpop.f32.mrb[11].mxu0  ;;  %v1679_v36 = vmul.f32 %v2367_v51, %v2106_v30 }
 0x45f   :  { %1132 = vrot.lane.b32.xlu1 %v1128_v27, %s2401_s27  ;;  %v1678_v11 = vmul.f32 %v2373_v2, %v1667_v46 }
 0x460   :  { %v2113_v47 = vpop.f32.mrb[10].mxu1  ;;  %v1684_v33 = vadd.f32 %v1681_v28, %v1679_v36 }
 0x461   :  { %v1864_v38 = vmul.f32 %v2369_v31, %v2113_v47  ;;  %v1852_v40 = vpop.f32.mrb[11].mxu1  ;;  %v1683_v48 = vadd.f32 %v1681_v28, %v1678_v11 }
 0x462   :  { %v1863_v50 = vmul.f32 %v2375_v42, %v1852_v40 }
 0x463   :  { %v1869_v45 = vadd.f32 %v1866_v15, %v1864_v38  ;;  %1317 = vrot.lane.b32.xlu1 %v1313_v35, %s2402_s3 }
 0x464   :  { %v1868_v7 = vadd.f32 %v1866_v15, %v1863_v50 }
 0x465   :  { %1874 = vrot.lane.b32.xlu0 %v1869_v45, %s2404_s28 }
 0x467   :  { %1689 = vrot.lane.b32.xlu1 %v1684_v33, %s2405_s29 }
 0x46b   :  { %1502 = vrot.lane.b32.xlu1 %v1498_v34, %s2403_s2 }
 0x46f   :  { %1687 = vrot.lane.b32.xlu1 %v1683_v48, %s2405_s29 }
 0x473   :  { %1872 = vrot.lane.b32.xlu1 %v1868_v7, %s2404_s28 }
 0x4b7   :  { %v765_v55 = vpop.permute.xlu0 %764 }
 0x4b8   :  { %770 = vst.msk [vmem:[%s2825_s5 + $0x8] sm:$0xff] %vm768_vm5, %v765_v55 }
 0x4c1   :  { %v950_v49 = vpop.permute.xlu1 %949 }
 0x4c2   :  { %955 = vst.msk [vmem:[%s2825_s5 + $0x8] sm:$0xff] %vm953_vm7, %v950_v49 }
 0x4c5   :  { %v763_v43 = vpop.permute.xlu1 %762 }
 0x4c6   :  { %v1135_v59 = vpop.permute.xlu0 %1134  ;;  %769 = vst.msk [vmem:[%s2825_s5] sm:$0xff] %vm768_vm5, %v763_v43 }
 0x4c7   :  { %1140 = vst.msk [vmem:[%s2825_s5 + $0x8] sm:$0xff] %vm1138_vm9, %v1135_v59 }
 0x4c9   :  { %v948_v37 = vpop.permute.xlu1 %947 }
 0x4ca   :  { %954 = vst.msk [vmem:[%s2825_s5] sm:$0xff] %vm953_vm7, %v948_v37 }
 0x4cd   :  { %v1320_v32 = vpop.permute.xlu1 %1319 }
 0x4ce   :  { %1325 = vst.msk [vmem:[%s2825_s5 + $0x8] sm:$0xff] %vm1323_vm10, %v1320_v32 }
 0x4cf   :  { %v1505_v56 = vpop.permute.xlu0 %1504 }
 0x4d0   :  { %1510 = vst.msk [vmem:[%s2825_s5 + $0x8] sm:$0xff] %vm1508_vm11, %v1505_v56 }
 0x4d1   :  { %v1133_v57 = vpop.permute.xlu1 %1132 }
 0x4d2   :  { %1139 = vst.msk [vmem:[%s2825_s5] sm:$0xff] %vm1138_vm9, %v1133_v57 }
 0x4d5   :  { %v1318_v58 = vpop.permute.xlu1 %1317 }
 0x4d6   :  { %1324 = vst.msk [vmem:[%s2825_s5] sm:$0xff] %vm1323_vm10, %v1318_v58 }
 0x4d7   :  { %v1875_v60 = vpop.permute.xlu0 %1874 }
 0x4d9   :  { %v1690_v44 = vpop.permute.xlu1 %1689 }
 0x4da   :  { %1695 = vst.msk [vmem:[%s2825_s5 + $0x8] sm:$0xff] %vm1693_vm12, %v1690_v44 }
 0x4db   :  { %1880 = vst.msk [vmem:[%s2825_s5 + $0x8] sm:$0xff] %vm1878_vm13, %v1875_v60 }
 0x4dd   :  { %v1503_v0 = vpop.permute.xlu1 %1502 }
 0x4de   :  { %1509 = vst.msk [vmem:[%s2825_s5] sm:$0xff] %vm1508_vm11, %v1503_v0 }
 0x4e1   :  { %v1688_v6 = vpop.permute.xlu1 %1687 }
 0x4e2   :  { %1694 = vst.msk [vmem:[%s2825_s5] sm:$0xff] %vm1693_vm12, %v1688_v6 }
 0x4e5   :  { %v1873_v5 = vpop.permute.xlu1 %1872 }
 0x4e6   :  { %1879 = vst.msk [vmem:[%s2825_s5] sm:$0xff] %vm1878_vm13, %v1873_v5 }

</bundles_post_ra>
